<compile_context>
chip_gen: v5e
topology: v5e:2x2
jax: 0.10.0
libtpu: 0.0.40
codegen_flags: <defaults>
</compile_context>

<pallas_src>
import functools

import jax
import jax.numpy as jnp
import numpy as np
from jax import lax
from jax.experimental import pallas as pl
from jax.experimental.pallas import tpu as pltpu


def _block_rnn_kernel(
    gate_in_ref,     # [R*L, B, 4H]  precomputed x*W_ih + b_ih + b_hh per (round, cell)
    w_hp_s_ref,      # [L, H, H]     hidden_processor weights, "space" half
    w_cp_s_ref,      # [L, H, H]     cell_processor weights, "space" half
    w_hp_t_bd_ref,   # [L*H, L*H]    block-diagonal "time" weights (hidden_processor)
    w_cp_t_bd_ref,   # [L*H, L*H]    block-diagonal "time" weights (cell_processor)
    b_hp_ref,        # [L, 1, H]
    b_cp_ref,        # [L, 1, H]
    w_hh_ref,        # [L, H, 4H]    LSTMCell hidden weights (x @ W convention)
    w_out_h_ref,     # [H, O]        fc_out, h half
    w_out_c_ref,     # [H, O]        fc_out, c half
    b_out_ref,       # [1, O]
    gamma_ref,       # [1, O]        BatchNorm1d gamma
    beta_ref,        # [1, O]        BatchNorm1d beta
    out_ref,         # [B, O]        sigmoid(bn(fc_out(...))) of the LAST round
    hout_ref,        # [B, H]        final hidden state (h_ext) after last round
    *,
    batch,
    hidden_size,
    chain_length,
    num_rounds,
):
    B, H, L, R = batch, hidden_size, chain_length, num_rounds
    f32 = jnp.float32

    def mm(a, w):
        return jnp.dot(a, w, preferred_element_type=f32)

    zeros_h = jnp.zeros((B, H), f32)
    zeros_chain = jnp.zeros((B, L * H), f32)

    # Lane-packed chain state: column block i holds cell i's (h, c) from the
    # previous round.  [B, L*H] = one dense vreg row-block each.
    h_chain = zeros_chain
    c_chain = zeros_chain
    final_h = zeros_h
    final_c = zeros_h

    # Static unroll over rounds (R small & known at trace time) -> single large
    # basic block for the LLO scheduler; gate_in indexing is static.
    # TODO(synk): for large production R, switch to a round grid (BlockSpec over
    # gate_in, h/c chain carried in VMEM scratch, dimension 'arbitrary') so
    # gate_in is not whole-array VMEM-resident (v7x has only 64 MiB VMEM) and
    # the HBM fetch pipelines against compute; at that point also add a
    # 'parallel' batch axis for v7x's second TensorCore and move the full-batch
    # BatchNorm head to an XLA epilogue, with lane-dense (>=128) output stores.
    for r in range(R):
        # One K = L*H MXU push per processor per round (replaces L separate
        # K = H pushes); depends only on last round's state, so it is off the
        # per-cell serial critical path.
        time_h_all = mm(h_chain, w_hp_t_bd_ref[...])   # [B, L*H]
        time_c_all = mm(c_chain, w_cp_t_bd_ref[...])   # [B, L*H]

        # Per-cell time terms: lane extracts from values available at round
        # start (scheduler can hoist them ahead of the serial chain).
        th_terms = [time_h_all[:, i * H:(i + 1) * H] for i in range(L)]
        tc_terms = [time_c_all[:, i * H:(i + 1) * H] for i in range(L)]

        if r == 0:
            # External state starts at zeros.
            h_space, c_space = zeros_h, zeros_h
        else:
            # h_ext/c_ext == chain[-1] of the previous round.
            h_space = h_chain[:, (L - 1) * H:]
            c_space = c_chain[:, (L - 1) * H:]

        new_h, new_c = [], []
        for i in range(L):                       # static unroll over the chain
            processed_h = jnp.maximum(
                mm(h_space, w_hp_s_ref[i]) + th_terms[i] + b_hp_ref[i], 0.0)   # [B, H]
            processed_c = jnp.maximum(
                mm(c_space, w_cp_s_ref[i]) + tc_terms[i] + b_cp_ref[i], 0.0)   # [B, H]

            gates = gate_in_ref[r * L + i] + mm(processed_h, w_hh_ref[i])      # [B, 4H]

            sig = jax.nn.sigmoid(gates)          # one full-vreg EUP pass
            th = jnp.tanh(gates)                 # one full-vreg EUP pass
            # TODO(synk): if the bundle dump shows per-cell vrot relayouts from
            # these lane-offset slices sitting on the serial path, pre-permute
            # w_hh columns / gate_in so each gate lands where it is consumed.
            i_g = sig[:, 0 * H:1 * H]
            f_g = sig[:, 1 * H:2 * H]
            g_g = th[:, 2 * H:3 * H]
            o_g = sig[:, 3 * H:4 * H]

            c_new = f_g * processed_c + i_g * g_g
            h_new = o_g * jnp.tanh(c_new)

            new_h.append(h_new)
            new_c.append(c_new)
            h_space, c_space = h_new, c_new      # next cell's "space" neighbor

        # Repack lane-dense chain state for the next round (2 concats/round,
        # off the per-cell chain; far cheaper than the 8 MXU pushes it saves).
        h_chain = jnp.concatenate(new_h, axis=1)
        c_chain = jnp.concatenate(new_c, axis=1)
        final_h, final_c = new_h[-1], new_c[-1]

    # Output head, run ONCE after the last round:
    # fc_out (Linear + ReLU) -> BatchNorm1d (training, batch stats) -> sigmoid.
    out = jnp.maximum(
        mm(final_h, w_out_h_ref[...]) + mm(final_c, w_out_c_ref[...]) + b_out_ref[...],
        0.0)                                                           # [B, O]
    # Whole-array (unblocked) refs: axis-0 mean/var sees exactly B rows.
    mean = jnp.mean(out, axis=0, keepdims=True)
    var = jnp.mean((out - mean) ** 2, axis=0, keepdims=True)           # biased variance
    out_bn = gamma_ref[...] * (out - mean) * lax.rsqrt(var + 1e-5) + beta_ref[...]
    out_ref[...] = jax.nn.sigmoid(out_bn)
    hout_ref[...] = final_h


def _block_diag(w):
    """[L, H, H] per-cell blocks -> [L*H, L*H] block-diagonal matrix."""
    L, H, _ = w.shape
    eye = jnp.eye(L, dtype=w.dtype)
    bd = eye[:, None, :, None] * w[:, :, None, :]        # [L, H, L, H]
    return bd.reshape(L * H, L * H)


def _tile_padded_bytes(shape, dtype):
    """Bytes of an array once padded to TPU (8, 128) tiles (last two dims)."""
    shape = tuple(shape)
    if len(shape) < 2:
        shape = (1,) * (2 - len(shape)) + shape
    *lead, sub, lane = shape
    sub_p = ((sub + 7) // 8) * 8
    lane_p = ((lane + 127) // 128) * 128
    n_lead = 1
    for d in lead:
        n_lead *= int(d)
    return n_lead * sub_p * lane_p * np.dtype(dtype).itemsize


def block_rnn_forward(x, params, *, hidden_size, output_size, chain_length, num_rounds):
    """x: [B, num_rounds, chain_length] float32.  Returns (output [B, O], h_ext [B, H])."""
    (w_hp, b_hp, w_cp, b_cp, w_ih, b_ih, w_hh, b_hh, w_out, b_out, gamma, beta) = params
    B = x.shape[0]
    H, L, O, R = hidden_size, chain_length, output_size, num_rounds
    x = x.astype(jnp.float32)

    # Precompute the scalar-input gate term once, vectorized over all rounds/cells:
    #   gate_in[r, i] = x[:, r, i, None] * W_ih[i] + b_ih[i] + b_hh[i]   -> [B, 4H]
    gate_in = (x[:, :, :, None] * w_ih[None, :, 0, :]
               + (b_ih + b_hh)[None, :, 0, :])                    # [B, R, L, 4H]
    gate_in = jnp.transpose(gate_in, (1, 2, 0, 3)).reshape(R * L, B, 4 * H)

    # Split processor weights into "space"/"time" halves; pack the time halves
    # into one block-diagonal [L*H, L*H] matrix per processor (single K=L*H
    # MXU op per round instead of L separate K=H ops).
    w_hp_s, w_hp_t = w_hp[:, :H, :], w_hp[:, H:, :]
    w_cp_s, w_cp_t = w_cp[:, :H, :], w_cp[:, H:, :]
    w_hp_t_bd = _block_diag(w_hp_t)
    w_cp_t_bd = _block_diag(w_cp_t)
    w_out_h, w_out_c = w_out[:H, :], w_out[H:, :]

    kernel = functools.partial(
        _block_rnn_kernel, batch=B, hidden_size=H, chain_length=L, num_rounds=R)

    vmem = pl.BlockSpec(memory_space=pltpu.MemorySpace.VMEM)
    inputs = (gate_in, w_hp_s, w_cp_s, w_hp_t_bd, w_cp_t_bd, b_hp, b_cp,
              w_hh, w_out_h, w_out_c, b_out, gamma, beta)
    out_shapes = (jax.ShapeDtypeStruct((B, O), jnp.float32),
                  jax.ShapeDtypeStruct((B, H), jnp.float32))

    # Tight, computed VMEM claim (no grid -> single-buffered, whole-array
    # resident): padded operand footprint x2 + margin, floor of 8 MiB.
    footprint = sum(_tile_padded_bytes(a.shape, a.dtype) for a in inputs)
    footprint += sum(_tile_padded_bytes(s.shape, s.dtype) for s in out_shapes)
    vmem_limit = int(max(2 * footprint + (2 << 20), 8 << 20))

    out, h_final = pl.pallas_call(
        kernel,
        out_shape=out_shapes,
        in_specs=[vmem] * len(inputs),
        out_specs=(vmem, vmem),
        compiler_params=pltpu.CompilerParams(vmem_limit_bytes=vmem_limit),
    )(*inputs)
    return out, h_final


def block_rnn_reference(x, params, *, hidden_size, output_size, chain_length, num_rounds):
    """Pure-JAX mirror of the PyTorch forward, for validation."""
    (w_hp, b_hp, w_cp, b_cp, w_ih, b_ih, w_hh, b_hh, w_out, b_out, gamma, beta) = params
    B, H = x.shape[0], hidden_size
    h_ext = jnp.zeros((B, H), jnp.float32)
    c_ext = jnp.zeros((B, H), jnp.float32)
    chain = [(h_ext, c_ext) for _ in range(chain_length)]
    output = None
    for r in range(num_rounds):
        xr = x[:, r, :]
        for i in range(chain_length):
            h_time, c_time = chain[i]
            h_space, c_space = (h_ext, c_ext) if i == 0 else chain[i - 1]
            ph = jax.nn.relu(jnp.concatenate([h_space, h_time], 1) @ w_hp[i] + b_hp[i, 0])
            pc = jax.nn.relu(jnp.concatenate([c_space, c_time], 1) @ w_cp[i] + b_cp[i, 0])
            gates = xr[:, i:i + 1] * w_ih[i, 0] + b_ih[i, 0] + ph @ w_hh[i] + b_hh[i, 0]
            ig = jax.nn.sigmoid(gates[:, :H])
            fg = jax.nn.sigmoid(gates[:, H:2 * H])
            gg = jnp.tanh(gates[:, 2 * H:3 * H])
            og = jax.nn.sigmoid(gates[:, 3 * H:])
            c_new = fg * pc + ig * gg
            h_new = og * jnp.tanh(c_new)
            chain[i] = (h_new, c_new)
        final_h, final_c = chain[-1]
        out = jax.nn.relu(jnp.concatenate([final_h, final_c], 1) @ w_out + b_out[0])
        mean = jnp.mean(out, axis=0, keepdims=True)
        var = jnp.mean((out - mean) ** 2, axis=0, keepdims=True)
        out = gamma[0] * (out - mean) / jnp.sqrt(var + 1e-5) + beta[0]
        output = jax.nn.sigmoid(out)
        h_ext, c_ext = final_h, final_c
    return output, h_ext


def init_params(key, *, hidden_size, output_size, chain_length):
    H, O, L = hidden_size, output_size, chain_length
    ks = jax.random.split(key, 10)
    u = lambda k, shape: jax.random.uniform(k, shape, jnp.float32, -0.1, 0.1)
    w_hp = u(ks[0], (L, 2 * H, H))
    b_hp = u(ks[1], (L, 1, H))
    w_cp = u(ks[2], (L, 2 * H, H))
    b_cp = u(ks[3], (L, 1, H))
    w_ih = u(ks[4], (L, 1, 4 * H))
    b_ih = u(ks[5], (L, 1, 4 * H))
    w_hh = u(ks[6], (L, H, 4 * H))
    b_hh = u(ks[7], (L, 1, 4 * H))
    w_out = u(ks[8], (2 * H, O))
    b_out = u(ks[9], (1, O))
    gamma = jnp.ones((1, O), jnp.float32)
    beta = jnp.zeros((1, O), jnp.float32)
    return (w_hp, b_hp, w_cp, b_cp, w_ih, b_ih, w_hh, b_hh, w_out, b_out, gamma, beta)


if __name__ == "__main__":
    # Small shapes consistent with the module's forward:
    #   input_size = 1 (per-cell scalar), grid_size == chain_length.
    B, H, O, L, R = 8, 32, 8, 4, 3

    key = jax.random.PRNGKey(0)
    kx, kp = jax.random.split(key)
    x = jax.random.normal(kx, (B, R, L), jnp.float32)   # [batch, num_rounds, chain_length]
    params = init_params(kp, hidden_size=H, output_size=O, chain_length=L)

    out, h_final = block_rnn_forward(
        x, params, hidden_size=H, output_size=O, chain_length=L, num_rounds=R)
    out = jax.block_until_ready(out)
    h_final = jax.block_until_ready(h_final)

    out_ref, h_ref = block_rnn_reference(
        x, params, hidden_size=H, output_size=O, chain_length=L, num_rounds=R)
    np.testing.assert_allclose(np.asarray(out), np.asarray(out_ref), rtol=3e-4, atol=3e-5)
    np.testing.assert_allclose(np.asarray(h_final), np.asarray(h_ref), rtol=3e-4, atol=3e-5)

    print("KERNEL_OK")
</pallas_src>

<mosaic_0001>
module attributes {stable_mosaic.version = 11 : i64} {
  func.func @_block_rnn_kernel(%arg0: memref<12x8x128xf32, #tpu.memory_space<vmem>>, %arg1: memref<4x32x32xf32, #tpu.memory_space<vmem>>, %arg2: memref<4x32x32xf32, #tpu.memory_space<vmem>>, %arg3: memref<128x128xf32, #tpu.memory_space<vmem>>, %arg4: memref<128x128xf32, #tpu.memory_space<vmem>>, %arg5: memref<4x1x32xf32, #tpu.memory_space<vmem>>, %arg6: memref<4x1x32xf32, #tpu.memory_space<vmem>>, %arg7: memref<4x32x128xf32, #tpu.memory_space<vmem>>, %arg8: memref<32x8xf32, #tpu.memory_space<vmem>>, %arg9: memref<32x8xf32, #tpu.memory_space<vmem>>, %arg10: memref<1x8xf32, #tpu.memory_space<vmem>>, %arg11: memref<1x8xf32, #tpu.memory_space<vmem>>, %arg12: memref<1x8xf32, #tpu.memory_space<vmem>>, %arg13: memref<8x8xf32, #tpu.memory_space<vmem>>, %arg14: memref<8x32xf32, #tpu.memory_space<vmem>>) attributes {dimension_semantics = [], scalar_prefetch = 0 : i64, scratch_operands = 0 : i64, tpu.core_type = #tpu.core_type<tc>} {
    %cst = arith.constant 0.000000e+00 : f32
    %0 = vector.broadcast %cst : f32 to vector<8x32xf32>
    %cst_0 = arith.constant 0.000000e+00 : f32
    %1 = vector.broadcast %cst_0 : f32 to vector<8x128xf32>
    %c0 = arith.constant 0 : index
    %c0_1 = arith.constant 0 : index
    %2 = vector.load %arg3[%c0, %c0_1] : memref<128x128xf32, #tpu.memory_space<vmem>>, vector<128x128xf32>
    %cst_2 = arith.constant dense<0.000000e+00> : vector<8x128xf32>
    %3 = tpu.matmul %1, %2, %cst_2 {dimension_numbers = #tpu.dot_dimension_numbers<[1], [0], [0], [1], [0, 0, 1, 1], [], []>} : vector<8x128xf32>, vector<128x128xf32>, vector<8x128xf32> -> vector<8x128xf32>
    %c0_3 = arith.constant 0 : index
    %c0_4 = arith.constant 0 : index
    %4 = vector.load %arg4[%c0_3, %c0_4] : memref<128x128xf32, #tpu.memory_space<vmem>>, vector<128x128xf32>
    %cst_5 = arith.constant dense<0.000000e+00> : vector<8x128xf32>
    %5 = tpu.matmul %1, %4, %cst_5 {dimension_numbers = #tpu.dot_dimension_numbers<[1], [0], [0], [1], [0, 0, 1, 1], [], []>} : vector<8x128xf32>, vector<128x128xf32>, vector<8x128xf32> -> vector<8x128xf32>
    %6 = vector.extract_strided_slice %3 {offsets = [0, 0], sizes = [8, 32], strides = [1, 1]} : vector<8x128xf32> to vector<8x32xf32>
    %7 = vector.extract_strided_slice %3 {offsets = [0, 32], sizes = [8, 32], strides = [1, 1]} : vector<8x128xf32> to vector<8x32xf32>
    %8 = vector.extract_strided_slice %3 {offsets = [0, 64], sizes = [8, 32], strides = [1, 1]} : vector<8x128xf32> to vector<8x32xf32>
    %9 = vector.extract_strided_slice %3 {offsets = [0, 96], sizes = [8, 32], strides = [1, 1]} : vector<8x128xf32> to vector<8x32xf32>
    %10 = vector.extract_strided_slice %5 {offsets = [0, 0], sizes = [8, 32], strides = [1, 1]} : vector<8x128xf32> to vector<8x32xf32>
    %11 = vector.extract_strided_slice %5 {offsets = [0, 32], sizes = [8, 32], strides = [1, 1]} : vector<8x128xf32> to vector<8x32xf32>
    %12 = vector.extract_strided_slice %5 {offsets = [0, 64], sizes = [8, 32], strides = [1, 1]} : vector<8x128xf32> to vector<8x32xf32>
    %13 = vector.extract_strided_slice %5 {offsets = [0, 96], sizes = [8, 32], strides = [1, 1]} : vector<8x128xf32> to vector<8x32xf32>
    %c0_6 = arith.constant 0 : index
    %c0_7 = arith.constant 0 : index
    %c0_8 = arith.constant 0 : index
    %14 = vector.load %arg1[%c0_6, %c0_7, %c0_8] : memref<4x32x32xf32, #tpu.memory_space<vmem>>, vector<1x32x32xf32>
    %15 = vector.shape_cast %14 : vector<1x32x32xf32> to vector<32x32xf32>
    %cst_9 = arith.constant dense<0.000000e+00> : vector<8x32xf32>
    %16 = tpu.matmul %0, %15, %cst_9 {dimension_numbers = #tpu.dot_dimension_numbers<[1], [0], [0], [1], [0, 0, 1, 1], [], []>} : vector<8x32xf32>, vector<32x32xf32>, vector<8x32xf32> -> vector<8x32xf32>
    %17 = arith.addf %16, %6 : vector<8x32xf32>
    %c0_10 = arith.constant 0 : index
    %c0_11 = arith.constant 0 : index
    %c0_12 = arith.constant 0 : index
    %18 = vector.load %arg5[%c0_10, %c0_11, %c0_12] : memref<4x1x32xf32, #tpu.memory_space<vmem>>, vector<1x1x32xf32>
    %19 = vector.shape_cast %18 : vector<1x1x32xf32> to vector<1x32xf32>
    %20 = vector.broadcast %19 : vector<1x32xf32> to vector<8x32xf32>
    %21 = arith.addf %17, %20 : vector<8x32xf32>
    %cst_13 = arith.constant 0.000000e+00 : f32
    %22 = vector.broadcast %cst_13 : f32 to vector<8x32xf32>
    %23 = arith.maximumf %21, %22 : vector<8x32xf32>
    %c0_14 = arith.constant 0 : index
    %c0_15 = arith.constant 0 : index
    %c0_16 = arith.constant 0 : index
    %24 = vector.load %arg2[%c0_14, %c0_15, %c0_16] : memref<4x32x32xf32, #tpu.memory_space<vmem>>, vector<1x32x32xf32>
    %25 = vector.shape_cast %24 : vector<1x32x32xf32> to vector<32x32xf32>
    %cst_17 = arith.constant dense<0.000000e+00> : vector<8x32xf32>
    %26 = tpu.matmul %0, %25, %cst_17 {dimension_numbers = #tpu.dot_dimension_numbers<[1], [0], [0], [1], [0, 0, 1, 1], [], []>} : vector<8x32xf32>, vector<32x32xf32>, vector<8x32xf32> -> vector<8x32xf32>
    %27 = arith.addf %26, %10 : vector<8x32xf32>
    %c0_18 = arith.constant 0 : index
    %c0_19 = arith.constant 0 : index
    %c0_20 = arith.constant 0 : index
    %28 = vector.load %arg6[%c0_18, %c0_19, %c0_20] : memref<4x1x32xf32, #tpu.memory_space<vmem>>, vector<1x1x32xf32>
    %29 = vector.shape_cast %28 : vector<1x1x32xf32> to vector<1x32xf32>
    %30 = vector.broadcast %29 : vector<1x32xf32> to vector<8x32xf32>
    %31 = arith.addf %27, %30 : vector<8x32xf32>
    %cst_21 = arith.constant 0.000000e+00 : f32
    %32 = vector.broadcast %cst_21 : f32 to vector<8x32xf32>
    %33 = arith.maximumf %31, %32 : vector<8x32xf32>
    %c0_22 = arith.constant 0 : index
    %c0_23 = arith.constant 0 : index
    %c0_24 = arith.constant 0 : index
    %34 = vector.load %arg0[%c0_22, %c0_23, %c0_24] : memref<12x8x128xf32, #tpu.memory_space<vmem>>, vector<1x8x128xf32>
    %35 = vector.shape_cast %34 : vector<1x8x128xf32> to vector<8x128xf32>
    %c0_25 = arith.constant 0 : index
    %c0_26 = arith.constant 0 : index
    %c0_27 = arith.constant 0 : index
    %36 = vector.load %arg7[%c0_25, %c0_26, %c0_27] : memref<4x32x128xf32, #tpu.memory_space<vmem>>, vector<1x32x128xf32>
    %37 = vector.shape_cast %36 : vector<1x32x128xf32> to vector<32x128xf32>
    %cst_28 = arith.constant dense<0.000000e+00> : vector<8x128xf32>
    %38 = tpu.matmul %23, %37, %cst_28 {dimension_numbers = #tpu.dot_dimension_numbers<[1], [0], [0], [1], [0, 0, 1, 1], [], []>} : vector<8x32xf32>, vector<32x128xf32>, vector<8x128xf32> -> vector<8x128xf32>
    %39 = arith.addf %35, %38 : vector<8x128xf32>
    %40 = arith.negf %39 : vector<8x128xf32>
    %41 = math.exp %40 : vector<8x128xf32>
    %cst_29 = arith.constant 1.000000e+00 : f32
    %42 = vector.broadcast %cst_29 : f32 to vector<8x128xf32>
    %43 = arith.addf %42, %41 : vector<8x128xf32>
    %44 = arith.divf %42, %43 : vector<8x128xf32>
    %45 = math.tanh %39 : vector<8x128xf32>
    %46 = vector.extract_strided_slice %44 {offsets = [0, 0], sizes = [8, 32], strides = [1, 1]} : vector<8x128xf32> to vector<8x32xf32>
    %47 = vector.extract_strided_slice %44 {offsets = [0, 32], sizes = [8, 32], strides = [1, 1]} : vector<8x128xf32> to vector<8x32xf32>
    %48 = vector.extract_strided_slice %45 {offsets = [0, 64], sizes = [8, 32], strides = [1, 1]} : vector<8x128xf32> to vector<8x32xf32>
    %49 = vector.extract_strided_slice %44 {offsets = [0, 96], sizes = [8, 32], strides = [1, 1]} : vector<8x128xf32> to vector<8x32xf32>
    %50 = arith.mulf %47, %33 : vector<8x32xf32>
    %51 = arith.mulf %46, %48 : vector<8x32xf32>
    %52 = arith.addf %50, %51 : vector<8x32xf32>
    %53 = math.tanh %52 : vector<8x32xf32>
    %54 = arith.mulf %49, %53 : vector<8x32xf32>
    %c1 = arith.constant 1 : index
    %c0_30 = arith.constant 0 : index
    %c0_31 = arith.constant 0 : index
    %55 = vector.load %arg1[%c1, %c0_30, %c0_31] : memref<4x32x32xf32, #tpu.memory_space<vmem>>, vector<1x32x32xf32>
    %56 = vector.shape_cast %55 : vector<1x32x32xf32> to vector<32x32xf32>
    %cst_32 = arith.constant dense<0.000000e+00> : vector<8x32xf32>
    %57 = tpu.matmul %54, %56, %cst_32 {dimension_numbers = #tpu.dot_dimension_numbers<[1], [0], [0], [1], [0, 0, 1, 1], [], []>} : vector<8x32xf32>, vector<32x32xf32>, vector<8x32xf32> -> vector<8x32xf32>
    %58 = arith.addf %57, %7 : vector<8x32xf32>
    %c1_33 = arith.constant 1 : index
    %c0_34 = arith.constant 0 : index
    %c0_35 = arith.constant 0 : index
    %59 = vector.load %arg5[%c1_33, %c0_34, %c0_35] : memref<4x1x32xf32, #tpu.memory_space<vmem>>, vector<1x1x32xf32>
    %60 = vector.shape_cast %59 : vector<1x1x32xf32> to vector<1x32xf32>
    %61 = vector.broadcast %60 : vector<1x32xf32> to vector<8x32xf32>
    %62 = arith.addf %58, %61 : vector<8x32xf32>
    %cst_36 = arith.constant 0.000000e+00 : f32
    %63 = vector.broadcast %cst_36 : f32 to vector<8x32xf32>
    %64 = arith.maximumf %62, %63 : vector<8x32xf32>
    %c1_37 = arith.constant 1 : index
    %c0_38 = arith.constant 0 : index
    %c0_39 = arith.constant 0 : index
    %65 = vector.load %arg2[%c1_37, %c0_38, %c0_39] : memref<4x32x32xf32, #tpu.memory_space<vmem>>, vector<1x32x32xf32>
    %66 = vector.shape_cast %65 : vector<1x32x32xf32> to vector<32x32xf32>
    %cst_40 = arith.constant dense<0.000000e+00> : vector<8x32xf32>
    %67 = tpu.matmul %52, %66, %cst_40 {dimension_numbers = #tpu.dot_dimension_numbers<[1], [0], [0], [1], [0, 0, 1, 1], [], []>} : vector<8x32xf32>, vector<32x32xf32>, vector<8x32xf32> -> vector<8x32xf32>
    %68 = arith.addf %67, %11 : vector<8x32xf32>
    %c1_41 = arith.constant 1 : index
    %c0_42 = arith.constant 0 : index
    %c0_43 = arith.constant 0 : index
    %69 = vector.load %arg6[%c1_41, %c0_42, %c0_43] : memref<4x1x32xf32, #tpu.memory_space<vmem>>, vector<1x1x32xf32>
    %70 = vector.shape_cast %69 : vector<1x1x32xf32> to vector<1x32xf32>
    %71 = vector.broadcast %70 : vector<1x32xf32> to vector<8x32xf32>
    %72 = arith.addf %68, %71 : vector<8x32xf32>
    %cst_44 = arith.constant 0.000000e+00 : f32
    %73 = vector.broadcast %cst_44 : f32 to vector<8x32xf32>
    %74 = arith.maximumf %72, %73 : vector<8x32xf32>
    %c1_45 = arith.constant 1 : index
    %c0_46 = arith.constant 0 : index
    %c0_47 = arith.constant 0 : index
    %75 = vector.load %arg0[%c1_45, %c0_46, %c0_47] : memref<12x8x128xf32, #tpu.memory_space<vmem>>, vector<1x8x128xf32>
    %76 = vector.shape_cast %75 : vector<1x8x128xf32> to vector<8x128xf32>
    %c1_48 = arith.constant 1 : index
    %c0_49 = arith.constant 0 : index
    %c0_50 = arith.constant 0 : index
    %77 = vector.load %arg7[%c1_48, %c0_49, %c0_50] : memref<4x32x128xf32, #tpu.memory_space<vmem>>, vector<1x32x128xf32>
    %78 = vector.shape_cast %77 : vector<1x32x128xf32> to vector<32x128xf32>
    %cst_51 = arith.constant dense<0.000000e+00> : vector<8x128xf32>
    %79 = tpu.matmul %64, %78, %cst_51 {dimension_numbers = #tpu.dot_dimension_numbers<[1], [0], [0], [1], [0, 0, 1, 1], [], []>} : vector<8x32xf32>, vector<32x128xf32>, vector<8x128xf32> -> vector<8x128xf32>
    %80 = arith.addf %76, %79 : vector<8x128xf32>
    %81 = arith.negf %80 : vector<8x128xf32>
    %82 = math.exp %81 : vector<8x128xf32>
    %cst_52 = arith.constant 1.000000e+00 : f32
    %83 = vector.broadcast %cst_52 : f32 to vector<8x128xf32>
    %84 = arith.addf %83, %82 : vector<8x128xf32>
    %85 = arith.divf %83, %84 : vector<8x128xf32>
    %86 = math.tanh %80 : vector<8x128xf32>
    %87 = vector.extract_strided_slice %85 {offsets = [0, 0], sizes = [8, 32], strides = [1, 1]} : vector<8x128xf32> to vector<8x32xf32>
    %88 = vector.extract_strided_slice %85 {offsets = [0, 32], sizes = [8, 32], strides = [1, 1]} : vector<8x128xf32> to vector<8x32xf32>
    %89 = vector.extract_strided_slice %86 {offsets = [0, 64], sizes = [8, 32], strides = [1, 1]} : vector<8x128xf32> to vector<8x32xf32>
    %90 = vector.extract_strided_slice %85 {offsets = [0, 96], sizes = [8, 32], strides = [1, 1]} : vector<8x128xf32> to vector<8x32xf32>
    %91 = arith.mulf %88, %74 : vector<8x32xf32>
    %92 = arith.mulf %87, %89 : vector<8x32xf32>
    %93 = arith.addf %91, %92 : vector<8x32xf32>
    %94 = math.tanh %93 : vector<8x32xf32>
    %95 = arith.mulf %90, %94 : vector<8x32xf32>
    %c2 = arith.constant 2 : index
    %c0_53 = arith.constant 0 : index
    %c0_54 = arith.constant 0 : index
    %96 = vector.load %arg1[%c2, %c0_53, %c0_54] : memref<4x32x32xf32, #tpu.memory_space<vmem>>, vector<1x32x32xf32>
    %97 = vector.shape_cast %96 : vector<1x32x32xf32> to vector<32x32xf32>
    %cst_55 = arith.constant dense<0.000000e+00> : vector<8x32xf32>
    %98 = tpu.matmul %95, %97, %cst_55 {dimension_numbers = #tpu.dot_dimension_numbers<[1], [0], [0], [1], [0, 0, 1, 1], [], []>} : vector<8x32xf32>, vector<32x32xf32>, vector<8x32xf32> -> vector<8x32xf32>
    %99 = arith.addf %98, %8 : vector<8x32xf32>
    %c2_56 = arith.constant 2 : index
    %c0_57 = arith.constant 0 : index
    %c0_58 = arith.constant 0 : index
    %100 = vector.load %arg5[%c2_56, %c0_57, %c0_58] : memref<4x1x32xf32, #tpu.memory_space<vmem>>, vector<1x1x32xf32>
    %101 = vector.shape_cast %100 : vector<1x1x32xf32> to vector<1x32xf32>
    %102 = vector.broadcast %101 : vector<1x32xf32> to vector<8x32xf32>
    %103 = arith.addf %99, %102 : vector<8x32xf32>
    %cst_59 = arith.constant 0.000000e+00 : f32
    %104 = vector.broadcast %cst_59 : f32 to vector<8x32xf32>
    %105 = arith.maximumf %103, %104 : vector<8x32xf32>
    %c2_60 = arith.constant 2 : index
    %c0_61 = arith.constant 0 : index
    %c0_62 = arith.constant 0 : index
    %106 = vector.load %arg2[%c2_60, %c0_61, %c0_62] : memref<4x32x32xf32, #tpu.memory_space<vmem>>, vector<1x32x32xf32>
    %107 = vector.shape_cast %106 : vector<1x32x32xf32> to vector<32x32xf32>
    %cst_63 = arith.constant dense<0.000000e+00> : vector<8x32xf32>
    %108 = tpu.matmul %93, %107, %cst_63 {dimension_numbers = #tpu.dot_dimension_numbers<[1], [0], [0], [1], [0, 0, 1, 1], [], []>} : vector<8x32xf32>, vector<32x32xf32>, vector<8x32xf32> -> vector<8x32xf32>
    %109 = arith.addf %108, %12 : vector<8x32xf32>
    %c2_64 = arith.constant 2 : index
    %c0_65 = arith.constant 0 : index
    %c0_66 = arith.constant 0 : index
    %110 = vector.load %arg6[%c2_64, %c0_65, %c0_66] : memref<4x1x32xf32, #tpu.memory_space<vmem>>, vector<1x1x32xf32>
    %111 = vector.shape_cast %110 : vector<1x1x32xf32> to vector<1x32xf32>
    %112 = vector.broadcast %111 : vector<1x32xf32> to vector<8x32xf32>
    %113 = arith.addf %109, %112 : vector<8x32xf32>
    %cst_67 = arith.constant 0.000000e+00 : f32
    %114 = vector.broadcast %cst_67 : f32 to vector<8x32xf32>
    %115 = arith.maximumf %113, %114 : vector<8x32xf32>
    %c2_68 = arith.constant 2 : index
    %c0_69 = arith.constant 0 : index
    %c0_70 = arith.constant 0 : index
    %116 = vector.load %arg0[%c2_68, %c0_69, %c0_70] : memref<12x8x128xf32, #tpu.memory_space<vmem>>, vector<1x8x128xf32>
    %117 = vector.shape_cast %116 : vector<1x8x128xf32> to vector<8x128xf32>
    %c2_71 = arith.constant 2 : index
    %c0_72 = arith.constant 0 : index
    %c0_73 = arith.constant 0 : index
    %118 = vector.load %arg7[%c2_71, %c0_72, %c0_73] : memref<4x32x128xf32, #tpu.memory_space<vmem>>, vector<1x32x128xf32>
    %119 = vector.shape_cast %118 : vector<1x32x128xf32> to vector<32x128xf32>
    %cst_74 = arith.constant dense<0.000000e+00> : vector<8x128xf32>
    %120 = tpu.matmul %105, %119, %cst_74 {dimension_numbers = #tpu.dot_dimension_numbers<[1], [0], [0], [1], [0, 0, 1, 1], [], []>} : vector<8x32xf32>, vector<32x128xf32>, vector<8x128xf32> -> vector<8x128xf32>
    %121 = arith.addf %117, %120 : vector<8x128xf32>
    %122 = arith.negf %121 : vector<8x128xf32>
    %123 = math.exp %122 : vector<8x128xf32>
    %cst_75 = arith.constant 1.000000e+00 : f32
    %124 = vector.broadcast %cst_75 : f32 to vector<8x128xf32>
    %125 = arith.addf %124, %123 : vector<8x128xf32>
    %126 = arith.divf %124, %125 : vector<8x128xf32>
    %127 = math.tanh %121 : vector<8x128xf32>
    %128 = vector.extract_strided_slice %126 {offsets = [0, 0], sizes = [8, 32], strides = [1, 1]} : vector<8x128xf32> to vector<8x32xf32>
    %129 = vector.extract_strided_slice %126 {offsets = [0, 32], sizes = [8, 32], strides = [1, 1]} : vector<8x128xf32> to vector<8x32xf32>
    %130 = vector.extract_strided_slice %127 {offsets = [0, 64], sizes = [8, 32], strides = [1, 1]} : vector<8x128xf32> to vector<8x32xf32>
    %131 = vector.extract_strided_slice %126 {offsets = [0, 96], sizes = [8, 32], strides = [1, 1]} : vector<8x128xf32> to vector<8x32xf32>
    %132 = arith.mulf %129, %115 : vector<8x32xf32>
    %133 = arith.mulf %128, %130 : vector<8x32xf32>
    %134 = arith.addf %132, %133 : vector<8x32xf32>
    %135 = math.tanh %134 : vector<8x32xf32>
    %136 = arith.mulf %131, %135 : vector<8x32xf32>
    %c3 = arith.constant 3 : index
    %c0_76 = arith.constant 0 : index
    %c0_77 = arith.constant 0 : index
    %137 = vector.load %arg1[%c3, %c0_76, %c0_77] : memref<4x32x32xf32, #tpu.memory_space<vmem>>, vector<1x32x32xf32>
    %138 = vector.shape_cast %137 : vector<1x32x32xf32> to vector<32x32xf32>
    %cst_78 = arith.constant dense<0.000000e+00> : vector<8x32xf32>
    %139 = tpu.matmul %136, %138, %cst_78 {dimension_numbers = #tpu.dot_dimension_numbers<[1], [0], [0], [1], [0, 0, 1, 1], [], []>} : vector<8x32xf32>, vector<32x32xf32>, vector<8x32xf32> -> vector<8x32xf32>
    %140 = arith.addf %139, %9 : vector<8x32xf32>
    %c3_79 = arith.constant 3 : index
    %c0_80 = arith.constant 0 : index
    %c0_81 = arith.constant 0 : index
    %141 = vector.load %arg5[%c3_79, %c0_80, %c0_81] : memref<4x1x32xf32, #tpu.memory_space<vmem>>, vector<1x1x32xf32>
    %142 = vector.shape_cast %141 : vector<1x1x32xf32> to vector<1x32xf32>
    %143 = vector.broadcast %142 : vector<1x32xf32> to vector<8x32xf32>
    %144 = arith.addf %140, %143 : vector<8x32xf32>
    %cst_82 = arith.constant 0.000000e+00 : f32
    %145 = vector.broadcast %cst_82 : f32 to vector<8x32xf32>
    %146 = arith.maximumf %144, %145 : vector<8x32xf32>
    %c3_83 = arith.constant 3 : index
    %c0_84 = arith.constant 0 : index
    %c0_85 = arith.constant 0 : index
    %147 = vector.load %arg2[%c3_83, %c0_84, %c0_85] : memref<4x32x32xf32, #tpu.memory_space<vmem>>, vector<1x32x32xf32>
    %148 = vector.shape_cast %147 : vector<1x32x32xf32> to vector<32x32xf32>
    %cst_86 = arith.constant dense<0.000000e+00> : vector<8x32xf32>
    %149 = tpu.matmul %134, %148, %cst_86 {dimension_numbers = #tpu.dot_dimension_numbers<[1], [0], [0], [1], [0, 0, 1, 1], [], []>} : vector<8x32xf32>, vector<32x32xf32>, vector<8x32xf32> -> vector<8x32xf32>
    %150 = arith.addf %149, %13 : vector<8x32xf32>
    %c3_87 = arith.constant 3 : index
    %c0_88 = arith.constant 0 : index
    %c0_89 = arith.constant 0 : index
    %151 = vector.load %arg6[%c3_87, %c0_88, %c0_89] : memref<4x1x32xf32, #tpu.memory_space<vmem>>, vector<1x1x32xf32>
    %152 = vector.shape_cast %151 : vector<1x1x32xf32> to vector<1x32xf32>
    %153 = vector.broadcast %152 : vector<1x32xf32> to vector<8x32xf32>
    %154 = arith.addf %150, %153 : vector<8x32xf32>
    %cst_90 = arith.constant 0.000000e+00 : f32
    %155 = vector.broadcast %cst_90 : f32 to vector<8x32xf32>
    %156 = arith.maximumf %154, %155 : vector<8x32xf32>
    %c3_91 = arith.constant 3 : index
    %c0_92 = arith.constant 0 : index
    %c0_93 = arith.constant 0 : index
    %157 = vector.load %arg0[%c3_91, %c0_92, %c0_93] : memref<12x8x128xf32, #tpu.memory_space<vmem>>, vector<1x8x128xf32>
    %158 = vector.shape_cast %157 : vector<1x8x128xf32> to vector<8x128xf32>
    %c3_94 = arith.constant 3 : index
    %c0_95 = arith.constant 0 : index
    %c0_96 = arith.constant 0 : index
    %159 = vector.load %arg7[%c3_94, %c0_95, %c0_96] : memref<4x32x128xf32, #tpu.memory_space<vmem>>, vector<1x32x128xf32>
    %160 = vector.shape_cast %159 : vector<1x32x128xf32> to vector<32x128xf32>
    %cst_97 = arith.constant dense<0.000000e+00> : vector<8x128xf32>
    %161 = tpu.matmul %146, %160, %cst_97 {dimension_numbers = #tpu.dot_dimension_numbers<[1], [0], [0], [1], [0, 0, 1, 1], [], []>} : vector<8x32xf32>, vector<32x128xf32>, vector<8x128xf32> -> vector<8x128xf32>
    %162 = arith.addf %158, %161 : vector<8x128xf32>
    %163 = arith.negf %162 : vector<8x128xf32>
    %164 = math.exp %163 : vector<8x128xf32>
    %cst_98 = arith.constant 1.000000e+00 : f32
    %165 = vector.broadcast %cst_98 : f32 to vector<8x128xf32>
    %166 = arith.addf %165, %164 : vector<8x128xf32>
    %167 = arith.divf %165, %166 : vector<8x128xf32>
    %168 = math.tanh %162 : vector<8x128xf32>
    %169 = vector.extract_strided_slice %167 {offsets = [0, 0], sizes = [8, 32], strides = [1, 1]} : vector<8x128xf32> to vector<8x32xf32>
    %170 = vector.extract_strided_slice %167 {offsets = [0, 32], sizes = [8, 32], strides = [1, 1]} : vector<8x128xf32> to vector<8x32xf32>
    %171 = vector.extract_strided_slice %168 {offsets = [0, 64], sizes = [8, 32], strides = [1, 1]} : vector<8x128xf32> to vector<8x32xf32>
    %172 = vector.extract_strided_slice %167 {offsets = [0, 96], sizes = [8, 32], strides = [1, 1]} : vector<8x128xf32> to vector<8x32xf32>
    %173 = arith.mulf %170, %156 : vector<8x32xf32>
    %174 = arith.mulf %169, %171 : vector<8x32xf32>
    %175 = arith.addf %173, %174 : vector<8x32xf32>
    %176 = math.tanh %175 : vector<8x32xf32>
    %177 = arith.mulf %172, %176 : vector<8x32xf32>
    %178 = tpu.concatenate %54, %95, %136, %177 in 1 : vector<8x32xf32>, vector<8x32xf32>, vector<8x32xf32>, vector<8x32xf32> -> vector<8x128xf32>
    %179 = tpu.concatenate %52, %93, %134, %175 in 1 : vector<8x32xf32>, vector<8x32xf32>, vector<8x32xf32>, vector<8x32xf32> -> vector<8x128xf32>
    %c0_99 = arith.constant 0 : index
    %c0_100 = arith.constant 0 : index
    %180 = vector.load %arg3[%c0_99, %c0_100] : memref<128x128xf32, #tpu.memory_space<vmem>>, vector<128x128xf32>
    %cst_101 = arith.constant dense<0.000000e+00> : vector<8x128xf32>
    %181 = tpu.matmul %178, %180, %cst_101 {dimension_numbers = #tpu.dot_dimension_numbers<[1], [0], [0], [1], [0, 0, 1, 1], [], []>} : vector<8x128xf32>, vector<128x128xf32>, vector<8x128xf32> -> vector<8x128xf32>
    %c0_102 = arith.constant 0 : index
    %c0_103 = arith.constant 0 : index
    %182 = vector.load %arg4[%c0_102, %c0_103] : memref<128x128xf32, #tpu.memory_space<vmem>>, vector<128x128xf32>
    %cst_104 = arith.constant dense<0.000000e+00> : vector<8x128xf32>
    %183 = tpu.matmul %179, %182, %cst_104 {dimension_numbers = #tpu.dot_dimension_numbers<[1], [0], [0], [1], [0, 0, 1, 1], [], []>} : vector<8x128xf32>, vector<128x128xf32>, vector<8x128xf32> -> vector<8x128xf32>
    %184 = vector.extract_strided_slice %181 {offsets = [0, 0], sizes = [8, 32], strides = [1, 1]} : vector<8x128xf32> to vector<8x32xf32>
    %185 = vector.extract_strided_slice %181 {offsets = [0, 32], sizes = [8, 32], strides = [1, 1]} : vector<8x128xf32> to vector<8x32xf32>
    %186 = vector.extract_strided_slice %181 {offsets = [0, 64], sizes = [8, 32], strides = [1, 1]} : vector<8x128xf32> to vector<8x32xf32>
    %187 = vector.extract_strided_slice %181 {offsets = [0, 96], sizes = [8, 32], strides = [1, 1]} : vector<8x128xf32> to vector<8x32xf32>
    %188 = vector.extract_strided_slice %183 {offsets = [0, 0], sizes = [8, 32], strides = [1, 1]} : vector<8x128xf32> to vector<8x32xf32>
    %189 = vector.extract_strided_slice %183 {offsets = [0, 32], sizes = [8, 32], strides = [1, 1]} : vector<8x128xf32> to vector<8x32xf32>
    %190 = vector.extract_strided_slice %183 {offsets = [0, 64], sizes = [8, 32], strides = [1, 1]} : vector<8x128xf32> to vector<8x32xf32>
    %191 = vector.extract_strided_slice %183 {offsets = [0, 96], sizes = [8, 32], strides = [1, 1]} : vector<8x128xf32> to vector<8x32xf32>
    %192 = vector.extract_strided_slice %178 {offsets = [0, 96], sizes = [8, 32], strides = [1, 1]} : vector<8x128xf32> to vector<8x32xf32>
    %193 = vector.extract_strided_slice %179 {offsets = [0, 96], sizes = [8, 32], strides = [1, 1]} : vector<8x128xf32> to vector<8x32xf32>
    %c0_105 = arith.constant 0 : index
    %c0_106 = arith.constant 0 : index
    %c0_107 = arith.constant 0 : index
    %194 = vector.load %arg1[%c0_105, %c0_106, %c0_107] : memref<4x32x32xf32, #tpu.memory_space<vmem>>, vector<1x32x32xf32>
    %195 = vector.shape_cast %194 : vector<1x32x32xf32> to vector<32x32xf32>
    %cst_108 = arith.constant dense<0.000000e+00> : vector<8x32xf32>
    %196 = tpu.matmul %192, %195, %cst_108 {dimension_numbers = #tpu.dot_dimension_numbers<[1], [0], [0], [1], [0, 0, 1, 1], [], []>} : vector<8x32xf32>, vector<32x32xf32>, vector<8x32xf32> -> vector<8x32xf32>
    %197 = arith.addf %196, %184 : vector<8x32xf32>
    %c0_109 = arith.constant 0 : index
    %c0_110 = arith.constant 0 : index
    %c0_111 = arith.constant 0 : index
    %198 = vector.load %arg5[%c0_109, %c0_110, %c0_111] : memref<4x1x32xf32, #tpu.memory_space<vmem>>, vector<1x1x32xf32>
    %199 = vector.shape_cast %198 : vector<1x1x32xf32> to vector<1x32xf32>
    %200 = vector.broadcast %199 : vector<1x32xf32> to vector<8x32xf32>
    %201 = arith.addf %197, %200 : vector<8x32xf32>
    %cst_112 = arith.constant 0.000000e+00 : f32
    %202 = vector.broadcast %cst_112 : f32 to vector<8x32xf32>
    %203 = arith.maximumf %201, %202 : vector<8x32xf32>
    %c0_113 = arith.constant 0 : index
    %c0_114 = arith.constant 0 : index
    %c0_115 = arith.constant 0 : index
    %204 = vector.load %arg2[%c0_113, %c0_114, %c0_115] : memref<4x32x32xf32, #tpu.memory_space<vmem>>, vector<1x32x32xf32>
    %205 = vector.shape_cast %204 : vector<1x32x32xf32> to vector<32x32xf32>
    %cst_116 = arith.constant dense<0.000000e+00> : vector<8x32xf32>
    %206 = tpu.matmul %193, %205, %cst_116 {dimension_numbers = #tpu.dot_dimension_numbers<[1], [0], [0], [1], [0, 0, 1, 1], [], []>} : vector<8x32xf32>, vector<32x32xf32>, vector<8x32xf32> -> vector<8x32xf32>
    %207 = arith.addf %206, %188 : vector<8x32xf32>
    %c0_117 = arith.constant 0 : index
    %c0_118 = arith.constant 0 : index
    %c0_119 = arith.constant 0 : index
    %208 = vector.load %arg6[%c0_117, %c0_118, %c0_119] : memref<4x1x32xf32, #tpu.memory_space<vmem>>, vector<1x1x32xf32>
    %209 = vector.shape_cast %208 : vector<1x1x32xf32> to vector<1x32xf32>
    %210 = vector.broadcast %209 : vector<1x32xf32> to vector<8x32xf32>
    %211 = arith.addf %207, %210 : vector<8x32xf32>
    %cst_120 = arith.constant 0.000000e+00 : f32
    %212 = vector.broadcast %cst_120 : f32 to vector<8x32xf32>
    %213 = arith.maximumf %211, %212 : vector<8x32xf32>
    %c4 = arith.constant 4 : index
    %c0_121 = arith.constant 0 : index
    %c0_122 = arith.constant 0 : index
    %214 = vector.load %arg0[%c4, %c0_121, %c0_122] : memref<12x8x128xf32, #tpu.memory_space<vmem>>, vector<1x8x128xf32>
    %215 = vector.shape_cast %214 : vector<1x8x128xf32> to vector<8x128xf32>
    %c0_123 = arith.constant 0 : index
    %c0_124 = arith.constant 0 : index
    %c0_125 = arith.constant 0 : index
    %216 = vector.load %arg7[%c0_123, %c0_124, %c0_125] : memref<4x32x128xf32, #tpu.memory_space<vmem>>, vector<1x32x128xf32>
    %217 = vector.shape_cast %216 : vector<1x32x128xf32> to vector<32x128xf32>
    %cst_126 = arith.constant dense<0.000000e+00> : vector<8x128xf32>
    %218 = tpu.matmul %203, %217, %cst_126 {dimension_numbers = #tpu.dot_dimension_numbers<[1], [0], [0], [1], [0, 0, 1, 1], [], []>} : vector<8x32xf32>, vector<32x128xf32>, vector<8x128xf32> -> vector<8x128xf32>
    %219 = arith.addf %215, %218 : vector<8x128xf32>
    %220 = arith.negf %219 : vector<8x128xf32>
    %221 = math.exp %220 : vector<8x128xf32>
    %cst_127 = arith.constant 1.000000e+00 : f32
    %222 = vector.broadcast %cst_127 : f32 to vector<8x128xf32>
    %223 = arith.addf %222, %221 : vector<8x128xf32>
    %224 = arith.divf %222, %223 : vector<8x128xf32>
    %225 = math.tanh %219 : vector<8x128xf32>
    %226 = vector.extract_strided_slice %224 {offsets = [0, 0], sizes = [8, 32], strides = [1, 1]} : vector<8x128xf32> to vector<8x32xf32>
    %227 = vector.extract_strided_slice %224 {offsets = [0, 32], sizes = [8, 32], strides = [1, 1]} : vector<8x128xf32> to vector<8x32xf32>
    %228 = vector.extract_strided_slice %225 {offsets = [0, 64], sizes = [8, 32], strides = [1, 1]} : vector<8x128xf32> to vector<8x32xf32>
    %229 = vector.extract_strided_slice %224 {offsets = [0, 96], sizes = [8, 32], strides = [1, 1]} : vector<8x128xf32> to vector<8x32xf32>
    %230 = arith.mulf %227, %213 : vector<8x32xf32>
    %231 = arith.mulf %226, %228 : vector<8x32xf32>
    %232 = arith.addf %230, %231 : vector<8x32xf32>
    %233 = math.tanh %232 : vector<8x32xf32>
    %234 = arith.mulf %229, %233 : vector<8x32xf32>
    %c1_128 = arith.constant 1 : index
    %c0_129 = arith.constant 0 : index
    %c0_130 = arith.constant 0 : index
    %235 = vector.load %arg1[%c1_128, %c0_129, %c0_130] : memref<4x32x32xf32, #tpu.memory_space<vmem>>, vector<1x32x32xf32>
    %236 = vector.shape_cast %235 : vector<1x32x32xf32> to vector<32x32xf32>
    %cst_131 = arith.constant dense<0.000000e+00> : vector<8x32xf32>
    %237 = tpu.matmul %234, %236, %cst_131 {dimension_numbers = #tpu.dot_dimension_numbers<[1], [0], [0], [1], [0, 0, 1, 1], [], []>} : vector<8x32xf32>, vector<32x32xf32>, vector<8x32xf32> -> vector<8x32xf32>
    %238 = arith.addf %237, %185 : vector<8x32xf32>
    %c1_132 = arith.constant 1 : index
    %c0_133 = arith.constant 0 : index
    %c0_134 = arith.constant 0 : index
    %239 = vector.load %arg5[%c1_132, %c0_133, %c0_134] : memref<4x1x32xf32, #tpu.memory_space<vmem>>, vector<1x1x32xf32>
    %240 = vector.shape_cast %239 : vector<1x1x32xf32> to vector<1x32xf32>
    %241 = vector.broadcast %240 : vector<1x32xf32> to vector<8x32xf32>
    %242 = arith.addf %238, %241 : vector<8x32xf32>
    %cst_135 = arith.constant 0.000000e+00 : f32
    %243 = vector.broadcast %cst_135 : f32 to vector<8x32xf32>
    %244 = arith.maximumf %242, %243 : vector<8x32xf32>
    %c1_136 = arith.constant 1 : index
    %c0_137 = arith.constant 0 : index
    %c0_138 = arith.constant 0 : index
    %245 = vector.load %arg2[%c1_136, %c0_137, %c0_138] : memref<4x32x32xf32, #tpu.memory_space<vmem>>, vector<1x32x32xf32>
    %246 = vector.shape_cast %245 : vector<1x32x32xf32> to vector<32x32xf32>
    %cst_139 = arith.constant dense<0.000000e+00> : vector<8x32xf32>
    %247 = tpu.matmul %232, %246, %cst_139 {dimension_numbers = #tpu.dot_dimension_numbers<[1], [0], [0], [1], [0, 0, 1, 1], [], []>} : vector<8x32xf32>, vector<32x32xf32>, vector<8x32xf32> -> vector<8x32xf32>
    %248 = arith.addf %247, %189 : vector<8x32xf32>
    %c1_140 = arith.constant 1 : index
    %c0_141 = arith.constant 0 : index
    %c0_142 = arith.constant 0 : index
    %249 = vector.load %arg6[%c1_140, %c0_141, %c0_142] : memref<4x1x32xf32, #tpu.memory_space<vmem>>, vector<1x1x32xf32>
    %250 = vector.shape_cast %249 : vector<1x1x32xf32> to vector<1x32xf32>
    %251 = vector.broadcast %250 : vector<1x32xf32> to vector<8x32xf32>
    %252 = arith.addf %248, %251 : vector<8x32xf32>
    %cst_143 = arith.constant 0.000000e+00 : f32
    %253 = vector.broadcast %cst_143 : f32 to vector<8x32xf32>
    %254 = arith.maximumf %252, %253 : vector<8x32xf32>
    %c5 = arith.constant 5 : index
    %c0_144 = arith.constant 0 : index
    %c0_145 = arith.constant 0 : index
    %255 = vector.load %arg0[%c5, %c0_144, %c0_145] : memref<12x8x128xf32, #tpu.memory_space<vmem>>, vector<1x8x128xf32>
    %256 = vector.shape_cast %255 : vector<1x8x128xf32> to vector<8x128xf32>
    %c1_146 = arith.constant 1 : index
    %c0_147 = arith.constant 0 : index
    %c0_148 = arith.constant 0 : index
    %257 = vector.load %arg7[%c1_146, %c0_147, %c0_148] : memref<4x32x128xf32, #tpu.memory_space<vmem>>, vector<1x32x128xf32>
    %258 = vector.shape_cast %257 : vector<1x32x128xf32> to vector<32x128xf32>
    %cst_149 = arith.constant dense<0.000000e+00> : vector<8x128xf32>
    %259 = tpu.matmul %244, %258, %cst_149 {dimension_numbers = #tpu.dot_dimension_numbers<[1], [0], [0], [1], [0, 0, 1, 1], [], []>} : vector<8x32xf32>, vector<32x128xf32>, vector<8x128xf32> -> vector<8x128xf32>
    %260 = arith.addf %256, %259 : vector<8x128xf32>
    %261 = arith.negf %260 : vector<8x128xf32>
    %262 = math.exp %261 : vector<8x128xf32>
    %cst_150 = arith.constant 1.000000e+00 : f32
    %263 = vector.broadcast %cst_150 : f32 to vector<8x128xf32>
    %264 = arith.addf %263, %262 : vector<8x128xf32>
    %265 = arith.divf %263, %264 : vector<8x128xf32>
    %266 = math.tanh %260 : vector<8x128xf32>
    %267 = vector.extract_strided_slice %265 {offsets = [0, 0], sizes = [8, 32], strides = [1, 1]} : vector<8x128xf32> to vector<8x32xf32>
    %268 = vector.extract_strided_slice %265 {offsets = [0, 32], sizes = [8, 32], strides = [1, 1]} : vector<8x128xf32> to vector<8x32xf32>
    %269 = vector.extract_strided_slice %266 {offsets = [0, 64], sizes = [8, 32], strides = [1, 1]} : vector<8x128xf32> to vector<8x32xf32>
    %270 = vector.extract_strided_slice %265 {offsets = [0, 96], sizes = [8, 32], strides = [1, 1]} : vector<8x128xf32> to vector<8x32xf32>
    %271 = arith.mulf %268, %254 : vector<8x32xf32>
    %272 = arith.mulf %267, %269 : vector<8x32xf32>
    %273 = arith.addf %271, %272 : vector<8x32xf32>
    %274 = math.tanh %273 : vector<8x32xf32>
    %275 = arith.mulf %270, %274 : vector<8x32xf32>
    %c2_151 = arith.constant 2 : index
    %c0_152 = arith.constant 0 : index
    %c0_153 = arith.constant 0 : index
    %276 = vector.load %arg1[%c2_151, %c0_152, %c0_153] : memref<4x32x32xf32, #tpu.memory_space<vmem>>, vector<1x32x32xf32>
    %277 = vector.shape_cast %276 : vector<1x32x32xf32> to vector<32x32xf32>
    %cst_154 = arith.constant dense<0.000000e+00> : vector<8x32xf32>
    %278 = tpu.matmul %275, %277, %cst_154 {dimension_numbers = #tpu.dot_dimension_numbers<[1], [0], [0], [1], [0, 0, 1, 1], [], []>} : vector<8x32xf32>, vector<32x32xf32>, vector<8x32xf32> -> vector<8x32xf32>
    %279 = arith.addf %278, %186 : vector<8x32xf32>
    %c2_155 = arith.constant 2 : index
    %c0_156 = arith.constant 0 : index
    %c0_157 = arith.constant 0 : index
    %280 = vector.load %arg5[%c2_155, %c0_156, %c0_157] : memref<4x1x32xf32, #tpu.memory_space<vmem>>, vector<1x1x32xf32>
    %281 = vector.shape_cast %280 : vector<1x1x32xf32> to vector<1x32xf32>
    %282 = vector.broadcast %281 : vector<1x32xf32> to vector<8x32xf32>
    %283 = arith.addf %279, %282 : vector<8x32xf32>
    %cst_158 = arith.constant 0.000000e+00 : f32
    %284 = vector.broadcast %cst_158 : f32 to vector<8x32xf32>
    %285 = arith.maximumf %283, %284 : vector<8x32xf32>
    %c2_159 = arith.constant 2 : index
    %c0_160 = arith.constant 0 : index
    %c0_161 = arith.constant 0 : index
    %286 = vector.load %arg2[%c2_159, %c0_160, %c0_161] : memref<4x32x32xf32, #tpu.memory_space<vmem>>, vector<1x32x32xf32>
    %287 = vector.shape_cast %286 : vector<1x32x32xf32> to vector<32x32xf32>
    %cst_162 = arith.constant dense<0.000000e+00> : vector<8x32xf32>
    %288 = tpu.matmul %273, %287, %cst_162 {dimension_numbers = #tpu.dot_dimension_numbers<[1], [0], [0], [1], [0, 0, 1, 1], [], []>} : vector<8x32xf32>, vector<32x32xf32>, vector<8x32xf32> -> vector<8x32xf32>
    %289 = arith.addf %288, %190 : vector<8x32xf32>
    %c2_163 = arith.constant 2 : index
    %c0_164 = arith.constant 0 : index
    %c0_165 = arith.constant 0 : index
    %290 = vector.load %arg6[%c2_163, %c0_164, %c0_165] : memref<4x1x32xf32, #tpu.memory_space<vmem>>, vector<1x1x32xf32>
    %291 = vector.shape_cast %290 : vector<1x1x32xf32> to vector<1x32xf32>
    %292 = vector.broadcast %291 : vector<1x32xf32> to vector<8x32xf32>
    %293 = arith.addf %289, %292 : vector<8x32xf32>
    %cst_166 = arith.constant 0.000000e+00 : f32
    %294 = vector.broadcast %cst_166 : f32 to vector<8x32xf32>
    %295 = arith.maximumf %293, %294 : vector<8x32xf32>
    %c6 = arith.constant 6 : index
    %c0_167 = arith.constant 0 : index
    %c0_168 = arith.constant 0 : index
    %296 = vector.load %arg0[%c6, %c0_167, %c0_168] : memref<12x8x128xf32, #tpu.memory_space<vmem>>, vector<1x8x128xf32>
    %297 = vector.shape_cast %296 : vector<1x8x128xf32> to vector<8x128xf32>
    %c2_169 = arith.constant 2 : index
    %c0_170 = arith.constant 0 : index
    %c0_171 = arith.constant 0 : index
    %298 = vector.load %arg7[%c2_169, %c0_170, %c0_171] : memref<4x32x128xf32, #tpu.memory_space<vmem>>, vector<1x32x128xf32>
    %299 = vector.shape_cast %298 : vector<1x32x128xf32> to vector<32x128xf32>
    %cst_172 = arith.constant dense<0.000000e+00> : vector<8x128xf32>
    %300 = tpu.matmul %285, %299, %cst_172 {dimension_numbers = #tpu.dot_dimension_numbers<[1], [0], [0], [1], [0, 0, 1, 1], [], []>} : vector<8x32xf32>, vector<32x128xf32>, vector<8x128xf32> -> vector<8x128xf32>
    %301 = arith.addf %297, %300 : vector<8x128xf32>
    %302 = arith.negf %301 : vector<8x128xf32>
    %303 = math.exp %302 : vector<8x128xf32>
    %cst_173 = arith.constant 1.000000e+00 : f32
    %304 = vector.broadcast %cst_173 : f32 to vector<8x128xf32>
    %305 = arith.addf %304, %303 : vector<8x128xf32>
    %306 = arith.divf %304, %305 : vector<8x128xf32>
    %307 = math.tanh %301 : vector<8x128xf32>
    %308 = vector.extract_strided_slice %306 {offsets = [0, 0], sizes = [8, 32], strides = [1, 1]} : vector<8x128xf32> to vector<8x32xf32>
    %309 = vector.extract_strided_slice %306 {offsets = [0, 32], sizes = [8, 32], strides = [1, 1]} : vector<8x128xf32> to vector<8x32xf32>
    %310 = vector.extract_strided_slice %307 {offsets = [0, 64], sizes = [8, 32], strides = [1, 1]} : vector<8x128xf32> to vector<8x32xf32>
    %311 = vector.extract_strided_slice %306 {offsets = [0, 96], sizes = [8, 32], strides = [1, 1]} : vector<8x128xf32> to vector<8x32xf32>
    %312 = arith.mulf %309, %295 : vector<8x32xf32>
    %313 = arith.mulf %308, %310 : vector<8x32xf32>
    %314 = arith.addf %312, %313 : vector<8x32xf32>
    %315 = math.tanh %314 : vector<8x32xf32>
    %316 = arith.mulf %311, %315 : vector<8x32xf32>
    %c3_174 = arith.constant 3 : index
    %c0_175 = arith.constant 0 : index
    %c0_176 = arith.constant 0 : index
    %317 = vector.load %arg1[%c3_174, %c0_175, %c0_176] : memref<4x32x32xf32, #tpu.memory_space<vmem>>, vector<1x32x32xf32>
    %318 = vector.shape_cast %317 : vector<1x32x32xf32> to vector<32x32xf32>
    %cst_177 = arith.constant dense<0.000000e+00> : vector<8x32xf32>
    %319 = tpu.matmul %316, %318, %cst_177 {dimension_numbers = #tpu.dot_dimension_numbers<[1], [0], [0], [1], [0, 0, 1, 1], [], []>} : vector<8x32xf32>, vector<32x32xf32>, vector<8x32xf32> -> vector<8x32xf32>
    %320 = arith.addf %319, %187 : vector<8x32xf32>
    %c3_178 = arith.constant 3 : index
    %c0_179 = arith.constant 0 : index
    %c0_180 = arith.constant 0 : index
    %321 = vector.load %arg5[%c3_178, %c0_179, %c0_180] : memref<4x1x32xf32, #tpu.memory_space<vmem>>, vector<1x1x32xf32>
    %322 = vector.shape_cast %321 : vector<1x1x32xf32> to vector<1x32xf32>
    %323 = vector.broadcast %322 : vector<1x32xf32> to vector<8x32xf32>
    %324 = arith.addf %320, %323 : vector<8x32xf32>
    %cst_181 = arith.constant 0.000000e+00 : f32
    %325 = vector.broadcast %cst_181 : f32 to vector<8x32xf32>
    %326 = arith.maximumf %324, %325 : vector<8x32xf32>
    %c3_182 = arith.constant 3 : index
    %c0_183 = arith.constant 0 : index
    %c0_184 = arith.constant 0 : index
    %327 = vector.load %arg2[%c3_182, %c0_183, %c0_184] : memref<4x32x32xf32, #tpu.memory_space<vmem>>, vector<1x32x32xf32>
    %328 = vector.shape_cast %327 : vector<1x32x32xf32> to vector<32x32xf32>
    %cst_185 = arith.constant dense<0.000000e+00> : vector<8x32xf32>
    %329 = tpu.matmul %314, %328, %cst_185 {dimension_numbers = #tpu.dot_dimension_numbers<[1], [0], [0], [1], [0, 0, 1, 1], [], []>} : vector<8x32xf32>, vector<32x32xf32>, vector<8x32xf32> -> vector<8x32xf32>
    %330 = arith.addf %329, %191 : vector<8x32xf32>
    %c3_186 = arith.constant 3 : index
    %c0_187 = arith.constant 0 : index
    %c0_188 = arith.constant 0 : index
    %331 = vector.load %arg6[%c3_186, %c0_187, %c0_188] : memref<4x1x32xf32, #tpu.memory_space<vmem>>, vector<1x1x32xf32>
    %332 = vector.shape_cast %331 : vector<1x1x32xf32> to vector<1x32xf32>
    %333 = vector.broadcast %332 : vector<1x32xf32> to vector<8x32xf32>
    %334 = arith.addf %330, %333 : vector<8x32xf32>
    %cst_189 = arith.constant 0.000000e+00 : f32
    %335 = vector.broadcast %cst_189 : f32 to vector<8x32xf32>
    %336 = arith.maximumf %334, %335 : vector<8x32xf32>
    %c7 = arith.constant 7 : index
    %c0_190 = arith.constant 0 : index
    %c0_191 = arith.constant 0 : index
    %337 = vector.load %arg0[%c7, %c0_190, %c0_191] : memref<12x8x128xf32, #tpu.memory_space<vmem>>, vector<1x8x128xf32>
    %338 = vector.shape_cast %337 : vector<1x8x128xf32> to vector<8x128xf32>
    %c3_192 = arith.constant 3 : index
    %c0_193 = arith.constant 0 : index
    %c0_194 = arith.constant 0 : index
    %339 = vector.load %arg7[%c3_192, %c0_193, %c0_194] : memref<4x32x128xf32, #tpu.memory_space<vmem>>, vector<1x32x128xf32>
    %340 = vector.shape_cast %339 : vector<1x32x128xf32> to vector<32x128xf32>
    %cst_195 = arith.constant dense<0.000000e+00> : vector<8x128xf32>
    %341 = tpu.matmul %326, %340, %cst_195 {dimension_numbers = #tpu.dot_dimension_numbers<[1], [0], [0], [1], [0, 0, 1, 1], [], []>} : vector<8x32xf32>, vector<32x128xf32>, vector<8x128xf32> -> vector<8x128xf32>
    %342 = arith.addf %338, %341 : vector<8x128xf32>
    %343 = arith.negf %342 : vector<8x128xf32>
    %344 = math.exp %343 : vector<8x128xf32>
    %cst_196 = arith.constant 1.000000e+00 : f32
    %345 = vector.broadcast %cst_196 : f32 to vector<8x128xf32>
    %346 = arith.addf %345, %344 : vector<8x128xf32>
    %347 = arith.divf %345, %346 : vector<8x128xf32>
    %348 = math.tanh %342 : vector<8x128xf32>
    %349 = vector.extract_strided_slice %347 {offsets = [0, 0], sizes = [8, 32], strides = [1, 1]} : vector<8x128xf32> to vector<8x32xf32>
    %350 = vector.extract_strided_slice %347 {offsets = [0, 32], sizes = [8, 32], strides = [1, 1]} : vector<8x128xf32> to vector<8x32xf32>
    %351 = vector.extract_strided_slice %348 {offsets = [0, 64], sizes = [8, 32], strides = [1, 1]} : vector<8x128xf32> to vector<8x32xf32>
    %352 = vector.extract_strided_slice %347 {offsets = [0, 96], sizes = [8, 32], strides = [1, 1]} : vector<8x128xf32> to vector<8x32xf32>
    %353 = arith.mulf %350, %336 : vector<8x32xf32>
    %354 = arith.mulf %349, %351 : vector<8x32xf32>
    %355 = arith.addf %353, %354 : vector<8x32xf32>
    %356 = math.tanh %355 : vector<8x32xf32>
    %357 = arith.mulf %352, %356 : vector<8x32xf32>
    %358 = tpu.concatenate %234, %275, %316, %357 in 1 : vector<8x32xf32>, vector<8x32xf32>, vector<8x32xf32>, vector<8x32xf32> -> vector<8x128xf32>
    %359 = tpu.concatenate %232, %273, %314, %355 in 1 : vector<8x32xf32>, vector<8x32xf32>, vector<8x32xf32>, vector<8x32xf32> -> vector<8x128xf32>
    %c0_197 = arith.constant 0 : index
    %c0_198 = arith.constant 0 : index
    %360 = vector.load %arg3[%c0_197, %c0_198] : memref<128x128xf32, #tpu.memory_space<vmem>>, vector<128x128xf32>
    %cst_199 = arith.constant dense<0.000000e+00> : vector<8x128xf32>
    %361 = tpu.matmul %358, %360, %cst_199 {dimension_numbers = #tpu.dot_dimension_numbers<[1], [0], [0], [1], [0, 0, 1, 1], [], []>} : vector<8x128xf32>, vector<128x128xf32>, vector<8x128xf32> -> vector<8x128xf32>
    %c0_200 = arith.constant 0 : index
    %c0_201 = arith.constant 0 : index
    %362 = vector.load %arg4[%c0_200, %c0_201] : memref<128x128xf32, #tpu.memory_space<vmem>>, vector<128x128xf32>
    %cst_202 = arith.constant dense<0.000000e+00> : vector<8x128xf32>
    %363 = tpu.matmul %359, %362, %cst_202 {dimension_numbers = #tpu.dot_dimension_numbers<[1], [0], [0], [1], [0, 0, 1, 1], [], []>} : vector<8x128xf32>, vector<128x128xf32>, vector<8x128xf32> -> vector<8x128xf32>
    %364 = vector.extract_strided_slice %361 {offsets = [0, 0], sizes = [8, 32], strides = [1, 1]} : vector<8x128xf32> to vector<8x32xf32>
    %365 = vector.extract_strided_slice %361 {offsets = [0, 32], sizes = [8, 32], strides = [1, 1]} : vector<8x128xf32> to vector<8x32xf32>
    %366 = vector.extract_strided_slice %361 {offsets = [0, 64], sizes = [8, 32], strides = [1, 1]} : vector<8x128xf32> to vector<8x32xf32>
    %367 = vector.extract_strided_slice %361 {offsets = [0, 96], sizes = [8, 32], strides = [1, 1]} : vector<8x128xf32> to vector<8x32xf32>
    %368 = vector.extract_strided_slice %363 {offsets = [0, 0], sizes = [8, 32], strides = [1, 1]} : vector<8x128xf32> to vector<8x32xf32>
    %369 = vector.extract_strided_slice %363 {offsets = [0, 32], sizes = [8, 32], strides = [1, 1]} : vector<8x128xf32> to vector<8x32xf32>
    %370 = vector.extract_strided_slice %363 {offsets = [0, 64], sizes = [8, 32], strides = [1, 1]} : vector<8x128xf32> to vector<8x32xf32>
    %371 = vector.extract_strided_slice %363 {offsets = [0, 96], sizes = [8, 32], strides = [1, 1]} : vector<8x128xf32> to vector<8x32xf32>
    %372 = vector.extract_strided_slice %358 {offsets = [0, 96], sizes = [8, 32], strides = [1, 1]} : vector<8x128xf32> to vector<8x32xf32>
    %373 = vector.extract_strided_slice %359 {offsets = [0, 96], sizes = [8, 32], strides = [1, 1]} : vector<8x128xf32> to vector<8x32xf32>
    %c0_203 = arith.constant 0 : index
    %c0_204 = arith.constant 0 : index
    %c0_205 = arith.constant 0 : index
    %374 = vector.load %arg1[%c0_203, %c0_204, %c0_205] : memref<4x32x32xf32, #tpu.memory_space<vmem>>, vector<1x32x32xf32>
    %375 = vector.shape_cast %374 : vector<1x32x32xf32> to vector<32x32xf32>
    %cst_206 = arith.constant dense<0.000000e+00> : vector<8x32xf32>
    %376 = tpu.matmul %372, %375, %cst_206 {dimension_numbers = #tpu.dot_dimension_numbers<[1], [0], [0], [1], [0, 0, 1, 1], [], []>} : vector<8x32xf32>, vector<32x32xf32>, vector<8x32xf32> -> vector<8x32xf32>
    %377 = arith.addf %376, %364 : vector<8x32xf32>
    %c0_207 = arith.constant 0 : index
    %c0_208 = arith.constant 0 : index
    %c0_209 = arith.constant 0 : index
    %378 = vector.load %arg5[%c0_207, %c0_208, %c0_209] : memref<4x1x32xf32, #tpu.memory_space<vmem>>, vector<1x1x32xf32>
    %379 = vector.shape_cast %378 : vector<1x1x32xf32> to vector<1x32xf32>
    %380 = vector.broadcast %379 : vector<1x32xf32> to vector<8x32xf32>
    %381 = arith.addf %377, %380 : vector<8x32xf32>
    %cst_210 = arith.constant 0.000000e+00 : f32
    %382 = vector.broadcast %cst_210 : f32 to vector<8x32xf32>
    %383 = arith.maximumf %381, %382 : vector<8x32xf32>
    %c0_211 = arith.constant 0 : index
    %c0_212 = arith.constant 0 : index
    %c0_213 = arith.constant 0 : index
    %384 = vector.load %arg2[%c0_211, %c0_212, %c0_213] : memref<4x32x32xf32, #tpu.memory_space<vmem>>, vector<1x32x32xf32>
    %385 = vector.shape_cast %384 : vector<1x32x32xf32> to vector<32x32xf32>
    %cst_214 = arith.constant dense<0.000000e+00> : vector<8x32xf32>
    %386 = tpu.matmul %373, %385, %cst_214 {dimension_numbers = #tpu.dot_dimension_numbers<[1], [0], [0], [1], [0, 0, 1, 1], [], []>} : vector<8x32xf32>, vector<32x32xf32>, vector<8x32xf32> -> vector<8x32xf32>
    %387 = arith.addf %386, %368 : vector<8x32xf32>
    %c0_215 = arith.constant 0 : index
    %c0_216 = arith.constant 0 : index
    %c0_217 = arith.constant 0 : index
    %388 = vector.load %arg6[%c0_215, %c0_216, %c0_217] : memref<4x1x32xf32, #tpu.memory_space<vmem>>, vector<1x1x32xf32>
    %389 = vector.shape_cast %388 : vector<1x1x32xf32> to vector<1x32xf32>
    %390 = vector.broadcast %389 : vector<1x32xf32> to vector<8x32xf32>
    %391 = arith.addf %387, %390 : vector<8x32xf32>
    %cst_218 = arith.constant 0.000000e+00 : f32
    %392 = vector.broadcast %cst_218 : f32 to vector<8x32xf32>
    %393 = arith.maximumf %391, %392 : vector<8x32xf32>
    %c8 = arith.constant 8 : index
    %c0_219 = arith.constant 0 : index
    %c0_220 = arith.constant 0 : index
    %394 = vector.load %arg0[%c8, %c0_219, %c0_220] : memref<12x8x128xf32, #tpu.memory_space<vmem>>, vector<1x8x128xf32>
    %395 = vector.shape_cast %394 : vector<1x8x128xf32> to vector<8x128xf32>
    %c0_221 = arith.constant 0 : index
    %c0_222 = arith.constant 0 : index
    %c0_223 = arith.constant 0 : index
    %396 = vector.load %arg7[%c0_221, %c0_222, %c0_223] : memref<4x32x128xf32, #tpu.memory_space<vmem>>, vector<1x32x128xf32>
    %397 = vector.shape_cast %396 : vector<1x32x128xf32> to vector<32x128xf32>
    %cst_224 = arith.constant dense<0.000000e+00> : vector<8x128xf32>
    %398 = tpu.matmul %383, %397, %cst_224 {dimension_numbers = #tpu.dot_dimension_numbers<[1], [0], [0], [1], [0, 0, 1, 1], [], []>} : vector<8x32xf32>, vector<32x128xf32>, vector<8x128xf32> -> vector<8x128xf32>
    %399 = arith.addf %395, %398 : vector<8x128xf32>
    %400 = arith.negf %399 : vector<8x128xf32>
    %401 = math.exp %400 : vector<8x128xf32>
    %cst_225 = arith.constant 1.000000e+00 : f32
    %402 = vector.broadcast %cst_225 : f32 to vector<8x128xf32>
    %403 = arith.addf %402, %401 : vector<8x128xf32>
    %404 = arith.divf %402, %403 : vector<8x128xf32>
    %405 = math.tanh %399 : vector<8x128xf32>
    %406 = vector.extract_strided_slice %404 {offsets = [0, 0], sizes = [8, 32], strides = [1, 1]} : vector<8x128xf32> to vector<8x32xf32>
    %407 = vector.extract_strided_slice %404 {offsets = [0, 32], sizes = [8, 32], strides = [1, 1]} : vector<8x128xf32> to vector<8x32xf32>
    %408 = vector.extract_strided_slice %405 {offsets = [0, 64], sizes = [8, 32], strides = [1, 1]} : vector<8x128xf32> to vector<8x32xf32>
    %409 = vector.extract_strided_slice %404 {offsets = [0, 96], sizes = [8, 32], strides = [1, 1]} : vector<8x128xf32> to vector<8x32xf32>
    %410 = arith.mulf %407, %393 : vector<8x32xf32>
    %411 = arith.mulf %406, %408 : vector<8x32xf32>
    %412 = arith.addf %410, %411 : vector<8x32xf32>
    %413 = math.tanh %412 : vector<8x32xf32>
    %414 = arith.mulf %409, %413 : vector<8x32xf32>
    %c1_226 = arith.constant 1 : index
    %c0_227 = arith.constant 0 : index
    %c0_228 = arith.constant 0 : index
    %415 = vector.load %arg1[%c1_226, %c0_227, %c0_228] : memref<4x32x32xf32, #tpu.memory_space<vmem>>, vector<1x32x32xf32>
    %416 = vector.shape_cast %415 : vector<1x32x32xf32> to vector<32x32xf32>
    %cst_229 = arith.constant dense<0.000000e+00> : vector<8x32xf32>
    %417 = tpu.matmul %414, %416, %cst_229 {dimension_numbers = #tpu.dot_dimension_numbers<[1], [0], [0], [1], [0, 0, 1, 1], [], []>} : vector<8x32xf32>, vector<32x32xf32>, vector<8x32xf32> -> vector<8x32xf32>
    %418 = arith.addf %417, %365 : vector<8x32xf32>
    %c1_230 = arith.constant 1 : index
    %c0_231 = arith.constant 0 : index
    %c0_232 = arith.constant 0 : index
    %419 = vector.load %arg5[%c1_230, %c0_231, %c0_232] : memref<4x1x32xf32, #tpu.memory_space<vmem>>, vector<1x1x32xf32>
    %420 = vector.shape_cast %419 : vector<1x1x32xf32> to vector<1x32xf32>
    %421 = vector.broadcast %420 : vector<1x32xf32> to vector<8x32xf32>
    %422 = arith.addf %418, %421 : vector<8x32xf32>
    %cst_233 = arith.constant 0.000000e+00 : f32
    %423 = vector.broadcast %cst_233 : f32 to vector<8x32xf32>
    %424 = arith.maximumf %422, %423 : vector<8x32xf32>
    %c1_234 = arith.constant 1 : index
    %c0_235 = arith.constant 0 : index
    %c0_236 = arith.constant 0 : index
    %425 = vector.load %arg2[%c1_234, %c0_235, %c0_236] : memref<4x32x32xf32, #tpu.memory_space<vmem>>, vector<1x32x32xf32>
    %426 = vector.shape_cast %425 : vector<1x32x32xf32> to vector<32x32xf32>
    %cst_237 = arith.constant dense<0.000000e+00> : vector<8x32xf32>
    %427 = tpu.matmul %412, %426, %cst_237 {dimension_numbers = #tpu.dot_dimension_numbers<[1], [0], [0], [1], [0, 0, 1, 1], [], []>} : vector<8x32xf32>, vector<32x32xf32>, vector<8x32xf32> -> vector<8x32xf32>
    %428 = arith.addf %427, %369 : vector<8x32xf32>
    %c1_238 = arith.constant 1 : index
    %c0_239 = arith.constant 0 : index
    %c0_240 = arith.constant 0 : index
    %429 = vector.load %arg6[%c1_238, %c0_239, %c0_240] : memref<4x1x32xf32, #tpu.memory_space<vmem>>, vector<1x1x32xf32>
    %430 = vector.shape_cast %429 : vector<1x1x32xf32> to vector<1x32xf32>
    %431 = vector.broadcast %430 : vector<1x32xf32> to vector<8x32xf32>
    %432 = arith.addf %428, %431 : vector<8x32xf32>
    %cst_241 = arith.constant 0.000000e+00 : f32
    %433 = vector.broadcast %cst_241 : f32 to vector<8x32xf32>
    %434 = arith.maximumf %432, %433 : vector<8x32xf32>
    %c9 = arith.constant 9 : index
    %c0_242 = arith.constant 0 : index
    %c0_243 = arith.constant 0 : index
    %435 = vector.load %arg0[%c9, %c0_242, %c0_243] : memref<12x8x128xf32, #tpu.memory_space<vmem>>, vector<1x8x128xf32>
    %436 = vector.shape_cast %435 : vector<1x8x128xf32> to vector<8x128xf32>
    %c1_244 = arith.constant 1 : index
    %c0_245 = arith.constant 0 : index
    %c0_246 = arith.constant 0 : index
    %437 = vector.load %arg7[%c1_244, %c0_245, %c0_246] : memref<4x32x128xf32, #tpu.memory_space<vmem>>, vector<1x32x128xf32>
    %438 = vector.shape_cast %437 : vector<1x32x128xf32> to vector<32x128xf32>
    %cst_247 = arith.constant dense<0.000000e+00> : vector<8x128xf32>
    %439 = tpu.matmul %424, %438, %cst_247 {dimension_numbers = #tpu.dot_dimension_numbers<[1], [0], [0], [1], [0, 0, 1, 1], [], []>} : vector<8x32xf32>, vector<32x128xf32>, vector<8x128xf32> -> vector<8x128xf32>
    %440 = arith.addf %436, %439 : vector<8x128xf32>
    %441 = arith.negf %440 : vector<8x128xf32>
    %442 = math.exp %441 : vector<8x128xf32>
    %cst_248 = arith.constant 1.000000e+00 : f32
    %443 = vector.broadcast %cst_248 : f32 to vector<8x128xf32>
    %444 = arith.addf %443, %442 : vector<8x128xf32>
    %445 = arith.divf %443, %444 : vector<8x128xf32>
    %446 = math.tanh %440 : vector<8x128xf32>
    %447 = vector.extract_strided_slice %445 {offsets = [0, 0], sizes = [8, 32], strides = [1, 1]} : vector<8x128xf32> to vector<8x32xf32>
    %448 = vector.extract_strided_slice %445 {offsets = [0, 32], sizes = [8, 32], strides = [1, 1]} : vector<8x128xf32> to vector<8x32xf32>
    %449 = vector.extract_strided_slice %446 {offsets = [0, 64], sizes = [8, 32], strides = [1, 1]} : vector<8x128xf32> to vector<8x32xf32>
    %450 = vector.extract_strided_slice %445 {offsets = [0, 96], sizes = [8, 32], strides = [1, 1]} : vector<8x128xf32> to vector<8x32xf32>
    %451 = arith.mulf %448, %434 : vector<8x32xf32>
    %452 = arith.mulf %447, %449 : vector<8x32xf32>
    %453 = arith.addf %451, %452 : vector<8x32xf32>
    %454 = math.tanh %453 : vector<8x32xf32>
    %455 = arith.mulf %450, %454 : vector<8x32xf32>
    %c2_249 = arith.constant 2 : index
    %c0_250 = arith.constant 0 : index
    %c0_251 = arith.constant 0 : index
    %456 = vector.load %arg1[%c2_249, %c0_250, %c0_251] : memref<4x32x32xf32, #tpu.memory_space<vmem>>, vector<1x32x32xf32>
    %457 = vector.shape_cast %456 : vector<1x32x32xf32> to vector<32x32xf32>
    %cst_252 = arith.constant dense<0.000000e+00> : vector<8x32xf32>
    %458 = tpu.matmul %455, %457, %cst_252 {dimension_numbers = #tpu.dot_dimension_numbers<[1], [0], [0], [1], [0, 0, 1, 1], [], []>} : vector<8x32xf32>, vector<32x32xf32>, vector<8x32xf32> -> vector<8x32xf32>
    %459 = arith.addf %458, %366 : vector<8x32xf32>
    %c2_253 = arith.constant 2 : index
    %c0_254 = arith.constant 0 : index
    %c0_255 = arith.constant 0 : index
    %460 = vector.load %arg5[%c2_253, %c0_254, %c0_255] : memref<4x1x32xf32, #tpu.memory_space<vmem>>, vector<1x1x32xf32>
    %461 = vector.shape_cast %460 : vector<1x1x32xf32> to vector<1x32xf32>
    %462 = vector.broadcast %461 : vector<1x32xf32> to vector<8x32xf32>
    %463 = arith.addf %459, %462 : vector<8x32xf32>
    %cst_256 = arith.constant 0.000000e+00 : f32
    %464 = vector.broadcast %cst_256 : f32 to vector<8x32xf32>
    %465 = arith.maximumf %463, %464 : vector<8x32xf32>
    %c2_257 = arith.constant 2 : index
    %c0_258 = arith.constant 0 : index
    %c0_259 = arith.constant 0 : index
    %466 = vector.load %arg2[%c2_257, %c0_258, %c0_259] : memref<4x32x32xf32, #tpu.memory_space<vmem>>, vector<1x32x32xf32>
    %467 = vector.shape_cast %466 : vector<1x32x32xf32> to vector<32x32xf32>
    %cst_260 = arith.constant dense<0.000000e+00> : vector<8x32xf32>
    %468 = tpu.matmul %453, %467, %cst_260 {dimension_numbers = #tpu.dot_dimension_numbers<[1], [0], [0], [1], [0, 0, 1, 1], [], []>} : vector<8x32xf32>, vector<32x32xf32>, vector<8x32xf32> -> vector<8x32xf32>
    %469 = arith.addf %468, %370 : vector<8x32xf32>
    %c2_261 = arith.constant 2 : index
    %c0_262 = arith.constant 0 : index
    %c0_263 = arith.constant 0 : index
    %470 = vector.load %arg6[%c2_261, %c0_262, %c0_263] : memref<4x1x32xf32, #tpu.memory_space<vmem>>, vector<1x1x32xf32>
    %471 = vector.shape_cast %470 : vector<1x1x32xf32> to vector<1x32xf32>
    %472 = vector.broadcast %471 : vector<1x32xf32> to vector<8x32xf32>
    %473 = arith.addf %469, %472 : vector<8x32xf32>
    %cst_264 = arith.constant 0.000000e+00 : f32
    %474 = vector.broadcast %cst_264 : f32 to vector<8x32xf32>
    %475 = arith.maximumf %473, %474 : vector<8x32xf32>
    %c10 = arith.constant 10 : index
    %c0_265 = arith.constant 0 : index
    %c0_266 = arith.constant 0 : index
    %476 = vector.load %arg0[%c10, %c0_265, %c0_266] : memref<12x8x128xf32, #tpu.memory_space<vmem>>, vector<1x8x128xf32>
    %477 = vector.shape_cast %476 : vector<1x8x128xf32> to vector<8x128xf32>
    %c2_267 = arith.constant 2 : index
    %c0_268 = arith.constant 0 : index
    %c0_269 = arith.constant 0 : index
    %478 = vector.load %arg7[%c2_267, %c0_268, %c0_269] : memref<4x32x128xf32, #tpu.memory_space<vmem>>, vector<1x32x128xf32>
    %479 = vector.shape_cast %478 : vector<1x32x128xf32> to vector<32x128xf32>
    %cst_270 = arith.constant dense<0.000000e+00> : vector<8x128xf32>
    %480 = tpu.matmul %465, %479, %cst_270 {dimension_numbers = #tpu.dot_dimension_numbers<[1], [0], [0], [1], [0, 0, 1, 1], [], []>} : vector<8x32xf32>, vector<32x128xf32>, vector<8x128xf32> -> vector<8x128xf32>
    %481 = arith.addf %477, %480 : vector<8x128xf32>
    %482 = arith.negf %481 : vector<8x128xf32>
    %483 = math.exp %482 : vector<8x128xf32>
    %cst_271 = arith.constant 1.000000e+00 : f32
    %484 = vector.broadcast %cst_271 : f32 to vector<8x128xf32>
    %485 = arith.addf %484, %483 : vector<8x128xf32>
    %486 = arith.divf %484, %485 : vector<8x128xf32>
    %487 = math.tanh %481 : vector<8x128xf32>
    %488 = vector.extract_strided_slice %486 {offsets = [0, 0], sizes = [8, 32], strides = [1, 1]} : vector<8x128xf32> to vector<8x32xf32>
    %489 = vector.extract_strided_slice %486 {offsets = [0, 32], sizes = [8, 32], strides = [1, 1]} : vector<8x128xf32> to vector<8x32xf32>
    %490 = vector.extract_strided_slice %487 {offsets = [0, 64], sizes = [8, 32], strides = [1, 1]} : vector<8x128xf32> to vector<8x32xf32>
    %491 = vector.extract_strided_slice %486 {offsets = [0, 96], sizes = [8, 32], strides = [1, 1]} : vector<8x128xf32> to vector<8x32xf32>
    %492 = arith.mulf %489, %475 : vector<8x32xf32>
    %493 = arith.mulf %488, %490 : vector<8x32xf32>
    %494 = arith.addf %492, %493 : vector<8x32xf32>
    %495 = math.tanh %494 : vector<8x32xf32>
    %496 = arith.mulf %491, %495 : vector<8x32xf32>
    %c3_272 = arith.constant 3 : index
    %c0_273 = arith.constant 0 : index
    %c0_274 = arith.constant 0 : index
    %497 = vector.load %arg1[%c3_272, %c0_273, %c0_274] : memref<4x32x32xf32, #tpu.memory_space<vmem>>, vector<1x32x32xf32>
    %498 = vector.shape_cast %497 : vector<1x32x32xf32> to vector<32x32xf32>
    %cst_275 = arith.constant dense<0.000000e+00> : vector<8x32xf32>
    %499 = tpu.matmul %496, %498, %cst_275 {dimension_numbers = #tpu.dot_dimension_numbers<[1], [0], [0], [1], [0, 0, 1, 1], [], []>} : vector<8x32xf32>, vector<32x32xf32>, vector<8x32xf32> -> vector<8x32xf32>
    %500 = arith.addf %499, %367 : vector<8x32xf32>
    %c3_276 = arith.constant 3 : index
    %c0_277 = arith.constant 0 : index
    %c0_278 = arith.constant 0 : index
    %501 = vector.load %arg5[%c3_276, %c0_277, %c0_278] : memref<4x1x32xf32, #tpu.memory_space<vmem>>, vector<1x1x32xf32>
    %502 = vector.shape_cast %501 : vector<1x1x32xf32> to vector<1x32xf32>
    %503 = vector.broadcast %502 : vector<1x32xf32> to vector<8x32xf32>
    %504 = arith.addf %500, %503 : vector<8x32xf32>
    %cst_279 = arith.constant 0.000000e+00 : f32
    %505 = vector.broadcast %cst_279 : f32 to vector<8x32xf32>
    %506 = arith.maximumf %504, %505 : vector<8x32xf32>
    %c3_280 = arith.constant 3 : index
    %c0_281 = arith.constant 0 : index
    %c0_282 = arith.constant 0 : index
    %507 = vector.load %arg2[%c3_280, %c0_281, %c0_282] : memref<4x32x32xf32, #tpu.memory_space<vmem>>, vector<1x32x32xf32>
    %508 = vector.shape_cast %507 : vector<1x32x32xf32> to vector<32x32xf32>
    %cst_283 = arith.constant dense<0.000000e+00> : vector<8x32xf32>
    %509 = tpu.matmul %494, %508, %cst_283 {dimension_numbers = #tpu.dot_dimension_numbers<[1], [0], [0], [1], [0, 0, 1, 1], [], []>} : vector<8x32xf32>, vector<32x32xf32>, vector<8x32xf32> -> vector<8x32xf32>
    %510 = arith.addf %509, %371 : vector<8x32xf32>
    %c3_284 = arith.constant 3 : index
    %c0_285 = arith.constant 0 : index
    %c0_286 = arith.constant 0 : index
    %511 = vector.load %arg6[%c3_284, %c0_285, %c0_286] : memref<4x1x32xf32, #tpu.memory_space<vmem>>, vector<1x1x32xf32>
    %512 = vector.shape_cast %511 : vector<1x1x32xf32> to vector<1x32xf32>
    %513 = vector.broadcast %512 : vector<1x32xf32> to vector<8x32xf32>
    %514 = arith.addf %510, %513 : vector<8x32xf32>
    %cst_287 = arith.constant 0.000000e+00 : f32
    %515 = vector.broadcast %cst_287 : f32 to vector<8x32xf32>
    %516 = arith.maximumf %514, %515 : vector<8x32xf32>
    %c11 = arith.constant 11 : index
    %c0_288 = arith.constant 0 : index
    %c0_289 = arith.constant 0 : index
    %517 = vector.load %arg0[%c11, %c0_288, %c0_289] : memref<12x8x128xf32, #tpu.memory_space<vmem>>, vector<1x8x128xf32>
    %518 = vector.shape_cast %517 : vector<1x8x128xf32> to vector<8x128xf32>
    %c3_290 = arith.constant 3 : index
    %c0_291 = arith.constant 0 : index
    %c0_292 = arith.constant 0 : index
    %519 = vector.load %arg7[%c3_290, %c0_291, %c0_292] : memref<4x32x128xf32, #tpu.memory_space<vmem>>, vector<1x32x128xf32>
    %520 = vector.shape_cast %519 : vector<1x32x128xf32> to vector<32x128xf32>
    %cst_293 = arith.constant dense<0.000000e+00> : vector<8x128xf32>
    %521 = tpu.matmul %506, %520, %cst_293 {dimension_numbers = #tpu.dot_dimension_numbers<[1], [0], [0], [1], [0, 0, 1, 1], [], []>} : vector<8x32xf32>, vector<32x128xf32>, vector<8x128xf32> -> vector<8x128xf32>
    %522 = arith.addf %518, %521 : vector<8x128xf32>
    %523 = arith.negf %522 : vector<8x128xf32>
    %524 = math.exp %523 : vector<8x128xf32>
    %cst_294 = arith.constant 1.000000e+00 : f32
    %525 = vector.broadcast %cst_294 : f32 to vector<8x128xf32>
    %526 = arith.addf %525, %524 : vector<8x128xf32>
    %527 = arith.divf %525, %526 : vector<8x128xf32>
    %528 = math.tanh %522 : vector<8x128xf32>
    %529 = vector.extract_strided_slice %527 {offsets = [0, 0], sizes = [8, 32], strides = [1, 1]} : vector<8x128xf32> to vector<8x32xf32>
    %530 = vector.extract_strided_slice %527 {offsets = [0, 32], sizes = [8, 32], strides = [1, 1]} : vector<8x128xf32> to vector<8x32xf32>
    %531 = vector.extract_strided_slice %528 {offsets = [0, 64], sizes = [8, 32], strides = [1, 1]} : vector<8x128xf32> to vector<8x32xf32>
    %532 = vector.extract_strided_slice %527 {offsets = [0, 96], sizes = [8, 32], strides = [1, 1]} : vector<8x128xf32> to vector<8x32xf32>
    %533 = arith.mulf %530, %516 : vector<8x32xf32>
    %534 = arith.mulf %529, %531 : vector<8x32xf32>
    %535 = arith.addf %533, %534 : vector<8x32xf32>
    %536 = math.tanh %535 : vector<8x32xf32>
    %537 = arith.mulf %532, %536 : vector<8x32xf32>
    %c0_295 = arith.constant 0 : index
    %c0_296 = arith.constant 0 : index
    %538 = vector.load %arg8[%c0_295, %c0_296] : memref<32x8xf32, #tpu.memory_space<vmem>>, vector<32x8xf32>
    %cst_297 = arith.constant dense<0.000000e+00> : vector<8x8xf32>
    %539 = tpu.matmul %537, %538, %cst_297 {dimension_numbers = #tpu.dot_dimension_numbers<[1], [0], [0], [1], [0, 0, 1, 1], [], []>} : vector<8x32xf32>, vector<32x8xf32>, vector<8x8xf32> -> vector<8x8xf32>
    %c0_298 = arith.constant 0 : index
    %c0_299 = arith.constant 0 : index
    %540 = vector.load %arg9[%c0_298, %c0_299] : memref<32x8xf32, #tpu.memory_space<vmem>>, vector<32x8xf32>
    %cst_300 = arith.constant dense<0.000000e+00> : vector<8x8xf32>
    %541 = tpu.matmul %535, %540, %cst_300 {dimension_numbers = #tpu.dot_dimension_numbers<[1], [0], [0], [1], [0, 0, 1, 1], [], []>} : vector<8x32xf32>, vector<32x8xf32>, vector<8x8xf32> -> vector<8x8xf32>
    %542 = arith.addf %539, %541 : vector<8x8xf32>
    %c0_301 = arith.constant 0 : index
    %c0_302 = arith.constant 0 : index
    %543 = vector.load %arg10[%c0_301, %c0_302] : memref<1x8xf32, #tpu.memory_space<vmem>>, vector<1x8xf32>
    %544 = vector.broadcast %543 : vector<1x8xf32> to vector<8x8xf32>
    %545 = arith.addf %542, %544 : vector<8x8xf32>
    %cst_303 = arith.constant 0.000000e+00 : f32
    %546 = vector.broadcast %cst_303 : f32 to vector<8x8xf32>
    %547 = arith.maximumf %545, %546 : vector<8x8xf32>
    %cst_304 = arith.constant dense<0.000000e+00> : vector<8xf32>
    %548 = vector.multi_reduction <add>, %547, %cst_304 [0] : vector<8x8xf32> to vector<8xf32>
    %549 = vector.shape_cast %548 : vector<8xf32> to vector<1x8xf32>
    %cst_305 = arith.constant 8.000000e+00 : f32
    %550 = vector.broadcast %cst_305 : f32 to vector<1x8xf32>
    %551 = arith.divf %549, %550 : vector<1x8xf32>
    %552 = vector.broadcast %551 : vector<1x8xf32> to vector<8x8xf32>
    %553 = arith.subf %547, %552 : vector<8x8xf32>
    %554 = arith.mulf %553, %553 : vector<8x8xf32>
    %cst_306 = arith.constant dense<0.000000e+00> : vector<8xf32>
    %555 = vector.multi_reduction <add>, %554, %cst_306 [0] : vector<8x8xf32> to vector<8xf32>
    %556 = vector.shape_cast %555 : vector<8xf32> to vector<1x8xf32>
    %cst_307 = arith.constant 8.000000e+00 : f32
    %557 = vector.broadcast %cst_307 : f32 to vector<1x8xf32>
    %558 = arith.divf %556, %557 : vector<1x8xf32>
    %c0_308 = arith.constant 0 : index
    %c0_309 = arith.constant 0 : index
    %559 = vector.load %arg11[%c0_308, %c0_309] : memref<1x8xf32, #tpu.memory_space<vmem>>, vector<1x8xf32>
    %560 = vector.broadcast %551 : vector<1x8xf32> to vector<8x8xf32>
    %561 = arith.subf %547, %560 : vector<8x8xf32>
    %562 = vector.broadcast %559 : vector<1x8xf32> to vector<8x8xf32>
    %563 = arith.mulf %562, %561 : vector<8x8xf32>
    %cst_310 = arith.constant 9.99999974E-6 : f32
    %564 = vector.broadcast %cst_310 : f32 to vector<1x8xf32>
    %565 = arith.addf %558, %564 : vector<1x8xf32>
    %566 = math.rsqrt %565 : vector<1x8xf32>
    %567 = vector.broadcast %566 : vector<1x8xf32> to vector<8x8xf32>
    %568 = arith.mulf %563, %567 : vector<8x8xf32>
    %c0_311 = arith.constant 0 : index
    %c0_312 = arith.constant 0 : index
    %569 = vector.load %arg12[%c0_311, %c0_312] : memref<1x8xf32, #tpu.memory_space<vmem>>, vector<1x8xf32>
    %570 = vector.broadcast %569 : vector<1x8xf32> to vector<8x8xf32>
    %571 = arith.addf %568, %570 : vector<8x8xf32>
    %572 = arith.negf %571 : vector<8x8xf32>
    %573 = math.exp %572 : vector<8x8xf32>
    %cst_313 = arith.constant 1.000000e+00 : f32
    %574 = vector.broadcast %cst_313 : f32 to vector<8x8xf32>
    %575 = arith.addf %574, %573 : vector<8x8xf32>
    %576 = arith.divf %574, %575 : vector<8x8xf32>
    %c0_314 = arith.constant 0 : index
    %c0_315 = arith.constant 0 : index
    %577 = vector.load %arg13[%c0_314, %c0_315] : memref<8x8xf32, #tpu.memory_space<vmem>>, vector<8x8xf32>
    tpu.vector_store %arg13[%c0_314, %c0_315], %576 {strides = array<i32>} : memref<8x8xf32, #tpu.memory_space<vmem>>, vector<8x8xf32>,
    %c0_316 = arith.constant 0 : index
    %c0_317 = arith.constant 0 : index
    %578 = vector.load %arg14[%c0_316, %c0_317] : memref<8x32xf32, #tpu.memory_space<vmem>>, vector<8x32xf32>
    tpu.vector_store %arg14[%c0_316, %c0_317], %537 {strides = array<i32>} : memref<8x32xf32, #tpu.memory_space<vmem>>, vector<8x32xf32>,
    return
  }
}

</mosaic_0001>

<bundles_post_ra>
// kernel: tpu_custom_call.1
= control target key start
LH: loop header
LB: loop body
LE: loop exit
PB: predicated region body
PF: predicated region fallthrough
CT: control target
= control target key end

     0   :  { %20 = vsyncpa [#allocation3], 0  ;;  %s3387_s0 = inlined_call_operand.hbm [shape: f32[12,8,128], index: 0, kind: input, shape index: {}]   ;;  %s3388_s1 = inlined_call_operand.hbm [shape: f32[4,32,32], index: 1, kind: input, shape index: {}]   ;;  %s3389_s2 = inlined_call_operand.hbm [shape: f32[4,32,32], index: 2, kind: input, shape index: {}]   ;;  %s3390_s3 = inlined_call_operand.hbm [shape: f32[128,128], index: 3, kind: input, shape index: {}]   ;;  %s3391_s4 = inlined_call_operand.hbm [shape: f32[128,128], index: 4, kind: input, shape index: {}]   ;;  %s3392_s5 = inlined_call_operand.vmem [shape: f32[4,1,32], index: 5, kind: input, shape index: {}]   ;;  %s3393_s6 = inlined_call_operand.vmem [shape: f32[4,1,32], index: 6, kind: input, shape index: {}]   ;;  %s3394_s7 = inlined_call_operand.hbm [shape: f32[4,32,128], index: 7, kind: input, shape index: {}]   ;;  %s3395_s8 = inlined_call_operand.vmem [shape: f32[32,8], index: 8, kind: input, shape index: {}]   ;;  %s3396_s9 = inlined_call_operand.vmem [shape: f32[32,8], index: 9, kind: input, shape index: {}]   ;;  %s3397_s10 = inlined_call_operand.vmem [shape: f32[1,8], index: 10, kind: input, shape index: {}]   ;;  %s3398_s11 = inlined_call_operand.vmem [shape: f32[1,8], index: 11, kind: input, shape index: {}]   ;;  %s3399_s12 = inlined_call_operand.vmem [shape: f32[1,8], index: 12, kind: input, shape index: {}]   ;;  %s3400_s13 = inlined_call_operand.hbm [shape: f32[8,8], index: 13, kind: output, shape index: {0}]   ;;  %s3401_s14 = inlined_call_operand.hbm [shape: f32[8,32], index: 14, kind: output, shape index: {1}]  }
   0x1   :  { %21 = vsyncpa [#allocation6], 0 }
   0x2   :  { %22 = vsyncpa [#allocation9], 0 }
   0x3   :  { %23 = vsyncpa [#allocation12], 0 }
   0x4   :  { %24 = vsyncpa [#allocation4], 0 }
   0x5   :  { %25 = vsyncpa [#allocation15], 0  ;;  %s43_s15 = sshll.u32 %s3388_s1, 4  ;;  %s2541_s16 = smov [#allocation5]   ;;  %s44_s15 = int_to_ptr.hbm [resolvable:$true] %s43_s15 }
   0x6   :  { %s45_s17 = sshll.u32 %s2541_s16, 4  ;;  %s69_s20 = sshll.u32 %s3390_s3, 4  ;;  %s46_s17 = int_to_ptr.vmem [resolvable:$true] %s45_s17  ;;  %s70_s20 = int_to_ptr.hbm [resolvable:$true] %s69_s20 }
   0x7   :  { %s2542_s21 = smov 128   ;;  %s2543_s22 = smov 8  }
   0x8   :  { %51 = dma.hbm_to_vmem [thread:$0]  %s44_s15, 2048, %s46_s17, [#allocation6], %s2542_s21, %s2542_s21, %s2543_s22  }
   0x9   :  { %s2544_s23 = smov [#allocation8]   ;;  %s30_s1 = sshll.u32 %s3387_s0, 4  ;;  %s31_s1 = int_to_ptr.hbm [resolvable:$true] %s30_s1 }
   0xa   :  { %s71_s24 = sshll.u32 %s2544_s23, 4  ;;  %s56_s28 = sshll.u32 %s3389_s2, 4  ;;  %s72_s24 = int_to_ptr.vmem [resolvable:$true] %s71_s24  ;;  %s57_s28 = int_to_ptr.hbm [resolvable:$true] %s56_s28 }
   0xb   :  { %77 = dma.hbm_to_vmem [thread:$0]  %s70_s20, 2048, %s72_s24, [#allocation9], %s2542_s21, %s2542_s21, %s2543_s22  }
   0xc   :  { %s2545_s29 = smov [#allocation2]   ;;  %s2546_s15 = smov [#allocation7]  }
   0xd   :  { %s32_s30 = sshll.u32 %s2545_s29, 4  ;;  %s58_s0 = sshll.u32 %s2546_s15, 4  ;;  %s33_s30 = int_to_ptr.vmem [resolvable:$true] %s32_s30  ;;  %s59_s0 = int_to_ptr.vmem [resolvable:$true] %s58_s0 }
   0xe   :  { %38 = dma.hbm_to_vmem [thread:$0]  %s31_s1, 1536, %s33_s30, [#allocation3], %s2542_s21, %s2542_s21, %s2543_s22  }
   0xf   :  { %s82_s18 = sshll.u32 %s3391_s4, 4  ;;  %s99_s20 = sshll.u32 %s3394_s7, 4  ;;  %s83_s18 = int_to_ptr.hbm [resolvable:$true] %s82_s18  ;;  %s100_s20 = int_to_ptr.hbm [resolvable:$true] %s99_s20 }
  0x10   :  { %64 = dma.hbm_to_vmem [thread:$0]  %s57_s28, 2048, %s59_s0, [#allocation6], %s2542_s21, %s2542_s21, %s2543_s22  }
  0x11   :  { %s2547_s23 = smov [#allocation10]   ;;  %s2548_s25 = smov [#allocation11]  }
  0x12   :  { %s84_s24 = sshll.u32 %s2547_s23, 4  ;;  %s101_s4 = sshll.u32 %s2548_s25, 4  ;;  %s85_s24 = int_to_ptr.vmem [resolvable:$true] %s84_s24  ;;  %s102_s4 = int_to_ptr.vmem [resolvable:$true] %s101_s4 }
  0x13   :  { %90 = dma.hbm_to_vmem [thread:$0]  %s83_s18, 2048, %s85_s24, [#allocation9], %s2542_s21, %s2542_s21, %s2543_s22  }
  0x14   :  { %107 = dma.hbm_to_vmem [thread:$0]  %s100_s20, 2048, %s102_s4, [#allocation12], %s2542_s21, %s2542_s21, %s2543_s22  }
  0x15   :  { %2529 = dma.done.wait [#allocation3], 1536  }
  0x16   :  { %2530 = vsyncadd [#allocation3], 4294965760 }
  0x17   :  { %2531 = dma.done.wait [#allocation6], 4096  }
  0x18   :  { %2532 = vsyncadd [#allocation6], 4294963200 }
  0x19   :  { %2533 = dma.done.wait [#allocation9], 4096  }
  0x1a   :  { %2534 = vsyncadd [#allocation9], 4294963200 }
  0x1b   :  { %2535 = dma.done.wait [#allocation12], 2048  }
  0x1c   :  { %2536 = vsyncadd [#allocation12], 4294965248  ;;  %v2667_v0 = vld [vmem:[#allocation8 + $0x78] sm:$0xff]  ;;  %v2669_v1 = vld [vmem:[#allocation8 + $0x70] sm:$0xff]  ;;  %v2549_v16 = vmov 0.0   ;;  %vm218_vm0 = vcmask 261120  }
  0x1d   :  { %158 = vmatpush.msra.mxu0 %v2667_v0  ;;  %v2672_v2 = vld [vmem:[#allocation8 + $0x68] sm:$0xff]  ;;  %v2675_v3 = vld [vmem:[#allocation5 + $0x18] sm:$0xff]  ;;  %v2677_v4 = vld [vmem:[#allocation8 + $0x60] sm:$0xff]  ;;  %s2550_s1 = smov 64   ;;  %s2551_s3 = smov 32  }
  0x1e   :  { %234 = vmatpush.msra.mxu2 %v2675_v3  ;;  %v2680_v5 = vld [vmem:[#allocation5 + $0x10] sm:$0xff]  ;;  %v2683_v6 = vld [vmem:[#allocation5 + $0x8] sm:$0xff]  ;;  %v2685_v7 = vld [vmem:[#allocation8 + $0x58] sm:$0xff]  ;;  %s2552_s27 = smov 96  }
  0x1f   :  { %159 = vmatpush.msra.mxu0 %v2669_v1  ;;  %v2687_v8 = vld [vmem:[#allocation8 + $0x50] sm:$0xff]  ;;  %v2690_v9 = vld [vmem:[#allocation10 + $0x78] sm:$0xff]  ;;  %v2693_v10 = vld [vmem:[#allocation5] sm:$0xff] }
  0x20   :  { %235 = vmatpush.msra.mxu2 %v2680_v5  ;;  %194 = vmatpush.msra.mxu1 %v2690_v9  ;;  %v2696_v11 = vld [vmem:[#allocation10 + $0x70] sm:$0xff]  ;;  %v2698_v12 = vld [vmem:[#allocation10 + $0x68] sm:$0xff]  ;;  %v2703_v14 = vld [vmem:[#allocation11 + $0x18] sm:$0xff] }
  0x21   :  { %160 = vmatpush.msra.mxu0 %v2672_v2  ;;  %v2700_v13 = vld [vmem:[#allocation8 + $0x48] sm:$0xff]  ;;  %v2707_v15 = vld [vmem:[#allocation10 + $0x60] sm:$0xff]  ;;  %v2717_v18 = vld [vmem:[#allocation8 + $0x38] sm:$0xff] }
  0x22   :  { %236 = vmatpush.msra.mxu2 %v2683_v6  ;;  %195 = vmatpush.msra.mxu1 %v2696_v11  ;;  %v2712_v17 = vld [vmem:[#allocation8 + $0x40] sm:$0xff]  ;;  %v2721_v19 = vld [vmem:[#allocation8 + $0x30] sm:$0xff]  ;;  %v2724_v20 = vld [vmem:[#allocation8 + $0x28] sm:$0xff] }
  0x23   :  { %161 = vmatpush.msra.mxu0 %v2677_v4  ;;  %v2727_v21 = vld [vmem:[#allocation8 + $0x20] sm:$0xff]  ;;  %v2730_v22 = vld [vmem:[#allocation8 + $0x18] sm:$0xff]  ;;  %v2733_v23 = vld [vmem:[#allocation8 + $0x10] sm:$0xff] }
  0x24   :  { %237 = vmatpush.msra.mxu2 %v2693_v10  ;;  %196 = vmatpush.msra.mxu1 %v2698_v12  ;;  %v2736_v24 = vld [vmem:[#allocation8 + $0x8] sm:$0xff]  ;;  %v2739_v25 = vld [vmem:[#allocation8] sm:$0xff]  ;;  %v2744_v26 = vld [vmem:[#allocation10 + $0x58] sm:$0xff] }
  0x25   :  { %162 = vmatpush.msra.mxu0 %v2685_v7  ;;  %238 = vmatmul.f32.vlgmr.msra.gmra.mxu2 %v2549_v16  ;;  %3433 = vst [vmem:[#allocation22_spill] sm:$0xff] %v2736_v24  ;;  %v2747_v27 = vld [vmem:[#allocation11 + $0x10] sm:$0xff]  ;;  %v2753_v29 = vld [vmem:[#allocation11 + $0x8] sm:$0xff]  ;;  %v2759_v31 = vld [vmem:[#allocation11] sm:$0xff] }
  0x26   :  { %298 = vmatpush.msrb.mxu2 %v2703_v14  ;;  %197 = vmatpush.msra.mxu1 %v2707_v15  ;;  %3434 = vst [vmem:[#allocation23_spill] sm:$0xff] %v2739_v25  ;;  %v2750_v28 = vld [vmem:[#allocation10 + $0x50] sm:$0xff]  ;;  %v2756_v30 = vld [vmem:[#allocation10 + $0x48] sm:$0xff]  ;;  %v2761_v32 = vld [vmem:[#allocation10 + $0x40] sm:$0xff] }
  0x27   :  { %163 = vmatpush.msra.mxu0 %v2687_v8  ;;  %v2765_v33 = vld [vmem:[#allocation10 + $0x38] sm:$0xff]  ;;  %v2769_v35 = vld [vmem:[#allocation10 + $0x30] sm:$0xff]  ;;  %v2775_v37 = vld [vmem:[#allocation7 + $0x8] sm:$0xff] }
  0x28   :  { %198 = vmatpush.msra.mxu1 %v2744_v26  ;;  %299 = vmatpush.msrb.mxu2 %v2747_v27  ;;  %v2767_v34 = vld [vmem:[#allocation7 + $0x18] sm:$0xff]  ;;  %v2772_v36 = vld [vmem:[#allocation7 + $0x10] sm:$0xff]  ;;  %v2777_v38 = vld [vmem:[#allocation10 + $0x28] sm:$0xff] }
  0x29   :  { %164 = vmatpush.msra.mxu0 %v2700_v13  ;;  %264 = vmatpush.msra.mxu3 %v2767_v34  ;;  %v2781_v39 = vld [vmem:[#allocation7] sm:$0xff]  ;;  %v2787_v41 = vld [vmem:[#allocation10 + $0x18] sm:$0xff]  ;;  %v2792_v42 = vld [vmem:[#allocation10 + $0x10] sm:$0xff] }
  0x2a   :  { %199 = vmatpush.msra.mxu1 %v2750_v28  ;;  %300 = vmatpush.msrb.mxu2 %v2753_v29  ;;  %v2783_v40 = vld [vmem:[#allocation10 + $0x20] sm:$0xff]  ;;  %v2795_v43 = vld [vmem:[#allocation10 + $0x8] sm:$0xff] }
  0x2b   :  { %165 = vmatpush.msra.mxu0 %v2712_v17  ;;  %265 = vmatpush.msra.mxu3 %v2772_v36  ;;  %v2798_v44 = vld [vmem:[#allocation10] sm:$0xff] }
  0x2c   :  { %200 = vmatpush.msra.mxu1 %v2756_v30  ;;  %301 = vmatpush.msrb.mxu2 %v2759_v31  ;;  %v2806_v46 = vld [vmem:[%s3392_s5] ss:$0 sm:$0xff] }
  0x2d   :  { %166 = vmatpush.msra.mxu0 %v2717_v18  ;;  %266 = vmatpush.msra.mxu3 %v2775_v37  ;;  %3435 = vst [vmem:[#allocation24_spill] sm:$0xff] %v2806_v46  ;;  %v278_v51 = vld [vmem:[#allocation2] sm:$0xff] }
  0x2e   :  { %201 = vmatpush.msra.mxu1 %v2761_v32  ;;  %v2819_v57 = vld [vmem:[%s3393_s6] ss:$0 sm:$0xff] }
  0x2f   :  { %167 = vmatpush.msra.mxu0 %v2721_v19  ;;  %267 = vmatpush.msra.mxu3 %v2781_v39  ;;  %3436 = vst [vmem:[#allocation25_spill] sm:$0xff] %v2819_v57 }
  0x30   :  { %202 = vmatpush.msra.mxu1 %v2765_v33  ;;  %268 = vmatmul.f32.vlgmr.msra.gmra.mxu3 %v2549_v16 }
  0x31   :  { %168 = vmatpush.msra.mxu0 %v2724_v20 }
  0x32   :  { %203 = vmatpush.msra.mxu1 %v2769_v35 }
  0x33   :  { %169 = vmatpush.msra.mxu0 %v2727_v21 }
  0x34   :  { %204 = vmatpush.msra.mxu1 %v2777_v38 }
  0x35   :  { %170 = vmatpush.msra.mxu0 %v2730_v22 }
  0x36   :  { %205 = vmatpush.msra.mxu1 %v2783_v40 }
  0x37   :  { %171 = vmatpush.msra.mxu0 %v2733_v23 }
  0x38   :  { %206 = vmatpush.msra.mxu1 %v2787_v41 }
  0x39   :  { %172 = vmatpush.msra.mxu0 %v2736_v24 }
  0x3a   :  { %207 = vmatpush.msra.mxu1 %v2792_v42 }
  0x3b   :  { %173 = vmatpush.msra.mxu0 %v2739_v25 }
  0x3c   :  { %174 = vmatmul.f32.vlgmr.msra.gmra.mxu0 %v2549_v16  ;;  %208 = vmatpush.msra.mxu1 %v2795_v43 }
  0x3e   :  { %209 = vmatpush.msra.mxu1 %v2798_v44 }
  0x3f   :  { %210 = vmatmul.f32.vlgmr.msra.gmra.mxu1 %v2549_v16 }
  0xa8   :  { %v239_v45 = vpop.f32.mrf.mxu2 }
  0xb3   :  { %v269_v55 = vpop.f32.mrf.mxu3 }
  0xb9   :  { %v2808_v47 = vpop.f32.mrf.mxu0 }
  0xba   :  { %v240_v48 = vadd.f32 %v239_v45, %v2808_v47 }
  0xbc   :  { %v246_v49 = vadd.f32 %v2806_v46, %v240_v48  ;;  %v2813_v54 = vpop.f32.mrf.mxu1  ;;  %v2874_v46 = vld [vmem:[#allocation11 + $0x30] sm:$0xff] }
  0xbd   :  { %v270_v56 = vadd.f32 %v269_v55, %v2813_v54  ;;  %3446 = vst [vmem:[#allocation35_spill] sm:$0xff] %v2874_v46 }
  0xbe   :  { %v247_v50 = vmax.f32 %v246_v49, 0.0 }
  0xbf   :  { %v276_v59 = vadd.f32 %v2819_v57, %v270_v56 }
  0xc0   :  { %2108 = vmatmul.msk.f32.vlgmr.msrb.gmra.mxu2 %vm218_vm0, %v247_v50 }
  0xc1   :  { %v277_v60 = vmax.f32 %v276_v59, 0.0 }
 0x143   :  { %v303_v52 = vpop.f32.mrf.mxu2 }
 0x144   :  { %v306_v53 = vadd.f32 %v303_v52, %v278_v51 }
 0x146   :  { %2189 = vtanh.f32 %v306_v53  ;;  %v2109_v61 = vmul.f32 -1.442695, %v306_v53 }
 0x148   :  { %2191 = vpow2.f32 %v2109_v61  ;;  %v2827_v61 = vld [vmem:[#allocation7 + $0x30] sm:$0xff] }
 0x149   :  { %3438 = vst [vmem:[#allocation27_spill] sm:$0xff] %v2827_v61 }
 0x14c   :  { %v2190_v58 = vpop.eup %2189 }
 0x14d   :  { %333 = vrot.lane.b32.xlu0 %v2190_v58, %s2550_s1 }
 0x14e   :  { %v2192_v62 = vpop.eup %2191 }
 0x14f   :  { %v310_v63 = vadd.f32 1.0, %v2192_v62  ;;  %v2830_v62 = vld [vmem:[#allocation7 + $0x28] sm:$0xff] }
 0x150   :  { %3439 = vst [vmem:[#allocation28_spill] sm:$0xff] %v2830_v62 }
 0x151   :  { %2193 = vrcp.f32 %v310_v63  ;;  %v322_v51 = vand.u32 2147483648, %v310_v63  ;;  %vm316_vm2 = vweird.f32 %v310_v63  ;;  %v320_v52 = vand.u32 2147483647, %v310_v63 }
 0x153   :  { %v323_v56 = vor.u32 1.1754944e-38, %v322_v51  ;;  %vm321_vm4 = vcmp.eq.f32.partialorder %v320_v52, 8.507059e+37  ;;  %v2841_v51 = vld [vmem:[#allocation5 + $0x38] sm:$0xff]  ;;  %v2843_v52 = vld [vmem:[#allocation5 + $0x30] sm:$0xff] }
 0x154   :  { %374 = vmatpush.msrb.mxu3 %v2841_v51 }
 0x155   :  { %328 = vrot.lane.b32.xlu0 %v277_v60, %s2551_s3  ;;  %v2825_v60 = vld [vmem:[#allocation7 + $0x38] sm:$0xff] }
 0x156   :  { %3437 = vst [vmem:[#allocation26_spill] sm:$0xff] %v2825_v60  ;;  %415 = vmatpush.msra.mxu2 %v2825_v60  ;;  %375 = vmatpush.msrb.mxu3 %v2843_v52 }
 0x157   :  { %v2194_v16 = vpop.eup %2193 }
 0x158   :  { %v312_v45 = vmul.f32 %v2194_v16, %v310_v63  ;;  %vm317_vm1 = vweird.f32 %v2194_v16  ;;  %416 = vmatpush.msra.mxu2 %v2827_v61  ;;  %v2833_v63 = vld [vmem:[#allocation7 + $0x20] sm:$0xff] }
 0x159   :  { %vm318_vm3 = vmor %vm316_vm2, %vm317_vm1  ;;  %3440 = vst [vmem:[#allocation29_spill] sm:$0xff] %v2833_v63  ;;  %vm814_vm2 = vcmask 523264  }
 0x15a   :  { %v313_v48 = vsub.f32 1.0, %v312_v45  ;;  %417 = vmatpush.msra.mxu2 %v2830_v62 }
 0x15c   :  { %v314_v49 = vmul.f32 %v2194_v16, %v313_v48  ;;  %418 = vmatpush.msra.mxu2 %v2833_v63  ;;  %v2877_v63 = vld [vmem:[#allocation11 + $0x28] sm:$0xff] }
 0x15d   :  { %3447 = vst [vmem:[#allocation36_spill] sm:$0xff] %v2877_v63 }
 0x15e   :  { %v315_v50 = vadd.f32 %v2194_v16, %v314_v49 }
 0x160   :  { %v319_v55 = vsel %vm318_vm3, %v2194_v16, %v315_v50  ;;  %vm816_vm3 = vcmask 785408  }
 0x161   :  { %v324_v59 = vsel %vm321_vm4, %v323_v56, %v319_v55  ;;  %v2846_v55 = vld [vmem:[#allocation5 + $0x28] sm:$0xff]  ;;  %v2849_v56 = vld [vmem:[#allocation5 + $0x20] sm:$0xff] }
 0x162   :  { %3441 = vst [vmem:[#allocation30_spill] sm:$0xff] %v2849_v56  ;;  %376 = vmatpush.msrb.mxu3 %v2846_v55 }
 0x164   :  { %377 = vmatpush.msrb.mxu3 %v2849_v56 }
 0x1bf   :  { %v334_v58 = vpop.permute.xlu0 %333 }
 0x1c0   :  { %v336_v53 = vmul.f32 %v334_v58, %v324_v59 }
 0x1c2   :  { %338 = vrot.lane.b32.xlu1 %v336_v53, %s2551_s3 }
 0x1c7   :  { %v329_v16 = vpop.permute.xlu0 %328 }
 0x1c8   :  { %v331_v45 = vmul.f32 %v329_v16, %v324_v59 }
 0x234   :  { %v339_v48 = vpop.permute.xlu1 %338 }
 0x235   :  { %v341_v49 = vadd.f32 %v339_v48, %v331_v45  ;;  %v2864_v48 = vld [vmem:[#allocation11 + $0x38] sm:$0xff] }
 0x236   :  { %3444 = vst [vmem:[#allocation33_spill] sm:$0xff] %v2864_v48  ;;  %452 = vmatpush.msra.mxu3 %v2864_v48  ;;  %v2880_v48 = vld [vmem:[#allocation11 + $0x20] sm:$0xff] }
 0x237   :  { %2195 = vtanh.f32 %v341_v49  ;;  %395 = vrot.lane.b32.xlu0 %v341_v49, %s2552_s27  ;;  %v2870_v49 = vld [vmem:[%s3393_s6 + $0x1] ss:$0 sm:$0xff]  ;;  %3448 = vst [vmem:[#allocation37_spill] sm:$0xff] %v2880_v48 }
 0x238   :  { %3445 = vst [vmem:[#allocation34_spill] sm:$0xff] %v2870_v49  ;;  %453 = vmatpush.msra.mxu3 %v2874_v46  ;;  %v431_v46 = vld [vmem:[#allocation2 + $0x8] sm:$0xff] }
 0x23a   :  { %454 = vmatpush.msra.mxu3 %v2877_v63 }
 0x23c   :  { %455 = vmatpush.msra.mxu3 %v2880_v48 }
 0x23d   :  { %v2196_v50 = vpop.eup %2195 }
 0x23e   :  { %344 = vrot.lane.b32.xlu1 %v2196_v50, %s2550_s1 }
 0x246   :  { %398 = vrot.lane.b32.xlu1 %v2813_v54, %s2552_s27 }
 0x2a9   :  { %v2853_v58 = vpop.permute.xlu0 %395 }
 0x2aa   :  { %3442 = vst [vmem:[#allocation31_spill] sm:$0xff] %v2853_v58  ;;  %2112 = vmatmul.msk.f32.vlgmr.msra.gmra.mxu2 %vm218_vm0, %v2853_v58 }
 0x2b0   :  { %v345_v53 = vpop.permute.xlu1 %344 }
 0x2b1   :  { %v347_v16 = vmul.f32 %v345_v53, %v324_v59 }
 0x2b3   :  { %354 = vrot.lane.b32.xlu2 %v347_v16, %s2551_s3 }
 0x2b8   :  { %v399_v59 = vpop.permute.xlu1 %398 }
 0x2bb   :  { %357 = vrot.lane.b32.xlu2 %v2808_v47, %s2552_s27 }
 0x30d   :  { %v2860_v45 = vpop.permute.xlu2 %354 }
 0x30e   :  { %3443 = vst [vmem:[#allocation32_spill] sm:$0xff] %v2860_v45  ;;  %2110 = vmatmul.msk.f32.vlgmr.msrb.gmra.mxu3 %vm218_vm0, %v2860_v45 }
 0x32d   :  { %v420_v50 = vpop.f32.mrf.mxu2 }
 0x32e   :  { %v421_v53 = vadd.f32 %v420_v50, %v399_v59  ;;  %v2886_v59 = vld [vmem:[%s3392_s5 + $0x1] ss:$0 sm:$0xff]  ;;  %v358_v50 = vpop.permute.xlu2 %357 }
 0x32f   :  { %3449 = vst [vmem:[#allocation38_spill] sm:$0xff] %v2886_v59 }
 0x330   :  { %v428_v16 = vadd.f32 %v2870_v49, %v421_v53 }
 0x332   :  { %v429_v57 = vmax.f32 %v428_v16, 0.0 }
 0x334   :  { %482 = vrot.lane.b32.xlu0 %v429_v57, %s2551_s3 }
 0x391   :  { %v379_v53 = vpop.f32.mrf.mxu3 }
 0x392   :  { %v380_v57 = vadd.f32 %v379_v53, %v358_v50 }
 0x394   :  { %v387_v16 = vadd.f32 %v2886_v59, %v380_v57 }
 0x396   :  { %v388_v49 = vmax.f32 %v387_v16, 0.0 }
 0x398   :  { %2114 = vmatmul.msk.f32.vlgmr.msra.gmra.mxu3 %vm218_vm0, %v388_v49 }
 0x41b   :  { %v457_v62 = vpop.f32.mrf.mxu3 }
 0x41c   :  { %v460_v63 = vadd.f32 %v457_v62, %v431_v46 }
 0x41e   :  { %2197 = vtanh.f32 %v460_v63  ;;  %v2115_v48 = vmul.f32 -1.442695, %v460_v63 }
 0x420   :  { %2199 = vpow2.f32 %v2115_v48 }
 0x424   :  { %v2198_v61 = vpop.eup %2197 }
 0x425   :  { %487 = vrot.lane.b32.xlu2 %v2198_v61, %s2550_s1 }
 0x426   :  { %v2200_v60 = vpop.eup %2199 }
 0x427   :  { %v464_v45 = vadd.f32 1.0, %v2200_v60  ;;  %v483_v60 = vpop.permute.xlu0 %482 }
 0x429   :  { %2201 = vrcp.f32 %v464_v45  ;;  %v476_v16 = vand.u32 2147483648, %v464_v45  ;;  %vm470_vm6 = vweird.f32 %v464_v45  ;;  %v474_v49 = vand.u32 2147483647, %v464_v45 }
 0x42b   :  { %v477_v62 = vor.u32 1.1754944e-38, %v476_v16  ;;  %vm475_vm8 = vcmp.eq.f32.partialorder %v474_v49, 8.507059e+37  ;;  %v2912_v16 = vld [vmem:[#allocation5 + $0x58] sm:$0xff]  ;;  %v2914_v49 = vld [vmem:[#allocation5 + $0x50] sm:$0xff] }
 0x42c   :  { %3454 = vst [vmem:[#allocation43_spill] sm:$0xff] %v2912_v16  ;;  %527 = vmatpush.msrb.mxu2 %v2912_v16 }
 0x42d   :  { %3455 = vst [vmem:[#allocation44_spill] sm:$0xff] %v2914_v49 }
 0x42e   :  { %528 = vmatpush.msrb.mxu2 %v2914_v49 }
 0x42f   :  { %v2202_v58 = vpop.eup %2201 }
 0x430   :  { %v466_v56 = vmul.f32 %v2202_v58, %v464_v45  ;;  %vm471_vm5 = vweird.f32 %v2202_v58 }
 0x431   :  { %vm472_vm7 = vmor %vm470_vm6, %vm471_vm5 }
 0x432   :  { %v467_v50 = vsub.f32 1.0, %v466_v56 }
 0x434   :  { %v468_v53 = vmul.f32 %v2202_v58, %v467_v50 }
 0x436   :  { %v469_v57 = vadd.f32 %v2202_v58, %v468_v53  ;;  %v2905_v53 = vld [vmem:[#allocation7 + $0x48] sm:$0xff] }
 0x437   :  { %3452 = vst [vmem:[#allocation41_spill] sm:$0xff] %v2905_v53 }
 0x438   :  { %v473_v46 = vsel %vm472_vm7, %v2202_v58, %v469_v57  ;;  %v2900_v58 = vld [vmem:[#allocation7 + $0x58] sm:$0xff]  ;;  %v2908_v57 = vld [vmem:[#allocation7 + $0x40] sm:$0xff] }
 0x439   :  { %v478_v61 = vsel %vm475_vm8, %v477_v62, %v473_v46  ;;  %3450 = vst [vmem:[#allocation39_spill] sm:$0xff] %v2900_v58  ;;  %567 = vmatpush.msrb.mxu3 %v2900_v58  ;;  %v2917_v46 = vld [vmem:[#allocation5 + $0x48] sm:$0xff]  ;;  %v2920_v62 = vld [vmem:[#allocation5 + $0x40] sm:$0xff]  ;;  %v2942_v58 = vld [vmem:[#allocation11 + $0x50] sm:$0xff] }
 0x43a   :  { %v485_v56 = vmul.f32 %v483_v60, %v478_v61  ;;  %3453 = vst [vmem:[#allocation42_spill] sm:$0xff] %v2908_v57  ;;  %529 = vmatpush.msrb.mxu2 %v2917_v46 }
 0x43b   :  { %3456 = vst [vmem:[#allocation45_spill] sm:$0xff] %v2917_v46 }
 0x43c   :  { %3457 = vst [vmem:[#allocation46_spill] sm:$0xff] %v2920_v62  ;;  %530 = vmatpush.msrb.mxu2 %v2920_v62  ;;  %v2948_v62 = vld [vmem:[#allocation11 + $0x40] sm:$0xff] }
 0x43d   :  { %3460 = vst [vmem:[#allocation49_spill] sm:$0xff] %v2942_v58 }
 0x43e   :  { %3462 = vst [vmem:[#allocation51_spill] sm:$0xff] %v2948_v62 }
 0x47f   :  { %v488_v59 = vpop.permute.xlu2 %487 }
 0x480   :  { %v490_v63 = vmul.f32 %v488_v59, %v478_v61  ;;  %v2903_v59 = vld [vmem:[#allocation7 + $0x50] sm:$0xff] }
 0x481   :  { %3451 = vst [vmem:[#allocation40_spill] sm:$0xff] %v2903_v59  ;;  %568 = vmatpush.msrb.mxu3 %v2903_v59 }
 0x482   :  { %492 = vrot.lane.b32.xlu1 %v490_v63, %s2551_s3 }
 0x483   :  { %569 = vmatpush.msrb.mxu3 %v2905_v53 }
 0x485   :  { %570 = vmatpush.msrb.mxu3 %v2908_v57 }
 0x48a   :  { %510 = vrot.lane.b32.xlu1 %v2808_v47, %s2550_s1 }
 0x4f4   :  { %v493_v48 = vpop.permute.xlu1 %492 }
 0x4f5   :  { %v2894_v50 = vadd.f32 %v493_v48, %v485_v56 }
 0x4f7   :  { %2203 = vtanh.f32 %v2894_v50 }
 0x4fd   :  { %v2204_v45 = vpop.eup %2203 }
 0x4fe   :  { %498 = vrot.lane.b32.xlu2 %v2204_v45, %s2550_s1  ;;  %v2935_v45 = vld [vmem:[%s3393_s6 + $0x2] ss:$0 sm:$0xff] }
 0x4ff   :  { %3458 = vst [vmem:[#allocation47_spill] sm:$0xff] %v2935_v45 }
 0x506   :  { %548 = vrot.lane.b32.xlu2 %v2894_v50, %s2552_s27 }
 0x558   :  { %v499_v63 = vpop.permute.xlu2 %498 }
 0x559   :  { %v2924_v60 = vmul.f32 %v499_v63, %v478_v61 }
 0x55b   :  { %508 = vrot.lane.b32.xlu0 %v2924_v60, %s2551_s3 }
 0x560   :  { %v549_v56 = vpop.permute.xlu2 %548 }
 0x561   :  { %2118 = vmatmul.msk.f32.vlgmr.msrb.gmra.mxu3 %vm218_vm0, %v549_v56  ;;  %v2939_v56 = vld [vmem:[#allocation11 + $0x58] sm:$0xff] }
 0x562   :  { %3459 = vst [vmem:[#allocation48_spill] sm:$0xff] %v2939_v56  ;;  %604 = vmatpush.msrb.mxu0 %v2939_v56 }
 0x563   :  { %550 = vrot.lane.b32.xlu0 %v2813_v54, %s2550_s1 }
 0x564   :  { %605 = vmatpush.msrb.mxu0 %v2942_v58 }
 0x5cd   :  { %v509_v48 = vpop.permute.xlu0 %508 }
 0x5ce   :  { %2116 = vmatmul.msk.f32.vlgmr.msrb.gmra.mxu2 %vm218_vm0, %v509_v48  ;;  %v2945_v48 = vld [vmem:[#allocation11 + $0x48] sm:$0xff] }
 0x5cf   :  { %3461 = vst [vmem:[#allocation50_spill] sm:$0xff] %v2945_v48  ;;  %606 = vmatpush.msrb.mxu0 %v2945_v48 }
 0x5d1   :  { %607 = vmatpush.msrb.mxu0 %v2948_v62 }
 0x5d3   :  { %829 = vmatpush.msra.mxu0 %v2667_v0 }
 0x5d5   :  { %v551_v57 = vpop.permute.xlu0 %550  ;;  %830 = vmatpush.msra.mxu0 %v2669_v1 }
 0x5d7   :  { %831 = vmatpush.msra.mxu0 %v2672_v2 }
 0x5d9   :  { %832 = vmatpush.msra.mxu0 %v2677_v4 }
 0x5db   :  { %833 = vmatpush.msra.mxu0 %v2685_v7 }
 0x5dd   :  { %834 = vmatpush.msra.mxu0 %v2687_v8 }
 0x5df   :  { %835 = vmatpush.msra.mxu0 %v2700_v13 }
 0x5e1   :  { %836 = vmatpush.msra.mxu0 %v2712_v17 }
 0x5e3   :  { %837 = vmatpush.msra.mxu0 %v2717_v18 }
 0x5e4   :  { %v572_v61 = vpop.f32.mrf.mxu3 }
 0x5e5   :  { %v573_v63 = vadd.f32 %v572_v61, %v551_v57  ;;  %838 = vmatpush.msra.mxu0 %v2721_v19 }
 0x5e7   :  { %v580_v53 = vadd.f32 %v2935_v45, %v573_v63  ;;  %839 = vmatpush.msra.mxu0 %v2724_v20 }
 0x5e9   :  { %v581_v59 = vmax.f32 %v580_v53, 0.0  ;;  %840 = vmatpush.msra.mxu0 %v2727_v21  ;;  %v511_v53 = vpop.permute.xlu1 %510 }
 0x5eb   :  { %634 = vrot.lane.b32.xlu2 %v581_v59, %s2551_s3  ;;  %v2966_v59 = vld [vmem:[%s3392_s5 + $0x2] ss:$0 sm:$0xff]  ;;  %841 = vmatpush.msra.mxu0 %v2730_v22 }
 0x5ec   :  { %3463 = vst [vmem:[#allocation52_spill] sm:$0xff] %v2966_v59 }
 0x5ed   :  { %842 = vmatpush.msra.mxu0 %v2733_v23 }
 0x5ef   :  { %843 = vmatpush.msra.mxu0 %v2736_v24 }
 0x5f1   :  { %844 = vmatpush.msra.mxu0 %v2739_v25 }
 0x651   :  { %v532_v57 = vpop.f32.mrf.mxu2 }
 0x652   :  { %v533_v61 = vadd.f32 %v532_v57, %v511_v53  ;;  %v583_v53 = vld [vmem:[#allocation2 + $0x10] sm:$0xff] }
 0x654   :  { %v540_v63 = vadd.f32 %v2966_v59, %v533_v61 }
 0x656   :  { %v541_v45 = vmax.f32 %v540_v63, 0.0 }
 0x658   :  { %2120 = vmatmul.msk.f32.vlgmr.msrb.gmra.mxu0 %vm218_vm0, %v541_v45 }
 0x659   :  { %1196 = vmatpush.msrb.mxu0 %v2939_v56 }
 0x65b   :  { %1197 = vmatpush.msrb.mxu0 %v2942_v58 }
 0x65d   :  { %1198 = vmatpush.msrb.mxu0 %v2945_v48 }
 0x65f   :  { %1199 = vmatpush.msrb.mxu0 %v2948_v62 }
 0x6d5   :  { %v609_v57 = vpop.f32.mrf.mxu0 }
 0x6d6   :  { %v612_v46 = vadd.f32 %v609_v57, %v583_v53 }
 0x6d8   :  { %2205 = vtanh.f32 %v612_v46  ;;  %v2121_v63 = vmul.f32 -1.442695, %v612_v46 }
 0x6da   :  { %2207 = vpow2.f32 %v2121_v63  ;;  %v3003_v63 = vld [vmem:[#allocation5 + $0x70] sm:$0xff] }
 0x6de   :  { %v2206_v61 = vpop.eup %2205 }
 0x6df   :  { %639 = vrot.lane.b32.xlu1 %v2206_v61, %s2550_s1 }
 0x6e0   :  { %v2208_v59 = vpop.eup %2207 }
 0x6e1   :  { %v616_v49 = vadd.f32 1.0, %v2208_v59  ;;  %v635_v59 = vpop.permute.xlu2 %634 }
 0x6e3   :  { %2209 = vrcp.f32 %v616_v49  ;;  %v628_v48 = vand.u32 2147483648, %v616_v49  ;;  %vm622_vm10 = vweird.f32 %v616_v49  ;;  %v626_v62 = vand.u32 2147483647, %v616_v49 }
 0x6e5   :  { %v629_v57 = vor.u32 1.1754944e-38, %v628_v48  ;;  %vm627_vm12 = vcmp.eq.f32.partialorder %v626_v62, 8.507059e+37  ;;  %v2996_v62 = vld [vmem:[#allocation7 + $0x60] sm:$0xff]  ;;  %v3001_v48 = vld [vmem:[#allocation5 + $0x78] sm:$0xff] }
 0x6e6   :  { %679 = vmatpush.msrb.mxu1 %v3001_v48 }
 0x6e8   :  { %680 = vmatpush.msrb.mxu1 %v3003_v63 }
 0x6e9   :  { %v2210_v45 = vpop.eup %2209 }
 0x6ea   :  { %v618_v56 = vmul.f32 %v2210_v45, %v616_v49  ;;  %vm623_vm9 = vweird.f32 %v2210_v45 }
 0x6eb   :  { %vm624_vm11 = vmor %vm622_vm10, %vm623_vm9 }
 0x6ec   :  { %v619_v16 = vsub.f32 1.0, %v618_v56 }
 0x6ee   :  { %v620_v58 = vmul.f32 %v2210_v45, %v619_v16 }
 0x6f0   :  { %v621_v25 = vadd.f32 %v2210_v45, %v620_v58 }
 0x6f2   :  { %v625_v53 = vsel %vm624_vm11, %v2210_v45, %v621_v25  ;;  %v2988_v25 = vld [vmem:[#allocation7 + $0x78] sm:$0xff]  ;;  %v3007_v45 = vld [vmem:[#allocation5 + $0x68] sm:$0xff] }
 0x6f3   :  { %v630_v61 = vsel %vm627_vm12, %v629_v57, %v625_v53  ;;  %719 = vmatpush.msra.mxu2 %v2988_v25  ;;  %v3011_v53 = vld [vmem:[#allocation5 + $0x60] sm:$0xff]  ;;  %681 = vmatpush.msrb.mxu1 %v3007_v45 }
 0x6f4   :  { %v637_v56 = vmul.f32 %v635_v59, %v630_v61  ;;  %v3065_v59 = vld [vmem:[#allocation11 + $0x68] sm:$0xff] }
 0x6f5   :  { %682 = vmatpush.msrb.mxu1 %v3011_v53 }
 0x6f7   :  { %849 = vmatpush.msra.mxu1 %v2690_v9 }
 0x6f9   :  { %850 = vmatpush.msra.mxu1 %v2696_v11 }
 0x6fb   :  { %851 = vmatpush.msra.mxu1 %v2698_v12 }
 0x6fd   :  { %852 = vmatpush.msra.mxu1 %v2707_v15 }
 0x6ff   :  { %853 = vmatpush.msra.mxu1 %v2744_v26 }
 0x701   :  { %854 = vmatpush.msra.mxu1 %v2750_v28 }
 0x703   :  { %855 = vmatpush.msra.mxu1 %v2756_v30 }
 0x705   :  { %856 = vmatpush.msra.mxu1 %v2761_v32 }
 0x707   :  { %857 = vmatpush.msra.mxu1 %v2765_v33 }
 0x709   :  { %858 = vmatpush.msra.mxu1 %v2769_v35 }
 0x70b   :  { %859 = vmatpush.msra.mxu1 %v2777_v38 }
 0x70d   :  { %860 = vmatpush.msra.mxu1 %v2783_v40 }
 0x70f   :  { %861 = vmatpush.msra.mxu1 %v2787_v41 }
 0x711   :  { %862 = vmatpush.msra.mxu1 %v2792_v42 }
 0x713   :  { %863 = vmatpush.msra.mxu1 %v2795_v43 }
 0x715   :  { %864 = vmatpush.msra.mxu1 %v2798_v44 }
 0x751   :  { %v640_v24 = vpop.permute.xlu1 %639 }
 0x752   :  { %v642_v46 = vmul.f32 %v640_v24, %v630_v61  ;;  %v2991_v24 = vld [vmem:[#allocation7 + $0x70] sm:$0xff] }
 0x753   :  { %720 = vmatpush.msra.mxu2 %v2991_v24 }
 0x754   :  { %644 = vrot.lane.b32.xlu0 %v642_v46, %s2551_s3  ;;  %v3062_v46 = vld [vmem:[#allocation11 + $0x70] sm:$0xff] }
 0x75c   :  { %662 = vrot.lane.b32.xlu0 %v2808_v47, %s2551_s3  ;;  %v2993_v47 = vld [vmem:[#allocation7 + $0x68] sm:$0xff] }
 0x75d   :  { %721 = vmatpush.msra.mxu2 %v2993_v47 }
 0x75f   :  { %722 = vmatpush.msra.mxu2 %v2996_v62 }
 0x761   :  { %886 = vmatpush.msrb.mxu2 %v2675_v3 }
 0x763   :  { %887 = vmatpush.msrb.mxu2 %v2680_v5 }
 0x765   :  { %888 = vmatpush.msrb.mxu2 %v2683_v6 }
 0x767   :  { %889 = vmatpush.msrb.mxu2 %v2693_v10 }
 0x7c6   :  { %v645_v16 = vpop.permute.xlu0 %644 }
 0x7c7   :  { %v2982_v58 = vadd.f32 %v645_v16, %v637_v56  ;;  %v3068_v56 = vld [vmem:[#allocation11 + $0x60] sm:$0xff] }
 0x7c9   :  { %2211 = vtanh.f32 %v2982_v58 }
 0x7ce   :  { %v663_v16 = vpop.permute.xlu0 %662 }
 0x7cf   :  { %v2212_v49 = vpop.eup %2211 }
 0x7d0   :  { %650 = vrot.lane.b32.xlu1 %v2212_v49, %s2550_s1 }
 0x7d8   :  { %700 = vrot.lane.b32.xlu1 %v2982_v58, %s2552_s27 }
 0x842   :  { %v651_v3 = vpop.permute.xlu1 %650 }
 0x843   :  { %v3023_v5 = vmul.f32 %v651_v3, %v630_v61 }
 0x845   :  { %660 = vrot.lane.b32.xlu2 %v3023_v5, %s2551_s3 }
 0x84a   :  { %v701_v6 = vpop.permute.xlu1 %700 }
 0x84b   :  { %2124 = vmatmul.msk.f32.vlgmr.msra.gmra.mxu2 %vm218_vm0, %v701_v6 }
 0x84c   :  { %940 = vmatpush.msra.mxu2 %v2703_v14  ;;  %v3048_v14 = vld [vmem:[#allocation11 + $0x78] sm:$0xff] }
 0x84d   :  { %702 = vrot.lane.b32.xlu2 %v2813_v54, %s2551_s3  ;;  %756 = vmatpush.msra.mxu3 %v3048_v14 }
 0x84e   :  { %941 = vmatpush.msra.mxu2 %v2747_v27  ;;  %v3054_v27 = vld [vmem:[%s3393_s6 + $0x3] ss:$0 sm:$0xff] }
 0x84f   :  { %757 = vmatpush.msra.mxu3 %v3062_v46 }
 0x850   :  { %942 = vmatpush.msra.mxu2 %v2753_v29 }
 0x851   :  { %758 = vmatpush.msra.mxu3 %v3065_v59 }
 0x852   :  { %943 = vmatpush.msra.mxu2 %v2759_v31 }
 0x853   :  { %759 = vmatpush.msra.mxu3 %v3068_v56 }
 0x855   :  { %913 = vmatpush.msrb.mxu3 %v2767_v34  ;;  %v3464_v34 = vld [vmem:[#allocation30_spill] sm:$0xff] }
 0x857   :  { %914 = vmatpush.msrb.mxu3 %v2772_v36  ;;  %v735_v36 = vld [vmem:[#allocation2 + $0x18] sm:$0xff] }
 0x859   :  { %915 = vmatpush.msrb.mxu3 %v2775_v37 }
 0x85b   :  { %916 = vmatpush.msrb.mxu3 %v2781_v39 }
 0x89f   :  { %v661_v10 = vpop.permute.xlu2 %660 }
 0x8a0   :  { %2122 = vmatmul.msk.f32.vlgmr.msrb.gmra.mxu1 %vm218_vm0, %v661_v10 }
 0x8a1   :  { %1266 = vmatpush.msrb.mxu1 %v3001_v48 }
 0x8a3   :  { %1267 = vmatpush.msrb.mxu1 %v3003_v63 }
 0x8a5   :  { %1268 = vmatpush.msrb.mxu1 %v3007_v45 }
 0x8a7   :  { %1269 = vmatpush.msrb.mxu1 %v3011_v53  ;;  %v703_v29 = vpop.permute.xlu2 %702 }
 0x8ce   :  { %v724_v31 = vpop.f32.mrf.mxu2 }
 0x8cf   :  { %v725_v54 = vadd.f32 %v724_v31, %v703_v29 }
 0x8d1   :  { %v732_v57 = vadd.f32 %v3054_v27, %v725_v54 }
 0x8d3   :  { %v733_v61 = vmax.f32 %v732_v57, 0.0 }
 0x8d5   :  { %786 = vrot.lane.b32.xlu1 %v733_v61, %s2551_s3 }
 0x8dd   :  { %807 = vrot.lane.b32.xlu1 %v2924_v60, %s2550_s1  ;;  %v3078_v60 = vld [vmem:[%s3392_s5 + $0x3] ss:$0 sm:$0xff] }
 0x8e5   :  { %819 = vrot.lane.b32.xlu1 %v2982_v58, %s2551_s3 }
 0x91d   :  { %v684_v58 = vpop.f32.mrf.mxu1 }
 0x91e   :  { %v685_v49 = vadd.f32 %v684_v58, %v663_v16 }
 0x920   :  { %v692_v3 = vadd.f32 %v3078_v60, %v685_v49 }
 0x922   :  { %v693_v6 = vmax.f32 %v692_v3, 0.0 }
 0x924   :  { %2126 = vmatmul.msk.f32.vlgmr.msra.gmra.mxu3 %vm218_vm0, %v693_v6 }
 0x925   :  { %1011 = vmatpush.msra.mxu3 %v2841_v51 }
 0x927   :  { %1012 = vmatpush.msra.mxu3 %v2843_v52 }
 0x929   :  { %1013 = vmatpush.msra.mxu3 %v2846_v55 }
 0x92b   :  { %1014 = vmatpush.msra.mxu3 %v3464_v34 }
 0x9a7   :  { %v761_v37 = vpop.f32.mrf.mxu3 }
 0x9a8   :  { %v764_v39 = vadd.f32 %v761_v37, %v735_v36  ;;  %v787_v37 = vpop.permute.xlu1 %786 }
 0x9aa   :  { %2213 = vtanh.f32 %v764_v39  ;;  %v2127_v29 = vmul.f32 -1.442695, %v764_v39 }
 0x9ac   :  { %2215 = vpow2.f32 %v2127_v29 }
 0x9b0   :  { %v2214_v10 = vpop.eup %2213 }
 0x9b1   :  { %791 = vrot.lane.b32.xlu0 %v2214_v10, %s2550_s1 }
 0x9b2   :  { %v2216_v31 = vpop.eup %2215 }
 0x9b3   :  { %v768_v54 = vadd.f32 1.0, %v2216_v31 }
 0x9b5   :  { %2217 = vrcp.f32 %v768_v54  ;;  %v780_v55 = vand.u32 2147483648, %v768_v54  ;;  %vm774_vm14 = vweird.f32 %v768_v54  ;;  %v778_v58 = vand.u32 2147483647, %v768_v54 }
 0x9b7   :  { %v781_v3 = vor.u32 1.1754944e-38, %v780_v55  ;;  %vm779_vm1 = vcmp.eq.f32.partialorder %v778_v58, 8.507059e+37  ;;  %v3481_v58 = vld [vmem:[#allocation45_spill] sm:$0xff] }
 0x9bb   :  { %v2218_v57 = vpop.eup %2217 }
 0x9bc   :  { %v770_v51 = vmul.f32 %v2218_v57, %v768_v54  ;;  %vm775_vm13 = vweird.f32 %v2218_v57  ;;  %v808_v54 = vpop.permute.xlu1 %807 }
 0x9bd   :  { %vm776_vm15 = vmor %vm774_vm14, %vm775_vm13 }
 0x9be   :  { %v771_v61 = vsub.f32 1.0, %v770_v51 }
 0x9c0   :  { %v772_v52 = vmul.f32 %v2218_v57, %v771_v61  ;;  %v3465_v61 = vld [vmem:[#allocation31_spill] sm:$0xff] }
 0x9c2   :  { %v773_v16 = vadd.f32 %v2218_v57, %v772_v52  ;;  %v826_v52 = vsel %vm218_vm0, %v3465_v61, %v2894_v50 }
 0x9c4   :  { %v777_v49 = vsel %vm776_vm15, %v2218_v57, %v773_v16  ;;  %v820_v51 = vpop.permute.xlu1 %819 }
 0x9c5   :  { %v782_v34 = vsel %vm779_vm1, %v781_v3, %v777_v49  ;;  %v3482_v3 = vld [vmem:[#allocation46_spill] sm:$0xff] }
 0x9c6   :  { %v789_v39 = vmul.f32 %v787_v37, %v782_v34 }
 0xa23   :  { %v792_v6 = vpop.permute.xlu0 %791 }
 0xa24   :  { %v794_v36 = vmul.f32 %v792_v6, %v782_v34  ;;  %v924_v6 = vld [vmem:[#allocation2 + $0x20] sm:$0xff] }
 0xa26   :  { %796 = vrot.lane.b32.xlu2 %v794_v36, %s2551_s3 }
 0xa2e   :  { %810 = vrot.lane.b32.xlu2 %v3023_v5, %s2552_s27  ;;  %v827_v5 = vsel %vm814_vm2, %v826_v52, %v820_v51 }
 0xa80   :  { %v797_v10 = vpop.permute.xlu2 %796 }
 0xa81   :  { %v799_v29 = vadd.f32 %v797_v10, %v789_v39 }
 0xa83   :  { %2219 = vtanh.f32 %v799_v29  ;;  %823 = vrot.lane.b32.xlu2 %v799_v29, %s2550_s1 }
 0xa88   :  { %v811_v57 = vpop.permute.xlu2 %810 }
 0xa89   :  { %v2220_v31 = vpop.eup %2219 }
 0xa8a   :  { %802 = vrot.lane.b32.xlu0 %v2220_v31, %s2550_s1 }
 0xadd   :  { %v824_v16 = vpop.permute.xlu2 %823 }
 0xade   :  { %v828_v55 = vsel %vm816_vm3, %v827_v5, %v824_v16 }
 0xadf   :  { %865 = vmatmul.f32.vlgmr.msra.gmra.mxu1 %v828_v55 }
 0xae0   :  { %1414 = vmatpush.msra.mxu1 %v2690_v9 }
 0xae2   :  { %1415 = vmatpush.msra.mxu1 %v2696_v11  ;;  %v3466_v11 = vld [vmem:[#allocation32_spill] sm:$0xff] }
 0xae4   :  { %1416 = vmatpush.msra.mxu1 %v2698_v12  ;;  %v813_v12 = vsel %vm218_vm0, %v3466_v11, %v808_v54 }
 0xae6   :  { %1417 = vmatpush.msra.mxu1 %v2707_v15 }
 0xae8   :  { %1418 = vmatpush.msra.mxu1 %v2744_v26  ;;  %v815_v26 = vsel %vm814_vm2, %v813_v12, %v811_v57 }
 0xaea   :  { %1419 = vmatpush.msra.mxu1 %v2750_v28 }
 0xaec   :  { %1420 = vmatpush.msra.mxu1 %v2756_v30 }
 0xaee   :  { %1421 = vmatpush.msra.mxu1 %v2761_v32  ;;  %v3477_v32 = vld [vmem:[#allocation24_spill] sm:$0xff] }
 0xaf0   :  { %1422 = vmatpush.msra.mxu1 %v2765_v33 }
 0xaf2   :  { %1423 = vmatpush.msra.mxu1 %v2769_v35 }
 0xaf4   :  { %1424 = vmatpush.msra.mxu1 %v2777_v38 }
 0xaf6   :  { %1425 = vmatpush.msra.mxu1 %v2783_v40 }
 0xaf8   :  { %1426 = vmatpush.msra.mxu1 %v2787_v41  ;;  %v3478_v41 = vld [vmem:[#allocation43_spill] sm:$0xff] }
 0xafa   :  { %1427 = vmatpush.msra.mxu1 %v2792_v42 }
 0xafc   :  { %v803_v9 = vpop.permute.xlu0 %802  ;;  %1428 = vmatpush.msra.mxu1 %v2795_v43  ;;  %v3479_v43 = vld [vmem:[#allocation44_spill] sm:$0xff] }
 0xafd   :  { %v805_v15 = vmul.f32 %v803_v9, %v782_v34 }
 0xafe   :  { %1429 = vmatpush.msra.mxu1 %v2798_v44  ;;  %v3480_v44 = vld [vmem:[#allocation25_spill] sm:$0xff] }
 0xaff   :  { %v817_v28 = vsel %vm816_vm3, %v815_v26, %v805_v15 }
 0xb00   :  { %870 = vrot.lane.b32.xlu0 %v817_v28, %s2551_s3  ;;  %845 = vmatmul.f32.vlgmr.msra.gmra.mxu0 %v817_v28 }
 0xb01   :  { %1394 = vmatpush.msra.mxu0 %v2667_v0  ;;  %v3467_v0 = vld [vmem:[#allocation22_spill] sm:$0xff] }
 0xb03   :  { %1395 = vmatpush.msra.mxu0 %v2669_v1  ;;  %v3468_v1 = vld [vmem:[#allocation23_spill] sm:$0xff] }
 0xb05   :  { %1396 = vmatpush.msra.mxu0 %v2672_v2 }
 0xb07   :  { %1397 = vmatpush.msra.mxu0 %v2677_v4  ;;  %v3469_v4 = vld [vmem:[#allocation26_spill] sm:$0xff] }
 0xb08   :  { %897 = vrot.lane.b32.xlu0 %v828_v55, %s2551_s3 }
 0xb09   :  { %1398 = vmatpush.msra.mxu0 %v2685_v7  ;;  %v3470_v7 = vld [vmem:[#allocation27_spill] sm:$0xff] }
 0xb0b   :  { %1399 = vmatpush.msra.mxu0 %v2687_v8  ;;  %v3471_v8 = vld [vmem:[#allocation28_spill] sm:$0xff] }
 0xb0d   :  { %1400 = vmatpush.msra.mxu0 %v2700_v13 }
 0xb0f   :  { %1401 = vmatpush.msra.mxu0 %v2712_v17  ;;  %v3472_v17 = vld [vmem:[#allocation29_spill] sm:$0xff] }
 0xb11   :  { %1402 = vmatpush.msra.mxu0 %v2717_v18  ;;  %v3473_v18 = vld [vmem:[#allocation33_spill] sm:$0xff] }
 0xb13   :  { %1403 = vmatpush.msra.mxu0 %v2721_v19  ;;  %v3474_v19 = vld [vmem:[#allocation35_spill] sm:$0xff] }
 0xb15   :  { %1404 = vmatpush.msra.mxu0 %v2724_v20  ;;  %v3475_v20 = vld [vmem:[#allocation36_spill] sm:$0xff] }
 0xb17   :  { %1405 = vmatpush.msra.mxu0 %v2727_v21  ;;  %v3476_v21 = vld [vmem:[#allocation37_spill] sm:$0xff] }
 0xb19   :  { %1406 = vmatpush.msra.mxu0 %v2730_v22 }
 0xb1b   :  { %1407 = vmatpush.msra.mxu0 %v2733_v23 }
 0xb1d   :  { %1408 = vmatpush.msra.mxu0 %v3467_v0 }
 0xb1f   :  { %1409 = vmatpush.msra.mxu0 %v3468_v1 }
 0xb5c   :  { %v3150_v38 = vpop.f32.mrf.mxu1 }
 0xb72   :  { %v871_v2 = vpop.permute.xlu0 %870 }
 0xb73   :  { %2128 = vmatmul.msk.f32.vlgmr.msrb.gmra.mxu2 %vm218_vm0, %v871_v2 }
 0xb74   :  { %1042 = vmatpush.msrb.mxu2 %v3469_v4 }
 0xb76   :  { %1043 = vmatpush.msrb.mxu2 %v3470_v7 }
 0xb78   :  { %1044 = vmatpush.msrb.mxu2 %v3471_v8 }
 0xb7a   :  { %v898_v13 = vpop.permute.xlu0 %897  ;;  %1045 = vmatpush.msrb.mxu2 %v3472_v17  ;;  %v3484_v17 = vld [vmem:[#allocation40_spill] sm:$0xff] }
 0xb7b   :  { %2129 = vmatmul.msk.f32.vlgmr.msrb.gmra.mxu3 %vm218_vm0, %v898_v13  ;;  %v3483_v13 = vld [vmem:[#allocation39_spill] sm:$0xff] }
 0xb7c   :  { %1069 = vmatpush.msrb.mxu3 %v3473_v18  ;;  %v3485_v18 = vld [vmem:[#allocation41_spill] sm:$0xff] }
 0xb7d   :  { %v3145_v22 = vpop.f32.mrf.mxu0 }
 0xb7e   :  { %1070 = vmatpush.msrb.mxu3 %v3474_v19 }
 0xb80   :  { %1071 = vmatpush.msrb.mxu3 %v3475_v20 }
 0xb82   :  { %1072 = vmatpush.msrb.mxu3 %v3476_v21  ;;  %v3487_v21 = vld [vmem:[#allocation34_spill] sm:$0xff] }
 0xbf6   :  { %v891_v23 = vpop.f32.mrf.mxu2 }
 0xbf7   :  { %v892_v30 = vadd.f32 %v891_v23, %v3145_v22 }
 0xbf9   :  { %v894_v33 = vadd.f32 %v3477_v32, %v892_v30 }
 0xbfb   :  { %v895_v35 = vmax.f32 %v894_v33, 0.0  ;;  %v3488_v33 = vld [vmem:[#allocation38_spill] sm:$0xff] }
 0xbfd   :  { %2130 = vmatmul.msk.f32.vlgmr.msra.gmra.mxu2 %vm218_vm0, %v895_v35 }
 0xbfe   :  { %v918_v40 = vpop.f32.mrf.mxu3  ;;  %1139 = vmatpush.msra.mxu2 %v3478_v41  ;;  %v1053_v41 = vld [vmem:[#allocation2 + $0x28] sm:$0xff] }
 0xbff   :  { %v919_v42 = vadd.f32 %v918_v40, %v3150_v38 }
 0xc00   :  { %1140 = vmatpush.msra.mxu2 %v3479_v43 }
 0xc01   :  { %v921_v50 = vadd.f32 %v3480_v44, %v919_v42 }
 0xc02   :  { %1141 = vmatpush.msra.mxu2 %v3481_v58 }
 0xc03   :  { %v922_v49 = vmax.f32 %v921_v50, 0.0 }
 0xc04   :  { %1142 = vmatpush.msra.mxu2 %v3482_v3 }
 0xc05   :  { %970 = vrot.lane.b32.xlu2 %v922_v49, %s2551_s3 }
 0xc5f   :  { %v971_v15 = vpop.permute.xlu2 %970 }
 0xc80   :  { %v945_v34 = vpop.f32.mrf.mxu2 }
 0xc81   :  { %v948_v36 = vadd.f32 %v945_v34, %v924_v6 }
 0xc83   :  { %2221 = vtanh.f32 %v948_v36  ;;  %v2131_v39 = vmul.f32 -1.442695, %v948_v36 }
 0xc85   :  { %2223 = vpow2.f32 %v2131_v39 }
 0xc89   :  { %v2222_v37 = vpop.eup %2221 }
 0xc8a   :  { %975 = vrot.lane.b32.xlu1 %v2222_v37, %s2550_s1 }
 0xc8b   :  { %v2224_v10 = vpop.eup %2223 }
 0xc8c   :  { %v952_v29 = vadd.f32 1.0, %v2224_v10 }
 0xc8e   :  { %2225 = vrcp.f32 %v952_v29  ;;  %v964_v52 = vand.u32 2147483648, %v952_v29  ;;  %vm958_vm5 = vweird.f32 %v952_v29  ;;  %v962_v5 = vand.u32 2147483647, %v952_v29 }
 0xc90   :  { %v965_v55 = vor.u32 1.1754944e-38, %v964_v52  ;;  %vm963_vm7 = vcmp.eq.f32.partialorder %v962_v5, 8.507059e+37 }
 0xc94   :  { %v2226_v31 = vpop.eup %2225 }
 0xc95   :  { %v954_v54 = vmul.f32 %v2226_v31, %v952_v29  ;;  %vm959_vm4 = vweird.f32 %v2226_v31 }
 0xc96   :  { %vm960_vm6 = vmor %vm958_vm5, %vm959_vm4 }
 0xc97   :  { %v955_v57 = vsub.f32 1.0, %v954_v54 }
 0xc99   :  { %v956_v51 = vmul.f32 %v2226_v31, %v955_v57 }
 0xc9b   :  { %v957_v61 = vadd.f32 %v2226_v31, %v956_v51 }
 0xc9d   :  { %v961_v16 = vsel %vm960_vm6, %v2226_v31, %v957_v61 }
 0xc9e   :  { %v966_v9 = vsel %vm963_vm7, %v965_v55, %v961_v16 }
 0xc9f   :  { %v973_v26 = vmul.f32 %v971_v15, %v966_v9  ;;  %v2293_v15 = vld [vmem:[#allocation7 + $0x18] sm:$0xff] }
 0xcfc   :  { %v976_v11 = vpop.permute.xlu1 %975 }
 0xcfd   :  { %v978_v12 = vmul.f32 %v976_v11, %v966_v9 }
 0xcff   :  { %980 = vrot.lane.b32.xlu0 %v978_v12, %s2551_s3 }
 0xd07   :  { %994 = vrot.lane.b32.xlu0 %v3145_v22, %s2552_s27 }
 0xd71   :  { %v981_v28 = vpop.permute.xlu0 %980 }
 0xd72   :  { %v983_v0 = vadd.f32 %v981_v28, %v973_v26  ;;  %v2294_v26 = vld [vmem:[#allocation7 + $0x10] sm:$0xff]  ;;  %v2295_v28 = vld [vmem:[#allocation7 + $0x8] sm:$0xff] }
 0xd74   :  { %2227 = vtanh.f32 %v983_v0 }
 0xd7a   :  { %v2228_v1 = vpop.eup %2227 }
 0xd7b   :  { %986 = vrot.lane.b32.xlu1 %v2228_v1, %s2550_s1 }
 0xd83   :  { %1022 = vrot.lane.b32.xlu1 %v983_v0, %s2552_s27  ;;  %v2296_v0 = vld [vmem:[#allocation7] sm:$0xff] }
 0xded   :  { %v987_v2 = vpop.permute.xlu1 %986 }
 0xdee   :  { %v989_v4 = vmul.f32 %v987_v2, %v966_v9  ;;  %v2297_v2 = vld [vmem:[#allocation5 + $0x18] sm:$0xff] }
 0xdf0   :  { %991 = vrot.lane.b32.xlu2 %v989_v4, %s2551_s3  ;;  %v2298_v4 = vld [vmem:[#allocation5 + $0x10] sm:$0xff] }
 0xdf5   :  { %v3166_v7 = vpop.permute.xlu1 %1022 }
 0xdf6   :  { %2133 = vmatmul.msk.f32.vlgmr.msrb.gmra.mxu2 %vm218_vm0, %v3166_v7 }
 0xdf7   :  { %1296 = vmatpush.msrb.mxu2 %v2988_v25  ;;  %v3486_v25 = vld [vmem:[#allocation42_spill] sm:$0xff] }
 0xdf8   :  { %1025 = vrot.lane.b32.xlu2 %v3150_v38, %s2552_s27 }
 0xdf9   :  { %1297 = vmatpush.msrb.mxu2 %v2991_v24 }
 0xdfb   :  { %1298 = vmatpush.msrb.mxu2 %v2993_v47 }
 0xdfd   :  { %1299 = vmatpush.msrb.mxu2 %v2996_v62  ;;  %v995_v62 = vpop.permute.xlu0 %994 }
 0xe4a   :  { %v3176_v8 = vpop.permute.xlu2 %991 }
 0xe4b   :  { %2132 = vmatmul.msk.f32.vlgmr.msra.gmra.mxu3 %vm218_vm0, %v3176_v8 }
 0xe4c   :  { %1169 = vmatpush.msra.mxu3 %v3483_v13  ;;  %v2299_v13 = vld [vmem:[#allocation5 + $0x8] sm:$0xff] }
 0xe4e   :  { %1170 = vmatpush.msra.mxu3 %v3484_v17  ;;  %v2300_v17 = vld [vmem:[#allocation5] sm:$0xff] }
 0xe50   :  { %1171 = vmatpush.msra.mxu3 %v3485_v18 }
 0xe52   :  { %1172 = vmatpush.msra.mxu3 %v3486_v25  ;;  %v1026_v19 = vpop.permute.xlu2 %1025 }
 0xe79   :  { %v1047_v20 = vpop.f32.mrf.mxu2 }
 0xe7a   :  { %v1048_v24 = vadd.f32 %v1047_v20, %v1026_v19  ;;  %v3489_v20 = vld [vmem:[#allocation47_spill] sm:$0xff] }
 0xe7c   :  { %v1050_v47 = vadd.f32 %v3487_v21, %v1048_v24 }
 0xe7e   :  { %v1051_v23 = vmax.f32 %v1050_v47, 0.0 }
 0xe80   :  { %1099 = vrot.lane.b32.xlu1 %v1051_v23, %s2551_s3 }
 0xece   :  { %v1016_v30 = vpop.f32.mrf.mxu3 }
 0xecf   :  { %v1017_v32 = vadd.f32 %v1016_v30, %v995_v62  ;;  %v3490_v30 = vld [vmem:[#allocation52_spill] sm:$0xff] }
 0xed1   :  { %v1019_v35 = vadd.f32 %v3488_v33, %v1017_v32 }
 0xed3   :  { %v1020_v40 = vmax.f32 %v1019_v35, 0.0  ;;  %v3491_v35 = vld [vmem:[#allocation48_spill] sm:$0xff] }
 0xed5   :  { %2134 = vmatmul.msk.f32.vlgmr.msrb.gmra.mxu3 %vm218_vm0, %v1020_v40  ;;  %v3492_v40 = vld [vmem:[#allocation49_spill] sm:$0xff] }
 0xed6   :  { %1323 = vmatpush.msrb.mxu3 %v3048_v14 }
 0xed8   :  { %1324 = vmatpush.msrb.mxu3 %v3062_v46 }
 0xeda   :  { %1325 = vmatpush.msrb.mxu3 %v3065_v59 }
 0xedc   :  { %1326 = vmatpush.msrb.mxu3 %v3068_v56 }
 0xef2   :  { %v1100_v61 = vpop.permute.xlu1 %1099 }
 0xf58   :  { %v1074_v42 = vpop.f32.mrf.mxu3 }
 0xf59   :  { %v1077_v43 = vadd.f32 %v1074_v42, %v1053_v41  ;;  %v3493_v41 = vld [vmem:[#allocation50_spill] sm:$0xff]  ;;  %v3494_v42 = vld [vmem:[#allocation51_spill] sm:$0xff] }
 0xf5b   :  { %2229 = vtanh.f32 %v1077_v43  ;;  %v2135_v50 = vmul.f32 -1.442695, %v1077_v43  ;;  %v1180_v43 = vld [vmem:[#allocation2 + $0x30] sm:$0xff] }
 0xf5d   :  { %2231 = vpow2.f32 %v2135_v50 }
 0xf61   :  { %v2230_v44 = vpop.eup %2229 }
 0xf62   :  { %1104 = vrot.lane.b32.xlu0 %v2230_v44, %s2550_s1 }
 0xf63   :  { %v2232_v58 = vpop.eup %2231 }
 0xf64   :  { %v1081_v49 = vadd.f32 1.0, %v2232_v58 }
 0xf66   :  { %2233 = vrcp.f32 %v1081_v49  ;;  %v1093_v39 = vand.u32 2147483648, %v1081_v49  ;;  %vm1087_vm9 = vweird.f32 %v1081_v49  ;;  %v1091_v10 = vand.u32 2147483647, %v1081_v49 }
 0xf68   :  { %v1094_v31 = vor.u32 1.1754944e-38, %v1093_v39  ;;  %vm1092_vm11 = vcmp.eq.f32.partialorder %v1091_v10, 8.507059e+37 }
 0xf6c   :  { %v2234_v3 = vpop.eup %2233 }
 0xf6d   :  { %v1083_v6 = vmul.f32 %v2234_v3, %v1081_v49  ;;  %vm1088_vm8 = vweird.f32 %v2234_v3 }
 0xf6e   :  { %vm1089_vm10 = vmor %vm1087_vm9, %vm1088_vm8 }
 0xf6f   :  { %v1084_v34 = vsub.f32 1.0, %v1083_v6 }
 0xf71   :  { %v1085_v36 = vmul.f32 %v2234_v3, %v1084_v34 }
 0xf73   :  { %v1086_v37 = vadd.f32 %v2234_v3, %v1085_v36 }
 0xf75   :  { %v1090_v29 = vsel %vm1089_vm10, %v2234_v3, %v1086_v37 }
 0xf76   :  { %v1095_v57 = vsel %vm1092_vm11, %v1094_v31, %v1090_v29 }
 0xf77   :  { %v1102_v52 = vmul.f32 %v1100_v61, %v1095_v57 }
 0xfd4   :  { %v1105_v54 = vpop.permute.xlu0 %1104 }
 0xfd5   :  { %v1107_v51 = vmul.f32 %v1105_v54, %v1095_v57 }
 0xfd7   :  { %1109 = vrot.lane.b32.xlu2 %v1107_v51, %s2551_s3 }
 0xfdf   :  { %1122 = vrot.lane.b32.xlu2 %v3145_v22, %s2550_s1 }
0x1031   :  { %v1110_v5 = vpop.permute.xlu2 %1109 }
0x1032   :  { %v3196_v16 = vadd.f32 %v1110_v5, %v1102_v52 }
0x1034   :  { %2235 = vtanh.f32 %v3196_v16 }
0x1039   :  { %v1123_v47 = vpop.permute.xlu2 %1122 }
0x103a   :  { %v2236_v55 = vpop.eup %2235 }
0x103b   :  { %1115 = vrot.lane.b32.xlu0 %v2236_v55, %s2550_s1 }
0x1043   :  { %1150 = vrot.lane.b32.xlu0 %v3196_v16, %s2552_s27 }
0x10ad   :  { %v1116_v9 = vpop.permute.xlu0 %1115 }
0x10ae   :  { %v3202_v11 = vmul.f32 %v1116_v9, %v1095_v57 }
0x10b0   :  { %1120 = vrot.lane.b32.xlu1 %v3202_v11, %s2551_s3 }
0x10b5   :  { %v1151_v12 = vpop.permute.xlu0 %1150 }
0x10b6   :  { %2137 = vmatmul.msk.f32.vlgmr.msra.gmra.mxu3 %vm218_vm0, %v1151_v12 }
0x10b7   :  { %1478 = vmatpush.msra.mxu3 %v2293_v15 }
0x10b8   :  { %1152 = vrot.lane.b32.xlu1 %v3150_v38, %s2550_s1 }
0x10b9   :  { %1479 = vmatpush.msra.mxu3 %v2294_v26 }
0x10bb   :  { %1480 = vmatpush.msra.mxu3 %v2295_v28 }
0x10bd   :  { %1481 = vmatpush.msra.mxu3 %v2296_v0 }
0x1122   :  { %v1121_v1 = vpop.permute.xlu1 %1120 }
0x1123   :  { %2136 = vmatmul.msk.f32.vlgmr.msra.gmra.mxu2 %vm218_vm0, %v1121_v1  ;;  %v2302_v1 = vld [vmem:[#allocation11 + $0x10] sm:$0xff] }
0x1124   :  { %1451 = vmatpush.msra.mxu2 %v2297_v2  ;;  %v2303_v2 = vld [vmem:[#allocation11 + $0x8] sm:$0xff] }
0x1126   :  { %1452 = vmatpush.msra.mxu2 %v2298_v4  ;;  %v2304_v4 = vld [vmem:[#allocation11] sm:$0xff] }
0x1128   :  { %1453 = vmatpush.msra.mxu2 %v2299_v13 }
0x112a   :  { %1454 = vmatpush.msra.mxu2 %v2300_v17  ;;  %v1153_v18 = vpop.permute.xlu1 %1152 }
0x1139   :  { %v1174_v25 = vpop.f32.mrf.mxu3 }
0x113a   :  { %v1175_v19 = vadd.f32 %v1174_v25, %v1153_v18 }
0x113c   :  { %v1177_v24 = vadd.f32 %v3489_v20, %v1175_v19 }
0x113e   :  { %v1178_v21 = vmax.f32 %v1177_v24, 0.0 }
0x1140   :  { %1226 = vrot.lane.b32.xlu0 %v1178_v21, %s2551_s3  ;;  %v2306_v21 = vld [vmem:[#allocation5 + $0x30] sm:$0xff] }
0x11a6   :  { %v1144_v23 = vpop.f32.mrf.mxu2 }
0x11a7   :  { %v1145_v62 = vadd.f32 %v1144_v23, %v1123_v47  ;;  %v2308_v47 = vld [vmem:[#allocation5 + $0x20] sm:$0xff]  ;;  %v1307_v23 = vld [vmem:[#allocation2 + $0x38] sm:$0xff] }
0x11a9   :  { %v1147_v32 = vadd.f32 %v3490_v30, %v1145_v62 }
0x11ab   :  { %v1148_v33 = vmax.f32 %v1147_v32, 0.0 }
0x11ad   :  { %2138 = vmatmul.msk.f32.vlgmr.msrb.gmra.mxu0 %vm218_vm0, %v1148_v33 }
0x11ae   :  { %1761 = vmatpush.msrb.mxu0 %v3491_v35 }
0x11b0   :  { %1762 = vmatpush.msrb.mxu0 %v3492_v40 }
0x11b2   :  { %1763 = vmatpush.msrb.mxu0 %v3493_v41  ;;  %v1227_v5 = vpop.permute.xlu0 %1226 }
0x11b4   :  { %1764 = vmatpush.msrb.mxu0 %v3494_v42 }
0x122a   :  { %v1201_v44 = vpop.f32.mrf.mxu0 }
0x122b   :  { %v1204_v50 = vadd.f32 %v1201_v44, %v1180_v43 }
0x122d   :  { %2237 = vtanh.f32 %v1204_v50  ;;  %v2139_v49 = vmul.f32 -1.442695, %v1204_v50 }
0x122f   :  { %2239 = vpow2.f32 %v2139_v49 }
0x1233   :  { %v2238_v58 = vpop.eup %2237 }
0x1234   :  { %1231 = vrot.lane.b32.xlu2 %v2238_v58, %s2550_s1 }
0x1235   :  { %v2240_v3 = vpop.eup %2239 }
0x1236   :  { %v1208_v6 = vadd.f32 1.0, %v2240_v3 }
0x1238   :  { %2241 = vrcp.f32 %v1208_v6  ;;  %v1220_v29 = vand.u32 2147483648, %v1208_v6  ;;  %vm1214_vm13 = vweird.f32 %v1208_v6  ;;  %v1218_v31 = vand.u32 2147483647, %v1208_v6 }
0x123a   :  { %v1221_v57 = vor.u32 1.1754944e-38, %v1220_v29  ;;  %vm1219_vm15 = vcmp.eq.f32.partialorder %v1218_v31, 8.507059e+37 }
0x123e   :  { %v2242_v34 = vpop.eup %2241 }
0x123f   :  { %v1210_v36 = vmul.f32 %v2242_v34, %v1208_v6  ;;  %vm1215_vm12 = vweird.f32 %v2242_v34 }
0x1240   :  { %vm1216_vm14 = vmor %vm1214_vm13, %vm1215_vm12 }
0x1241   :  { %v1211_v37 = vsub.f32 1.0, %v1210_v36 }
0x1243   :  { %v1212_v39 = vmul.f32 %v2242_v34, %v1211_v37 }
0x1245   :  { %v1213_v10 = vadd.f32 %v2242_v34, %v1212_v39 }
0x1247   :  { %v1217_v54 = vsel %vm1216_vm14, %v2242_v34, %v1213_v10 }
0x1248   :  { %v1222_v61 = vsel %vm1219_vm15, %v1221_v57, %v1217_v54 }
0x1249   :  { %v1229_v55 = vmul.f32 %v1227_v5, %v1222_v61 }
0x128e   :  { %v1232_v51 = vpop.permute.xlu2 %1231 }
0x128f   :  { %v1234_v52 = vmul.f32 %v1232_v51, %v1222_v61  ;;  %v1391_v51 = vsel %vm218_vm0, %v3166_v7, %v3196_v16  ;;  %v2309_v16 = vld [vmem:[#allocation7 + $0x38] sm:$0xff] }
0x1291   :  { %1236 = vrot.lane.b32.xlu1 %v1234_v52, %s2551_s3 }
0x1299   :  { %1249 = vrot.lane.b32.xlu1 %v3145_v22, %s2551_s3  ;;  %v2301_v22 = vld [vmem:[#allocation11 + $0x18] sm:$0xff] }
0x1303   :  { %v1237_v9 = vpop.permute.xlu1 %1236 }
0x1304   :  { %v1239_v12 = vadd.f32 %v1237_v9, %v1229_v55 }
0x1306   :  { %2243 = vtanh.f32 %v1239_v12 }
0x130c   :  { %v2244_v15 = vpop.eup %2243 }
0x130d   :  { %1242 = vrot.lane.b32.xlu2 %v2244_v15, %s2550_s1 }
0x1315   :  { %1277 = vrot.lane.b32.xlu2 %v1239_v12, %s2552_s27 }
0x1367   :  { %v1243_v26 = vpop.permute.xlu2 %1242 }
0x1368   :  { %v3224_v28 = vmul.f32 %v1243_v26, %v1222_v61 }
0x136a   :  { %1247 = vrot.lane.b32.xlu0 %v3224_v28, %s2551_s3 }
0x136f   :  { %v1278_v0 = vpop.permute.xlu2 %1277 }
0x1370   :  { %2141 = vmatmul.msk.f32.vlgmr.msrb.gmra.mxu2 %vm218_vm0, %v1278_v0  ;;  %v2311_v0 = vld [vmem:[#allocation7 + $0x28] sm:$0xff] }
0x1371   :  { %1505 = vmatpush.msrb.mxu2 %v2301_v22  ;;  %v2312_v22 = vld [vmem:[#allocation7 + $0x20] sm:$0xff] }
0x1372   :  { %1279 = vrot.lane.b32.xlu0 %v3150_v38, %s2551_s3 }
0x1373   :  { %1506 = vmatpush.msrb.mxu2 %v2302_v1  ;;  %v2313_v1 = vld [vmem:[#allocation11 + $0x38] sm:$0xff] }
0x1375   :  { %1507 = vmatpush.msrb.mxu2 %v2303_v2  ;;  %v2314_v2 = vld [vmem:[#allocation11 + $0x30] sm:$0xff] }
0x1377   :  { %1508 = vmatpush.msrb.mxu2 %v2304_v4  ;;  %v2315_v4 = vld [vmem:[#allocation11 + $0x28] sm:$0xff] }
0x13dc   :  { %v1248_v13 = vpop.permute.xlu0 %1247 }
0x13dd   :  { %2140 = vmatmul.msk.f32.vlgmr.msrb.gmra.mxu1 %vm218_vm0, %v1248_v13  ;;  %v2316_v13 = vld [vmem:[#allocation11 + $0x20] sm:$0xff] }
0x13de   :  { %1831 = vmatpush.msrb.mxu1 %v3001_v48  ;;  %v1250_v48 = vpop.permute.xlu1 %1249 }
0x13e0   :  { %1832 = vmatpush.msrb.mxu1 %v3003_v63 }
0x13e2   :  { %1833 = vmatpush.msrb.mxu1 %v3007_v45 }
0x13e4   :  { %1834 = vmatpush.msrb.mxu1 %v3011_v53  ;;  %v1280_v17 = vpop.permute.xlu0 %1279  ;;  %v2305_v53 = vld [vmem:[#allocation5 + $0x38] sm:$0xff] }
0x13f3   :  { %v1301_v18 = vpop.f32.mrf.mxu2 }
0x13f4   :  { %v1302_v38 = vadd.f32 %v1301_v18, %v1280_v17 }
0x13f6   :  { %v1304_v25 = vadd.f32 %v3054_v27, %v1302_v38  ;;  %v2307_v27 = vld [vmem:[#allocation5 + $0x28] sm:$0xff] }
0x13f8   :  { %v1305_v19 = vmax.f32 %v1304_v25, 0.0  ;;  %v2317_v25 = vld [vmem:[%s3392_s5] ss:$0 sm:$0xff] }
0x13fa   :  { %1353 = vrot.lane.b32.xlu2 %v1305_v19, %s2551_s3 }
0x1402   :  { %1374 = vrot.lane.b32.xlu2 %v3202_v11, %s2550_s1 }
0x140a   :  { %1384 = vrot.lane.b32.xlu2 %v1239_v12, %s2551_s3 }
0x1454   :  { %v1354_v36 = vpop.permute.xlu2 %1353 }
0x145a   :  { %v1271_v20 = vpop.f32.mrf.mxu1 }
0x145b   :  { %v1272_v63 = vadd.f32 %v1271_v20, %v1250_v48 }
0x145c   :  { %v1375_v31 = vpop.permute.xlu2 %1374 }
0x145d   :  { %v1274_v45 = vadd.f32 %v3078_v60, %v1272_v63  ;;  %v1380_v9 = vsel %vm218_vm0, %v3176_v8, %v1375_v31 }
0x145f   :  { %v1275_v24 = vmax.f32 %v1274_v45, 0.0  ;;  %v2318_v45 = vld [vmem:[#allocation5 + $0x58] sm:$0xff] }
0x1461   :  { %2142 = vmatmul.msk.f32.vlgmr.msrb.gmra.mxu3 %vm218_vm0, %v1275_v24 }
0x1462   :  { %1576 = vmatpush.msrb.mxu3 %v2305_v53  ;;  %v2319_v53 = vld [vmem:[#allocation5 + $0x50] sm:$0xff] }
0x1464   :  { %1577 = vmatpush.msrb.mxu3 %v2306_v21  ;;  %v1385_v57 = vpop.permute.xlu2 %1384  ;;  %v2320_v21 = vld [vmem:[%s3393_s6] ss:$0 sm:$0xff] }
0x1465   :  { %v1392_v61 = vsel %vm814_vm2, %v1391_v51, %v1385_v57 }
0x1466   :  { %1578 = vmatpush.msrb.mxu3 %v2307_v27 }
0x1468   :  { %1579 = vmatpush.msrb.mxu3 %v2308_v47  ;;  %v2321_v47 = vld [vmem:[#allocation5 + $0x48] sm:$0xff] }
0x14e4   :  { %v1328_v11 = vpop.f32.mrf.mxu3 }
0x14e5   :  { %v1331_v62 = vadd.f32 %v1328_v11, %v1307_v23  ;;  %v2322_v11 = vld [vmem:[#allocation5 + $0x40] sm:$0xff] }
0x14e7   :  { %2245 = vtanh.f32 %v1331_v62  ;;  %v2143_v32 = vmul.f32 -1.442695, %v1331_v62  ;;  %v1489_v62 = vld [vmem:[#allocation2 + $0x40] sm:$0xff] }
0x14e9   :  { %2247 = vpow2.f32 %v2143_v32 }
0x14ed   :  { %v2246_v30 = vpop.eup %2245 }
0x14ee   :  { %1358 = vrot.lane.b32.xlu1 %v2246_v30, %s2550_s1 }
0x14ef   :  { %v2248_v60 = vpop.eup %2247 }
0x14f0   :  { %v1335_v33 = vadd.f32 1.0, %v2248_v60 }
0x14f2   :  { %2249 = vrcp.f32 %v1335_v33  ;;  %v1347_v44 = vand.u32 2147483648, %v1335_v33  ;;  %vm1341_vm4 = vweird.f32 %v1335_v33  ;;  %v1345_v50 = vand.u32 2147483647, %v1335_v33 }
0x14f4   :  { %v1348_v49 = vor.u32 1.1754944e-38, %v1347_v44  ;;  %vm1346_vm6 = vcmp.eq.f32.partialorder %v1345_v50, 8.507059e+37 }
0x14f8   :  { %v2250_v35 = vpop.eup %2249 }
0x14f9   :  { %v1337_v40 = vmul.f32 %v2250_v35, %v1335_v33  ;;  %vm1342_vm1 = vweird.f32 %v2250_v35 }
0x14fa   :  { %vm1343_vm5 = vmor %vm1341_vm4, %vm1342_vm1 }
0x14fb   :  { %v1338_v41 = vsub.f32 1.0, %v1337_v40 }
0x14fd   :  { %v1339_v42 = vmul.f32 %v2250_v35, %v1338_v41 }
0x14ff   :  { %v1340_v43 = vadd.f32 %v2250_v35, %v1339_v42 }
0x1501   :  { %v1344_v58 = vsel %vm1343_vm5, %v2250_v35, %v1340_v43 }
0x1502   :  { %v1349_v6 = vsel %vm1346_vm6, %v1348_v49, %v1344_v58 }
0x1503   :  { %v1356_v37 = vmul.f32 %v1354_v36, %v1349_v6 }
0x1560   :  { %v1359_v3 = vpop.permute.xlu1 %1358 }
0x1561   :  { %v1361_v34 = vmul.f32 %v1359_v3, %v1349_v6 }
0x1563   :  { %1363 = vrot.lane.b32.xlu0 %v1361_v34, %s2551_s3 }
0x156b   :  { %1377 = vrot.lane.b32.xlu0 %v3224_v28, %s2552_s27  ;;  %v2310_v28 = vld [vmem:[#allocation7 + $0x30] sm:$0xff] }
0x15d5   :  { %v1364_v39 = vpop.permute.xlu0 %1363 }
0x15d6   :  { %v1366_v10 = vadd.f32 %v1364_v39, %v1356_v37 }
0x15d8   :  { %2251 = vtanh.f32 %v1366_v10  ;;  %1388 = vrot.lane.b32.xlu0 %v1366_v10, %s2550_s1 }
0x15dd   :  { %v1378_v54 = vpop.permute.xlu0 %1377 }
0x15de   :  { %v2252_v29 = vpop.eup %2251  ;;  %v1381_v15 = vsel %vm814_vm2, %v1380_v9, %v1378_v54  ;;  %v2326_v9 = vld [vmem:[#allocation7 + $0x60] sm:$0xff] }
0x15df   :  { %1369 = vrot.lane.b32.xlu1 %v2252_v29, %s2550_s1 }
0x164a   :  { %v1389_v52 = vpop.permute.xlu0 %1388 }
0x164b   :  { %v1393_v5 = vsel %vm816_vm3, %v1392_v61, %v1389_v52  ;;  %v2323_v52 = vld [vmem:[#allocation7 + $0x78] sm:$0xff] }
0x164c   :  { %1430 = vmatmul.f32.vlgmr.msra.gmra.mxu1 %v1393_v5 }
0x1651   :  { %v1370_v55 = vpop.permute.xlu1 %1369 }
0x1652   :  { %v1372_v12 = vmul.f32 %v1370_v55, %v1349_v6  ;;  %v2325_v55 = vld [vmem:[#allocation7 + $0x68] sm:$0xff] }
0x1654   :  { %v1382_v26 = vsel %vm816_vm3, %v1381_v15, %v1372_v12  ;;  %v2327_v15 = vld [vmem:[#allocation7 + $0x58] sm:$0xff] }
0x1655   :  { %1435 = vrot.lane.b32.xlu1 %v1382_v26, %s2551_s3  ;;  %1410 = vmatmul.f32.vlgmr.msra.gmra.mxu0 %v1382_v26  ;;  %v2328_v26 = vld [vmem:[#allocation7 + $0x50] sm:$0xff] }
0x165d   :  { %1462 = vrot.lane.b32.xlu1 %v1393_v5, %s2551_s3  ;;  %v2324_v5 = vld [vmem:[#allocation7 + $0x70] sm:$0xff] }
0x16c7   :  { %v1436_v7 = vpop.permute.xlu1 %1435 }
0x16c8   :  { %2144 = vmatmul.msk.f32.vlgmr.msra.gmra.mxu2 %vm218_vm0, %v1436_v7  ;;  %v2329_v7 = vld [vmem:[#allocation7 + $0x48] sm:$0xff] }
0x16c9   :  { %1607 = vmatpush.msra.mxu2 %v2309_v16  ;;  %v3269_v20 = vpop.f32.mrf.mxu1  ;;  %v2330_v16 = vld [vmem:[#allocation7 + $0x40] sm:$0xff] }
0x16cb   :  { %1608 = vmatpush.msra.mxu2 %v2310_v28 }
0x16cd   :  { %1609 = vmatpush.msra.mxu2 %v2311_v0 }
0x16cf   :  { %v1463_v8 = vpop.permute.xlu1 %1462  ;;  %1610 = vmatpush.msra.mxu2 %v2312_v22  ;;  %v2331_v22 = vld [vmem:[%s3393_s6 + $0x1] ss:$0 sm:$0xff] }
0x16d0   :  { %2145 = vmatmul.msk.f32.vlgmr.msra.gmra.mxu3 %vm218_vm0, %v1463_v8 }
0x16d1   :  { %1634 = vmatpush.msra.mxu3 %v2313_v1 }
0x16d2   :  { %v3262_v17 = vpop.f32.mrf.mxu0 }
0x16d3   :  { %1635 = vmatpush.msra.mxu3 %v2314_v2 }
0x16d5   :  { %1636 = vmatpush.msra.mxu3 %v2315_v4 }
0x16d7   :  { %1637 = vmatpush.msra.mxu3 %v2316_v13 }
0x174b   :  { %v1456_v18 = vpop.f32.mrf.mxu2 }
0x174c   :  { %v1457_v38 = vadd.f32 %v1456_v18, %v3262_v17 }
0x174e   :  { %v1459_v19 = vadd.f32 %v2317_v25, %v1457_v38  ;;  %v2332_v38 = vld [vmem:[%s3392_s5 + $0x1] ss:$0 sm:$0xff] }
0x1750   :  { %v1460_v48 = vmax.f32 %v1459_v19, 0.0 }
0x1752   :  { %2146 = vmatmul.msk.f32.vlgmr.msrb.gmra.mxu2 %vm218_vm0, %v1460_v48  ;;  %v1618_v48 = vld [vmem:[#allocation2 + $0x48] sm:$0xff] }
0x1753   :  { %v1483_v63 = vpop.f32.mrf.mxu3  ;;  %1704 = vmatpush.msrb.mxu2 %v2318_v45 }
0x1754   :  { %v1484_v24 = vadd.f32 %v1483_v63, %v3269_v20 }
0x1755   :  { %1705 = vmatpush.msrb.mxu2 %v2319_v53 }
0x1756   :  { %v1486_v27 = vadd.f32 %v2320_v21, %v1484_v24 }
0x1757   :  { %1706 = vmatpush.msrb.mxu2 %v2321_v47 }
0x1758   :  { %v1487_v23 = vmax.f32 %v1486_v27, 0.0 }
0x1759   :  { %1707 = vmatpush.msrb.mxu2 %v2322_v11 }
0x175a   :  { %1535 = vrot.lane.b32.xlu0 %v1487_v23, %s2551_s3 }
0x17cc   :  { %v1536_v39 = vpop.permute.xlu0 %1535 }
0x17d5   :  { %v1510_v30 = vpop.f32.mrf.mxu2 }
0x17d6   :  { %v1513_v32 = vadd.f32 %v1510_v30, %v1489_v62 }
0x17d8   :  { %2253 = vtanh.f32 %v1513_v32  ;;  %v2147_v33 = vmul.f32 -1.442695, %v1513_v32 }
0x17da   :  { %2255 = vpow2.f32 %v2147_v33 }
0x17de   :  { %v2254_v60 = vpop.eup %2253 }
0x17df   :  { %1540 = vrot.lane.b32.xlu2 %v2254_v60, %s2550_s1 }
0x17e0   :  { %v2256_v35 = vpop.eup %2255 }
0x17e1   :  { %v1517_v40 = vadd.f32 1.0, %v2256_v35 }
0x17e3   :  { %2257 = vrcp.f32 %v1517_v40  ;;  %v1529_v58 = vand.u32 2147483648, %v1517_v40  ;;  %vm1523_vm3 = vweird.f32 %v1517_v40  ;;  %v1527_v49 = vand.u32 2147483647, %v1517_v40 }
0x17e5   :  { %v1530_v6 = vor.u32 1.1754944e-38, %v1529_v58  ;;  %vm1528_vm8 = vcmp.eq.f32.partialorder %v1527_v49, 8.507059e+37 }
0x17e9   :  { %v2258_v41 = vpop.eup %2257 }
0x17ea   :  { %v1519_v42 = vmul.f32 %v2258_v41, %v1517_v40  ;;  %vm1524_vm2 = vweird.f32 %v2258_v41 }
0x17eb   :  { %vm1525_vm7 = vmor %vm1523_vm3, %vm1524_vm2 }
0x17ec   :  { %v1520_v43 = vsub.f32 1.0, %v1519_v42 }
0x17ee   :  { %v1521_v44 = vmul.f32 %v2258_v41, %v1520_v43 }
0x17f0   :  { %v1522_v50 = vadd.f32 %v2258_v41, %v1521_v44 }
0x17f2   :  { %v1526_v3 = vsel %vm1525_vm7, %v2258_v41, %v1522_v50 }
0x17f3   :  { %v1531_v34 = vsel %vm1528_vm8, %v1530_v6, %v1526_v3 }
0x17f4   :  { %v1538_v10 = vmul.f32 %v1536_v39, %v1531_v34 }
0x1839   :  { %v1541_v36 = vpop.permute.xlu2 %1540 }
0x183a   :  { %v1543_v37 = vmul.f32 %v1541_v36, %v1531_v34  ;;  %v2333_v36 = vld [vmem:[%s3393_s6 + $0x2] ss:$0 sm:$0xff] }
0x183c   :  { %1545 = vrot.lane.b32.xlu1 %v1543_v37, %s2551_s3 }
0x1844   :  { %1559 = vrot.lane.b32.xlu1 %v3262_v17, %s2552_s27 }
0x18ae   :  { %v1546_v29 = vpop.permute.xlu1 %1545 }
0x18af   :  { %v1548_v31 = vadd.f32 %v1546_v29, %v1538_v10 }
0x18b1   :  { %2259 = vtanh.f32 %v1548_v31 }
0x18b6   :  { %v1560_v4 = vpop.permute.xlu1 %1559 }
0x18b7   :  { %v2260_v54 = vpop.eup %2259 }
0x18b8   :  { %1551 = vrot.lane.b32.xlu2 %v2260_v54, %s2550_s1  ;;  %v2334_v54 = vld [vmem:[%s3392_s5 + $0x2] ss:$0 sm:$0xff] }
0x18c0   :  { %1587 = vrot.lane.b32.xlu2 %v1548_v31, %s2552_s27 }
0x1912   :  { %v1552_v57 = vpop.permute.xlu2 %1551 }
0x1913   :  { %v1554_v51 = vmul.f32 %v1552_v57, %v1531_v34 }
0x1915   :  { %1556 = vrot.lane.b32.xlu0 %v1554_v51, %s2551_s3 }
0x191a   :  { %v1588_v61 = vpop.permute.xlu2 %1587 }
0x191b   :  { %2149 = vmatmul.msk.f32.vlgmr.msra.gmra.mxu2 %vm218_vm0, %v1588_v61  ;;  %v1745_v61 = vld [vmem:[#allocation2 + $0x50] sm:$0xff] }
0x191c   :  { %1861 = vmatpush.msra.mxu2 %v2323_v52 }
0x191d   :  { %1590 = vrot.lane.b32.xlu0 %v3269_v20, %s2552_s27 }
0x191e   :  { %1862 = vmatpush.msra.mxu2 %v2324_v5 }
0x1920   :  { %1863 = vmatpush.msra.mxu2 %v2325_v55 }
0x1922   :  { %1864 = vmatpush.msra.mxu2 %v2326_v9 }
0x1987   :  { %v1557_v12 = vpop.permute.xlu0 %1556 }
0x1988   :  { %2148 = vmatmul.msk.f32.vlgmr.msrb.gmra.mxu3 %vm218_vm0, %v1557_v12 }
0x1989   :  { %1734 = vmatpush.msrb.mxu3 %v2327_v15 }
0x198b   :  { %1735 = vmatpush.msrb.mxu3 %v2328_v26 }
0x198d   :  { %1736 = vmatpush.msrb.mxu3 %v2329_v7 }
0x198f   :  { %1737 = vmatpush.msrb.mxu3 %v2330_v16  ;;  %v1591_v28 = vpop.permute.xlu0 %1590 }
0x199e   :  { %v1612_v0 = vpop.f32.mrf.mxu2 }
0x199f   :  { %v1613_v8 = vadd.f32 %v1612_v0, %v1591_v28 }
0x19a1   :  { %v1615_v1 = vadd.f32 %v2331_v22, %v1613_v8 }
0x19a3   :  { %v1616_v2 = vmax.f32 %v1615_v1, 0.0 }
0x19a5   :  { %1664 = vrot.lane.b32.xlu2 %v1616_v2, %s2551_s3 }
0x19ff   :  { %v1665_v35 = vpop.permute.xlu2 %1664 }
0x1a0b   :  { %v1581_v13 = vpop.f32.mrf.mxu3 }
0x1a0c   :  { %v1582_v18 = vadd.f32 %v1581_v13, %v1560_v4 }
0x1a0e   :  { %v1584_v25 = vadd.f32 %v2332_v38, %v1582_v18 }
0x1a10   :  { %v1585_v19 = vmax.f32 %v1584_v25, 0.0 }
0x1a12   :  { %2150 = vmatmul.msk.f32.vlgmr.msra.gmra.mxu3 %vm218_vm0, %v1585_v19 }
0x1a13   :  { %1888 = vmatpush.msra.mxu3 %v3048_v14 }
0x1a15   :  { %1889 = vmatpush.msra.mxu3 %v3062_v46 }
0x1a17   :  { %1890 = vmatpush.msra.mxu3 %v3065_v59 }
0x1a19   :  { %1891 = vmatpush.msra.mxu3 %v3068_v56 }
0x1a95   :  { %v1639_v63 = vpop.f32.mrf.mxu3 }
0x1a96   :  { %v1642_v45 = vadd.f32 %v1639_v63, %v1618_v48 }
0x1a98   :  { %2261 = vtanh.f32 %v1642_v45  ;;  %v2151_v53 = vmul.f32 -1.442695, %v1642_v45 }
0x1a9a   :  { %2263 = vpow2.f32 %v2151_v53 }
0x1a9e   :  { %v2262_v24 = vpop.eup %2261 }
0x1a9f   :  { %1669 = vrot.lane.b32.xlu1 %v2262_v24, %s2550_s1 }
0x1aa0   :  { %v2264_v21 = vpop.eup %2263 }
0x1aa1   :  { %v1646_v27 = vadd.f32 1.0, %v2264_v21 }
0x1aa3   :  { %2265 = vrcp.f32 %v1646_v27  ;;  %v1658_v59 = vand.u32 2147483648, %v1646_v27  ;;  %vm1652_vm10 = vweird.f32 %v1646_v27  ;;  %v1656_v56 = vand.u32 2147483647, %v1646_v27 }
0x1aa5   :  { %v1659_v30 = vor.u32 1.1754944e-38, %v1658_v59  ;;  %vm1657_vm12 = vcmp.eq.f32.partialorder %v1656_v56, 8.507059e+37 }
0x1aa9   :  { %v2266_v47 = vpop.eup %2265 }
0x1aaa   :  { %v1648_v14 = vmul.f32 %v2266_v47, %v1646_v27  ;;  %vm1653_vm9 = vweird.f32 %v2266_v47 }
0x1aab   :  { %vm1654_vm11 = vmor %vm1652_vm10, %vm1653_vm9 }
0x1aac   :  { %v1649_v23 = vsub.f32 1.0, %v1648_v14  ;;  %v2335_v14 = vld [vmem:[%s3393_s6 + $0x3] ss:$0 sm:$0xff] }
0x1aae   :  { %v1650_v46 = vmul.f32 %v2266_v47, %v1649_v23 }
0x1ab0   :  { %v1651_v11 = vadd.f32 %v2266_v47, %v1650_v46 }
0x1ab2   :  { %v1655_v62 = vsel %vm1654_vm11, %v2266_v47, %v1651_v11 }
0x1ab3   :  { %v1660_v60 = vsel %vm1657_vm12, %v1659_v30, %v1655_v62 }
0x1ab4   :  { %v1667_v40 = vmul.f32 %v1665_v35, %v1660_v60 }
0x1b11   :  { %v1670_v32 = vpop.permute.xlu1 %1669 }
0x1b12   :  { %v1672_v33 = vmul.f32 %v1670_v32, %v1660_v60  ;;  %v1872_v32 = vld [vmem:[#allocation2 + $0x58] sm:$0xff] }
0x1b14   :  { %1674 = vrot.lane.b32.xlu0 %v1672_v33, %s2551_s3 }
0x1b1c   :  { %1687 = vrot.lane.b32.xlu0 %v3262_v17, %s2550_s1 }
0x1b86   :  { %v1675_v41 = vpop.permute.xlu0 %1674 }
0x1b87   :  { %v1677_v42 = vadd.f32 %v1675_v41, %v1667_v40 }
0x1b89   :  { %2267 = vtanh.f32 %v1677_v42 }
0x1b8e   :  { %v1688_v10 = vpop.permute.xlu0 %1687 }
0x1b8f   :  { %v2268_v43 = vpop.eup %2267 }
0x1b90   :  { %1680 = vrot.lane.b32.xlu1 %v2268_v43, %s2550_s1 }
0x1b98   :  { %1715 = vrot.lane.b32.xlu1 %v1677_v42, %s2552_s27 }
0x1c02   :  { %v1681_v44 = vpop.permute.xlu1 %1680 }
0x1c03   :  { %v1683_v50 = vmul.f32 %v1681_v44, %v1660_v60 }
0x1c05   :  { %1685 = vrot.lane.b32.xlu2 %v1683_v50, %s2551_s3 }
0x1c0a   :  { %v1716_v58 = vpop.permute.xlu1 %1715 }
0x1c0b   :  { %2153 = vmatmul.msk.f32.vlgmr.msrb.gmra.mxu3 %vm218_vm0, %v1716_v58 }
0x1c0d   :  { %1717 = vrot.lane.b32.xlu2 %v3269_v20, %s2550_s1 }
0x1c5f   :  { %v1686_v49 = vpop.permute.xlu2 %1685 }
0x1c60   :  { %2152 = vmatmul.msk.f32.vlgmr.msrb.gmra.mxu2 %vm218_vm0, %v1686_v49 }
0x1c67   :  { %v1718_v3 = vpop.permute.xlu2 %1717 }
0x1c8e   :  { %v1739_v6 = vpop.f32.mrf.mxu3 }
0x1c8f   :  { %v1740_v34 = vadd.f32 %v1739_v6, %v1718_v3 }
0x1c91   :  { %v1742_v37 = vadd.f32 %v2333_v36, %v1740_v34 }
0x1c93   :  { %v1743_v39 = vmax.f32 %v1742_v37, 0.0 }
0x1c95   :  { %1791 = vrot.lane.b32.xlu1 %v1743_v39, %s2551_s3 }
0x1ce3   :  { %v1709_v29 = vpop.f32.mrf.mxu2 }
0x1ce4   :  { %v1710_v31 = vadd.f32 %v1709_v29, %v1688_v10 }
0x1ce6   :  { %v1712_v57 = vadd.f32 %v2334_v54, %v1710_v31 }
0x1ce8   :  { %v1713_v51 = vmax.f32 %v1712_v57, 0.0 }
0x1cea   :  { %2154 = vmatmul.msk.f32.vlgmr.msrb.gmra.mxu0 %vm218_vm0, %v1713_v51 }
0x1d07   :  { %v1792_v38 = vpop.permute.xlu1 %1791 }
0x1d67   :  { %v1766_v52 = vpop.f32.mrf.mxu0 }
0x1d68   :  { %v1769_v5 = vadd.f32 %v1766_v52, %v1745_v61  ;;  %v1945_v61 = vld [vmem:[%s3396_s9 + $0x18] sm:$0xff]  ;;  %v1944_v52 = vld [vmem:[%s3396_s9 + $0x10] sm:$0xff] }
0x1d69   :  { %1963 = vmatpush.msra.mxu0 %v1945_v61 }
0x1d6a   :  { %2269 = vtanh.f32 %v1769_v5  ;;  %v2155_v9 = vmul.f32 -1.442695, %v1769_v5  ;;  %v1943_v5 = vld [vmem:[%s3396_s9 + $0x8] sm:$0xff] }
0x1d6b   :  { %1964 = vmatpush.msra.mxu0 %v1944_v52 }
0x1d6c   :  { %2271 = vpow2.f32 %v2155_v9  ;;  %v1941_v9 = vld [vmem:[%s3395_s8 + $0x18] sm:$0xff] }
0x1d6d   :  { %1965 = vmatpush.msra.mxu0 %v1943_v5  ;;  %1988 = vmatpush.msra.mxu1 %v1941_v9 }
0x1d70   :  { %v2270_v55 = vpop.eup %2269 }
0x1d71   :  { %1796 = vrot.lane.b32.xlu0 %v2270_v55, %s2550_s1  ;;  %v1942_v55 = vld [vmem:[%s3396_s9] sm:$0xff]  ;;  %s2553_s9 = smov [#allocation14]  }
0x1d72   :  { %v2272_v12 = vpop.eup %2271  ;;  %1966 = vmatpush.msra.mxu0 %v1942_v55  ;;  %s2088_s30 = sshll.u32 %s2553_s9, 4  ;;  %s2089_s30 = int_to_ptr.vmem [resolvable:$true] %s2088_s30 }
0x1d73   :  { %v1773_v15 = vadd.f32 1.0, %v2272_v12  ;;  %v1940_v12 = vld [vmem:[%s3395_s8 + $0x10] sm:$0xff] }
0x1d74   :  { %1989 = vmatpush.msra.mxu1 %v1940_v12 }
0x1d75   :  { %2273 = vrcp.f32 %v1773_v15  ;;  %v1785_v8 = vand.u32 2147483648, %v1773_v15  ;;  %vm1779_vm14 = vweird.f32 %v1773_v15  ;;  %v1783_v22 = vand.u32 2147483647, %v1773_v15 }
0x1d77   :  { %v1786_v2 = vor.u32 1.1754944e-38, %v1785_v8  ;;  %vm1784_vm1 = vcmp.eq.f32.partialorder %v1783_v22, 8.507059e+37  ;;  %v2554_v8 = vmov 8.0  }
0x1d7b   :  { %v2274_v26 = vpop.eup %2273 }
0x1d7c   :  { %v1775_v7 = vmul.f32 %v2274_v26, %v1773_v15  ;;  %vm1780_vm13 = vweird.f32 %v2274_v26  ;;  %v1939_v15 = vld [vmem:[%s3395_s8 + $0x8] sm:$0xff] }
0x1d7d   :  { %vm1781_vm15 = vmor %vm1779_vm14, %vm1780_vm13  ;;  %1990 = vmatpush.msra.mxu1 %v1939_v15 }
0x1d7e   :  { %v1776_v16 = vsub.f32 1.0, %v1775_v7 }
0x1d80   :  { %v1777_v28 = vmul.f32 %v2274_v26, %v1776_v16 }
0x1d82   :  { %v1778_v0 = vadd.f32 %v2274_v26, %v1777_v28 }
0x1d84   :  { %v1782_v1 = vsel %vm1781_vm15, %v2274_v26, %v1778_v0  ;;  %v1938_v26 = vld [vmem:[%s3395_s8] sm:$0xff]  ;;  %s2090_s8 = sshll.u32 %s3401_s14, 4  ;;  %s2091_s8 = int_to_ptr.hbm [resolvable:$true] %s2090_s8 }
0x1d85   :  { %v1787_v13 = vsel %vm1784_vm1, %v1786_v2, %v1782_v1  ;;  %1991 = vmatpush.msra.mxu1 %v1938_v26  ;;  %v2186_v1 = vld [vmem:[%s3397_s10] ss:$0 sm:$0xff] }
0x1d86   :  { %v1794_v25 = vmul.f32 %v1792_v38, %v1787_v13 }
0x1de3   :  { %v1797_v4 = vpop.permute.xlu0 %1796 }
0x1de4   :  { %v1799_v18 = vmul.f32 %v1797_v4, %v1787_v13 }
0x1de6   :  { %1801 = vrot.lane.b32.xlu2 %v1799_v18, %s2551_s3 }
0x1dee   :  { %1814 = vrot.lane.b32.xlu2 %v3262_v17, %s2551_s3 }
0x1e40   :  { %v1802_v19 = vpop.permute.xlu2 %1801 }
0x1e41   :  { %v1804_v48 = vadd.f32 %v1802_v19, %v1794_v25 }
0x1e43   :  { %2275 = vtanh.f32 %v1804_v48 }
0x1e48   :  { %v1815_v11 = vpop.permute.xlu2 %1814 }
0x1e49   :  { %v2276_v63 = vpop.eup %2275 }
0x1e4a   :  { %1807 = vrot.lane.b32.xlu0 %v2276_v63, %s2550_s1 }
0x1e52   :  { %1842 = vrot.lane.b32.xlu0 %v1804_v48, %s2552_s27 }
0x1ebc   :  { %v1808_v45 = vpop.permute.xlu0 %1807 }
0x1ebd   :  { %v1810_v24 = vmul.f32 %v1808_v45, %v1787_v13 }
0x1ebf   :  { %1812 = vrot.lane.b32.xlu1 %v1810_v24, %s2551_s3 }
0x1ec4   :  { %v1843_v53 = vpop.permute.xlu0 %1842 }
0x1ec5   :  { %2157 = vmatmul.msk.f32.vlgmr.msra.gmra.mxu2 %vm218_vm0, %v1843_v53 }
0x1ec7   :  { %1844 = vrot.lane.b32.xlu1 %v3269_v20, %s2551_s3  ;;  %v2336_v20 = vld [vmem:[%s3392_s5 + $0x3] ss:$0 sm:$0xff] }
0x1f31   :  { %v1813_v17 = vpop.permute.xlu1 %1812 }
0x1f32   :  { %2156 = vmatmul.msk.f32.vlgmr.msrb.gmra.mxu1 %vm218_vm0, %v1813_v17 }
0x1f39   :  { %v1845_v21 = vpop.permute.xlu1 %1844 }
0x1f48   :  { %v1866_v27 = vpop.f32.mrf.mxu2 }
0x1f49   :  { %v1867_v47 = vadd.f32 %v1866_v27, %v1845_v21 }
0x1f4b   :  { %v1869_v23 = vadd.f32 %v2335_v14, %v1867_v47 }
0x1f4d   :  { %v1870_v46 = vmax.f32 %v1869_v23, 0.0 }
0x1f4f   :  { %1918 = vrot.lane.b32.xlu0 %v1870_v46, %s2551_s3 }
0x1faf   :  { %v1836_v59 = vpop.f32.mrf.mxu1 }
0x1fb0   :  { %v1837_v56 = vadd.f32 %v1836_v59, %v1815_v11 }
0x1fb2   :  { %v1839_v62 = vadd.f32 %v2336_v20, %v1837_v56 }
0x1fb4   :  { %v1840_v30 = vmax.f32 %v1839_v62, 0.0 }
0x1fb6   :  { %2158 = vmatmul.msk.f32.vlgmr.msra.gmra.mxu3 %vm218_vm0, %v1840_v30 }
0x1fc1   :  { %v1919_v29 = vpop.permute.xlu0 %1918 }
0x2039   :  { %v1893_v60 = vpop.f32.mrf.mxu3 }
0x203a   :  { %v1896_v33 = vadd.f32 %v1893_v60, %v1872_v32 }
0x203c   :  { %2277 = vtanh.f32 %v1896_v33  ;;  %v2159_v40 = vmul.f32 -1.442695, %v1896_v33 }
0x203e   :  { %2279 = vpow2.f32 %v2159_v40 }
0x2042   :  { %v2278_v35 = vpop.eup %2277 }
0x2043   :  { %1923 = vrot.lane.b32.xlu2 %v2278_v35, %s2550_s1 }
0x2044   :  { %v2280_v41 = vpop.eup %2279 }
0x2045   :  { %v1900_v42 = vadd.f32 1.0, %v2280_v41 }
0x2047   :  { %2281 = vrcp.f32 %v1900_v42  ;;  %v1912_v3 = vand.u32 2147483648, %v1900_v42  ;;  %vm1906_vm5 = vweird.f32 %v1900_v42  ;;  %v1910_v6 = vand.u32 2147483647, %v1900_v42 }
0x2049   :  { %v1913_v36 = vor.u32 1.1754944e-38, %v1912_v3  ;;  %vm1911_vm2 = vcmp.eq.f32.partialorder %v1910_v6, 8.507059e+37  ;;  %v2188_v3 = vld [vmem:[%s3399_s12] ss:$0 sm:$0xff]  ;;  %s2079_s12 = sshll.u32 %s3400_s13, 4  ;;  %s2080_s12 = int_to_ptr.hbm [resolvable:$true] %s2079_s12 }
0x204d   :  { %v2282_v43 = vpop.eup %2281 }
0x204e   :  { %v1902_v44 = vmul.f32 %v2282_v43, %v1900_v42  ;;  %vm1907_vm4 = vweird.f32 %v2282_v43 }
0x204f   :  { %vm1908_vm6 = vmor %vm1906_vm5, %vm1907_vm4 }
0x2050   :  { %v1903_v50 = vsub.f32 1.0, %v1902_v44  ;;  %v2187_v44 = vld [vmem:[%s3398_s11] ss:$0 sm:$0xff]  ;;  %s2555_s11 = smov [#allocation13]  }
0x2051   :  { %s2077_s2 = sshll.u32 %s2555_s11, 4  ;;  %s2078_s2 = int_to_ptr.vmem [resolvable:$true] %s2077_s2 }
0x2052   :  { %v1904_v58 = vmul.f32 %v2282_v43, %v1903_v50 }
0x2054   :  { %v1905_v49 = vadd.f32 %v2282_v43, %v1904_v58 }
0x2056   :  { %v1909_v34 = vsel %vm1908_vm6, %v2282_v43, %v1905_v49 }
0x2057   :  { %v1914_v39 = vsel %vm1911_vm2, %v1913_v36, %v1909_v34 }
0x2058   :  { %v1921_v31 = vmul.f32 %v1919_v29, %v1914_v39 }
0x209d   :  { %v1924_v37 = vpop.permute.xlu2 %1923 }
0x209e   :  { %v1926_v10 = vmul.f32 %v1924_v37, %v1914_v39 }
0x20a0   :  { %1928 = vrot.lane.b32.xlu1 %v1926_v10, %s2551_s3 }
0x2112   :  { %v1929_v54 = vpop.permute.xlu1 %1928 }
0x2113   :  { %v1931_v57 = vadd.f32 %v1929_v54, %v1921_v31 }
0x2115   :  { %2283 = vtanh.f32 %v1931_v57  ;;  %1947 = vrot.lane.b32.xlu0 %v1931_v57, %s2552_s27 }
0x2116   :  { %2285 = vrcp.f32 %v2554_v8 }
0x211b   :  { %v2284_v51 = vpop.eup %2283 }
0x211c   :  { %1934 = vrot.lane.b32.xlu2 %v2284_v51, %s2550_s1  ;;  %v2286_v22 = vpop.eup %2285 }
0x211d   :  { %v2011_v18 = vmul.f32 8.0, %v2286_v22  ;;  %vm2015_vm3 = vweird.f32 %v2286_v22 }
0x211f   :  { %v2012_v19 = vsub.f32 1.0, %v2011_v18 }
0x2121   :  { %v2013_v45 = vmul.f32 %v2286_v22, %v2012_v19 }
0x2123   :  { %v2014_v17 = vadd.f32 %v2286_v22, %v2013_v45 }
0x2125   :  { %v2016_v47 = vsel %vm2015_vm3, %v2286_v22, %v2014_v17 }
0x2176   :  { %v1935_v7 = vpop.permute.xlu2 %1934 }
0x2177   :  { %v1937_v16 = vmul.f32 %v1935_v7, %v1914_v39 }
0x2179   :  { %1972 = vrot.lane.b32.xlu1 %v1937_v16, %s2551_s3 }
0x2187   :  { %v1948_v28 = vpop.permute.xlu0 %1947 }
0x2188   :  { %2160 = vmatmul.msk.f32.vlgmr.msra.gmra.mxu0 %vm218_vm0, %v1948_v28 }
0x21eb   :  { %v1973_v0 = vpop.permute.xlu1 %1972 }
0x21ec   :  { %2071 = vst.msk [vmem:[#allocation14] sm:$0xff] %vm218_vm0, %v1973_v0  ;;  %2161 = vmatmul.msk.f32.vlgmr.msra.gmra.mxu1 %vm218_vm0, %v1973_v0  ;;  %vm2002_vm0 = vcmask 64512  }
0x21ed   :  { %2093 = dma.vmem_to_hbm [thread:$0]  %s2089_s30, 128, %s2091_s8, [#allocation15]  }
0x2205   :  { %v1968_v2 = vpop.f32.mrf.mxu0 }
0x2269   :  { %v1993_v4 = vpop.f32.mrf.mxu1 }
0x226a   :  { %v1994_v13 = vadd.f32 %v1993_v4, %v1968_v2 }
0x226c   :  { %v2000_v38 = vadd.f32 %v2186_v1, %v1994_v13 }
0x226e   :  { %v2001_v25 = vmax.f32 %v2000_v38, 0.0 }
0x2270   :  { %v2003_v48 = vsel %vm2002_vm0, %v2001_v25, 0.0 }
0x2271   :  { %v2004_v63 = vrot.slane %v2003_v48, 4 }
0x2273   :  { %v2005_v24 = vadd.f32 %v2004_v63, %v2003_v48 }
0x2275   :  { %v2006_v53 = vrot.slane %v2005_v24, 2 }
0x2277   :  { %v2007_v21 = vadd.f32 %v2006_v53, %v2005_v24 }
0x2279   :  { %v2008_v27 = vrot.slane %v2007_v21, 1 }
0x227b   :  { %v2009_v14 = vadd.f32 %v2008_v27, %v2007_v21 }
0x227d   :  { %v2017_v23 = vmul.f32 %v2016_v47, %v2009_v14 }
0x227f   :  { %v2018_v46 = vsub.f32 %v2001_v25, %v2017_v23 }
0x2281   :  { %v2019_v11 = vmul.f32 %v2018_v46, %v2018_v46  ;;  %v2032_v49 = vmul.f32 %v2187_v44, %v2018_v46 }
0x2283   :  { %v2020_v59 = vsel %vm2002_vm0, %v2019_v11, 0.0 }
0x2284   :  { %v2021_v56 = vrot.slane %v2020_v59, 4 }
0x2286   :  { %v2022_v20 = vadd.f32 %v2021_v56, %v2020_v59 }
0x2288   :  { %v2023_v62 = vrot.slane %v2022_v20, 2 }
0x228a   :  { %v2024_v30 = vadd.f32 %v2023_v62, %v2022_v20 }
0x228c   :  { %v2025_v32 = vrot.slane %v2024_v30, 1 }
0x228e   :  { %v2026_v60 = vadd.f32 %v2025_v32, %v2024_v30 }
0x2290   :  { %v2027_v33 = vmul.f32 %v2026_v60, %v2016_v47 }
0x2292   :  { %v2033_v35 = vadd.f32 1e-05, %v2027_v33 }
0x2294   :  { %2287 = vrsqrt.f32 %v2033_v35  ;;  %vm2040_vm8 = vweird.f32 %v2033_v35 }
0x229a   :  { %v2288_v40 = vpop.eup %2287 }
0x229b   :  { %v2035_v41 = vmul.f32 %v2288_v40, %v2033_v35  ;;  %vm2041_vm7 = vweird.f32 %v2288_v40 }
0x229c   :  { %vm2042_vm9 = vmor %vm2040_vm8, %vm2041_vm7 }
0x229d   :  { %v2036_v42 = vmul.f32 %v2288_v40, %v2035_v41 }
0x229f   :  { %v2037_v43 = vmul.f32 0.5, %v2036_v42 }
0x22a1   :  { %v2038_v50 = vsub.f32 1.5, %v2037_v43 }
0x22a3   :  { %v2039_v58 = vmul.f32 %v2288_v40, %v2038_v50 }
0x22a5   :  { %v2043_v6 = vsel %vm2042_vm9, %v2288_v40, %v2039_v58 }
0x22a6   :  { %v2044_v34 = vmul.f32 %v2043_v6, %v2032_v49 }
0x22a8   :  { %v2049_v36 = vadd.f32 %v2188_v3, %v2044_v34 }
0x22aa   :  { %v2162_v37 = vmul.f32 -1.442695, %v2049_v36 }
0x22ac   :  { %2289 = vpow2.f32 %v2162_v37 }
0x22b2   :  { %v2290_v39 = vpop.eup %2289 }
0x22b3   :  { %v2053_v10 = vadd.f32 1.0, %v2290_v39 }
0x22b5   :  { %2291 = vrcp.f32 %v2053_v10  ;;  %v2065_v57 = vand.u32 2147483648, %v2053_v10  ;;  %v2063_v61 = vand.u32 2147483647, %v2053_v10  ;;  %vm2059_vm11 = vweird.f32 %v2053_v10 }
0x22b7   :  { %v2066_v5 = vor.u32 1.1754944e-38, %v2065_v57  ;;  %vm2064_vm13 = vcmp.eq.f32.partialorder %v2063_v61, 8.507059e+37 }
0x22bb   :  { %v2292_v29 = vpop.eup %2291 }
0x22bc   :  { %v2055_v31 = vmul.f32 %v2292_v29, %v2053_v10  ;;  %vm2060_vm10 = vweird.f32 %v2292_v29 }
0x22bd   :  { %vm2061_vm12 = vmor %vm2059_vm11, %vm2060_vm10 }
0x22be   :  { %v2056_v54 = vsub.f32 1.0, %v2055_v31 }
0x22c0   :  { %v2057_v51 = vmul.f32 %v2292_v29, %v2056_v54 }
0x22c2   :  { %v2058_v52 = vadd.f32 %v2292_v29, %v2057_v51 }
0x22c4   :  { %v2062_v55 = vsel %vm2061_vm12, %v2292_v29, %v2058_v52 }
0x22c5   :  { %v2067_v9 = vsel %vm2064_vm13, %v2066_v5, %v2062_v55 }
0x22c6   :  { %2069 = vst.msk [vmem:[#allocation13] sm:$0xff] %vm2002_vm0, %v2067_v9 }
0x22c7   :  { %2082 = dma.vmem_to_hbm [thread:$0]  %s2078_s2, 128, %s2080_s12, [#allocation4]  }
0x22c8   :  { %2537 = dma.done.wait [#allocation4], 128  }
0x22c9   :  { %2538 = vsyncadd [#allocation4], 4294967168 }
0x22ca   :  { %2539 = dma.done.wait [#allocation15], 128  }
0x22cb   :  { %2540 = vsyncadd [#allocation15], 4294967168 }
0x22cc   :  { %2102 = vsyncpa [#allocation3], 1 }
0x22cd   :  { %2103 = vsyncpa [#allocation6], 1 }
0x22ce   :  { %2104 = vsyncpa [#allocation9], 1 }
0x22cf   :  { %2105 = vsyncpa [#allocation12], 1 }
0x22d0   :  { %2106 = vsyncpa [#allocation4], 1 }
0x22d1   :  { %2107 = vsyncpa [#allocation15], 1 }

</bundles_post_ra>
